<compile_context>
chip_gen: v7x
topology: tpu7x:2x2x1
jax: 0.10.0
libtpu: 0.0.40
codegen_flags: <defaults>
</compile_context>

<pallas_src>
import functools

import numpy as np
import jax
import jax.numpy as jnp
from jax.experimental import pallas as pl
from jax.experimental.pallas import tpu as pltpu


def _ceil_to(x, m):
    return ((x + m - 1) // m) * m


# ----------------------------------------------------------------------------
# Pallas kernel 1: fused multi-level trilinear grid_sample
# (align_corners=True, padding='zeros'); lane-dense (3,T) coords -> (ΣC, T).
# ----------------------------------------------------------------------------
def _multisample_kernel(coords_ref, *refs, level_dims, level_chans, row_offs):
    n_lvl = len(level_dims)
    vol_refs = refs[:n_lvl]
    out_ref = refs[n_lvl]
    T = coords_ref.shape[1]
    gx = coords_ref[0:1, :]      # grid-sample x coordinate -> W axis
    gy = coords_ref[1:2, :]      # y coordinate            -> H axis
    gz = coords_ref[2:3, :]      # z coordinate            -> D axis

    # Hoisted iota, shared by every line_weights call (JAX does not CSE
    # broadcast_in_dim across the unrolled level loop).
    max_n = max(max(d) for d in level_dims)
    iota = jax.lax.broadcasted_iota(jnp.int32, (max_n, T), 0)

    def line_weights(p, n):
        # p: (1, T) continuous voxel coordinate.  Returns (n, T) linear
        # interpolation weights (<=2 nonzeros per column; out-of-range corners
        # match no row, reproducing grid_sample's zeros padding).  Clamp before
        # the int cast so far-out-of-range coords stay well defined.
        p = jnp.clip(p, -2.0, float(n + 1))
        i0f = jnp.floor(p)
        frac = p - i0f
        i0 = i0f.astype(jnp.int32)
        ii = iota[:n, :]
        return (jnp.where(ii == i0, 1.0 - frac, 0.0)
                + jnp.where(ii == i0 + 1, frac, 0.0))

    wcache = {}   # levels with identical resolution share the weight build
    for lvl in range(n_lvl):
        D, H, W = level_dims[lvl]
        C = level_chans[lvl]
        off = row_offs[lvl]
        key = (D, H, W)
        if key not in wcache:
            # align_corners=True mapping from [-1, 1] to voxel coordinates.
            px = (gx + 1.0) * (0.5 * (W - 1))
            py = (gy + 1.0) * (0.5 * (H - 1))
            pz = (gz + 1.0) * (0.5 * (D - 1))
            ox = line_weights(px, W)                               # (W, T)
            oy = line_weights(py, H)                               # (H, T)
            oz = line_weights(pz, D)                               # (D, T)
            # Fused x*y kron weight: row index = y*W + x  (layout-trivial merge,
            # H and W are multiples of 8).
            oxy = (oy[:, None, :] * ox[None, :, :]).reshape(H * W, T)
            wcache[key] = (oxy, oz)
        oxy, oz = wcache[key]
        # Full-depth MXU contraction over the (y, x) plane: K = H*W.
        b = jnp.dot(vol_refs[lvl][...], oxy,
                    preferred_element_type=jnp.float32)            # (C*D, T)
        # Tiny z contraction on the VPU.
        res = jnp.sum(b.reshape(C, D, T) * oz[None, :, :], axis=1)  # (C, T)
        out_ref[off:off + C, :] = res


def multisample_pallas(coords, vols, dims, tile):
    """coords: (3, Np) normalized [-1,1] coords (rows: W-, H-, D-axis coordinate).
    vols[l]: (C_l*D_l, H_l*W_l) volume (rows = (c, z), cols = y*W + x).
    Returns one (ΣC_l, Np) array (levels stacked along rows)."""
    Np = coords.shape[1]
    assert Np % tile == 0
    chans = [v.shape[0] // d[0] for v, d in zip(vols, dims)]
    offs = np.cumsum([0] + chans)
    sum_c = int(offs[-1])
    kern = functools.partial(_multisample_kernel,
                             level_dims=tuple(dims),
                             level_chans=tuple(chans),
                             row_offs=tuple(int(o) for o in offs[:-1]))
    in_specs = [pl.BlockSpec((3, tile), lambda i: (0, i))]
    for v in vols:
        # TODO(synk): for realistic grid sizes on v7x (64 MiB VMEM) switch the
        # big level-0 volume to memory_space=pl.ANY with manual slab DMA (or
        # pipeline_mode=pl.Buffered(1)) instead of a resident constant-index block.
        in_specs.append(pl.BlockSpec(v.shape, lambda i: (0, 0)))
    return pl.pallas_call(
        kern,
        out_shape=jax.ShapeDtypeStruct((sum_c, Np), jnp.float32),
        grid=(Np // tile,),
        in_specs=in_specs,
        out_specs=pl.BlockSpec((sum_c, tile), lambda i: (0, i)),
        compiler_params=pltpu.CompilerParams(
            dimension_semantics=("parallel",),
            vmem_limit_bytes=32 * 1024 * 1024),
    )(coords, *vols)


# ----------------------------------------------------------------------------
# Pallas kernel 2: fused trilinear resize (align_corners=False) + Conv3d(3,1,1)
# as 9 "sandwich" matmuls  out = bias + sum_t B_t @ (grid2 @ RhwS_t^T).
# ----------------------------------------------------------------------------
def _resize_conv_kernel(g_ref, rhws_ref, bmat_ref, bias_ref, out_ref):
    g = g_ref[...]                                           # (Ci*D, H*W)
    acc = jnp.zeros(out_ref.shape, jnp.float32)              # (Co*s, s*s)
    for t in range(9):
        tt = jnp.dot(g, rhws_ref[t],
                     preferred_element_type=jnp.float32)     # (Ci*D, s*s)
        acc = acc + jnp.dot(bmat_ref[t], tt,
                            preferred_element_type=jnp.float32)
    out_ref[...] = acc + bias_ref[...]


def _resize_matrix(in_size, out_size):
    # F.interpolate(mode='trilinear', align_corners=False) 1-D weights.
    scale = in_size / out_size
    j = np.arange(out_size, dtype=np.float64)
    src = (j + 0.5) * scale - 0.5
    src = np.maximum(src, 0.0)
    i0 = np.floor(src).astype(np.int64)
    i0 = np.minimum(i0, in_size - 1)
    i1 = np.minimum(i0 + 1, in_size - 1)
    l1 = src - i0
    l0 = 1.0 - l1
    R = np.zeros((out_size, in_size), dtype=np.float64)
    R[np.arange(out_size), i0] += l0
    R[np.arange(out_size), i1] += l1
    return R


def _shifted_rows(R, k):
    # S[a, :] = R[a + k - 1, :] if 0 <= a+k-1 < n_out else 0   (conv tap shift
    # with zero padding, folded into the resize matrix).
    n_out = R.shape[0]
    S = np.zeros_like(R)
    lo = max(0, 1 - k)
    hi = min(n_out, n_out + 1 - k)
    if hi > lo:
        S[lo:hi] = R[lo + k - 1:hi + k - 1]
    return S


def resize_conv_pallas(grid2, weight, bias, in_dims, out_size):
    """grid2: (Ci*D, H*W), weight: (Co, Ci, 3, 3, 3), bias: (Co,)
    -> (Co*s, s*s) conv(resize(grid)) already in the sampler layout."""
    D, H, W = in_dims
    s = out_size
    Ci = grid2.shape[0] // D
    Co = weight.shape[0]
    Rd = _resize_matrix(D, s)
    Rh = _resize_matrix(H, s)
    Rw = _resize_matrix(W, s)
    RdS = np.stack([_shifted_rows(Rd, kd) for kd in range(3)])          # (3, s, D)
    RhwS_T = np.stack([np.kron(_shifted_rows(Rh, kh), _shifted_rows(Rw, kw)).T
                       for kh in range(3) for kw in range(3)])          # (9, H*W, s*s)
    rhws = jnp.asarray(RhwS_T, jnp.float32)
    # Weight-side prep: fold depth resize + kd taps + channel mixing into 9 tiny
    # (Co*s, Ci*D) matrices.  This is per-weights preprocessing (one small XLA
    # einsum), not per-point data glue.
    w_r = jnp.transpose(weight, (3, 4, 0, 1, 2)).reshape(9, Co, Ci, 3)  # (t,o,c,kd)
    bmat = jnp.einsum('tock,kad->toacd', w_r,
                      jnp.asarray(RdS, jnp.float32)).reshape(9, Co * s, Ci * D)
    bias_rows = jnp.repeat(bias, s).reshape(Co * s, 1)
    return pl.pallas_call(
        _resize_conv_kernel,
        out_shape=jax.ShapeDtypeStruct((Co * s, s * s), jnp.float32),
        in_specs=[pl.BlockSpec(memory_space=pltpu.MemorySpace.VMEM)] * 4,
        out_specs=pl.BlockSpec(memory_space=pltpu.MemorySpace.VMEM),
    )(grid2, rhws, bmat, bias_rows)


# ----------------------------------------------------------------------------
# MultiScaleGrid.forward
# ----------------------------------------------------------------------------
def multi_scale_grid_forward(grid, xyz, weights, biases, grid_size,
                             xyz_min, xyz_max, tile_max=1024):
    C, D, H, W = grid.shape
    shape = xyz.shape[:-1]
    pts = xyz.reshape(-1, 3)
    nrm = (pts - xyz_min) / (xyz_max - xyz_min)
    ind_norm = nrm[:, ::-1] * 2.0 - 1.0            # columns: [W-, H-, D-axis coord]
    coords = jnp.transpose(ind_norm).astype(jnp.float32)     # (3, N), lane-dense
    N = coords.shape[1]
    tile = min(tile_max, _ceil_to(N, 128))
    Np = _ceil_to(N, tile)
    if Np != N:
        coords = jnp.pad(coords, ((0, 0), (0, Np - N)))

    # Level volumes in the sampler layout (rows = (c, z), columns = y*W + x).
    # TODO(synk): optionally cast resident volumes / kron matrices to bf16 on
    # v6e/v7x (full-rate MXU, f32 accumulation) once tolerances are tightened.
    grid2 = grid.reshape(C * D, H * W).astype(jnp.float32)
    vols = [grid2]
    dims = [(D, H, W)]
    for i, s in enumerate(grid_size):
        vols.append(resize_conv_pallas(grid2, weights[i], biases[i], (D, H, W), s))
        dims.append((s, s, s))

    sampled = multisample_pallas(coords, vols, dims, tile)    # (ΣC, Np)
    out = sampled[:, :N].T                                    # (N, ΣC), one transpose
    return out.reshape(*shape, out.shape[-1])


# ----------------------------------------------------------------------------
# NumPy (float64) reference of the same math, for a correctness check.
# ----------------------------------------------------------------------------
def reference_forward_np(grid, xyz, weights, biases, grid_size, xyz_min, xyz_max):
    grid = np.asarray(grid, np.float64)
    xyz = np.asarray(xyz, np.float64)
    xyz_min = np.asarray(xyz_min, np.float64)
    xyz_max = np.asarray(xyz_max, np.float64)
    C, D, H, W = grid.shape
    shape = xyz.shape[:-1]
    pts = xyz.reshape(-1, 3)
    nrm = (pts - xyz_min) / (xyz_max - xyz_min)
    ind_norm = nrm[:, ::-1] * 2.0 - 1.0

    def sample(vol):
        c, d, h, w = vol.shape
        px = (ind_norm[:, 0] + 1.0) * 0.5 * (w - 1)
        py = (ind_norm[:, 1] + 1.0) * 0.5 * (h - 1)
        pz = (ind_norm[:, 2] + 1.0) * 0.5 * (d - 1)
        x0 = np.floor(px).astype(np.int64)
        y0 = np.floor(py).astype(np.int64)
        z0 = np.floor(pz).astype(np.int64)
        fx, fy, fz = px - x0, py - y0, pz - z0
        acc = np.zeros((pts.shape[0], c))
        for dz in (0, 1):
            for dy in (0, 1):
                for dx in (0, 1):
                    ix, iy, iz = x0 + dx, y0 + dy, z0 + dz
                    wt = ((fx if dx else 1 - fx) * (fy if dy else 1 - fy)
                          * (fz if dz else 1 - fz))
                    inb = ((ix >= 0) & (ix < w) & (iy >= 0) & (iy < h)
                           & (iz >= 0) & (iz < d))
                    val = vol[:, np.clip(iz, 0, d - 1),
                              np.clip(iy, 0, h - 1), np.clip(ix, 0, w - 1)]
                    acc += (wt * inb)[:, None] * val.T
        return acc

    outs = [sample(grid)]
    for i, s in enumerate(grid_size):
        Rd, Rh, Rw = _resize_matrix(D, s), _resize_matrix(H, s), _resize_matrix(W, s)
        xs = np.einsum('ad,bh,ew,cdhw->cabe', Rd, Rh, Rw, grid)
        wgt = np.asarray(weights[i], np.float64)
        b = np.asarray(biases[i], np.float64)
        co = wgt.shape[0]
        xp = np.pad(xs, ((0, 0), (1, 1), (1, 1), (1, 1)))
        conv = np.zeros((co, s, s, s)) + b[:, None, None, None]
        for kd in range(3):
            for kh in range(3):
                for kw in range(3):
                    conv += np.einsum('oc,cxyz->oxyz', wgt[:, :, kd, kh, kw],
                                      xp[:, kd:kd + s, kh:kh + s, kw:kw + s])
        outs.append(sample(conv))
    return np.concatenate(outs, -1).reshape(*shape, -1)


# ----------------------------------------------------------------------------
if __name__ == "__main__":
    key = jax.random.PRNGKey(0)
    k1, k2, k3, k4 = jax.random.split(key, 4)

    in_dim = 4
    embed_dim = 4                 # must equal in_dim for the module's reshape to be consistent
    grid_size = [16, 8]           # small multi-scale levels (multiples of 8 keep splits tile-aligned)
    D = H = W = 16

    grid = jax.random.normal(k1, (in_dim, D, H, W), jnp.float32)
    xyz = jax.random.uniform(k2, (2, 128, 3), jnp.float32, minval=-1.0, maxval=1.0)
    xyz_min = jnp.array([-1.0, -1.0, -1.0], jnp.float32)
    xyz_max = jnp.array([1.0, 1.0, 1.0], jnp.float32)

    wkeys = jax.random.split(k3, len(grid_size))
    bkeys = jax.random.split(k4, len(grid_size))
    weights = [0.1 * jax.random.normal(wkeys[i], (embed_dim, in_dim, 3, 3, 3), jnp.float32)
               for i in range(len(grid_size))]
    biases = [0.01 * jax.random.normal(bkeys[i], (embed_dim,), jnp.float32)
              for i in range(len(grid_size))]

    out = multi_scale_grid_forward(grid, xyz, weights, biases, grid_size,
                                   xyz_min, xyz_max)
    out = jax.block_until_ready(out)
    assert out.shape == (2, 128, in_dim * (1 + len(grid_size))), out.shape

    ref = reference_forward_np(grid, xyz, weights, biases, grid_size,
                               xyz_min, xyz_max)
    np.testing.assert_allclose(np.asarray(out), ref, rtol=3e-2, atol=3e-2)

    print("KERNEL_OK")
</pallas_src>

<mosaic_0001>
module attributes {stable_mosaic.version = 11 : i64} {
  func.func @_resize_conv_kernel(%arg0: memref<64x256xf32, #tpu.memory_space<vmem>>, %arg1: memref<9x256x256xf32, #tpu.memory_space<vmem>>, %arg2: memref<9x64x64xf32, #tpu.memory_space<vmem>>, %arg3: memref<64x1xf32, #tpu.memory_space<vmem>>, %arg4: memref<64x256xf32, #tpu.memory_space<vmem>>) attributes {dimension_semantics = [], scalar_prefetch = 0 : i64, scratch_operands = 0 : i64, tpu.core_type = #tpu.core_type<tc>} {
    %c0 = arith.constant 0 : index
    %c0_0 = arith.constant 0 : index
    %0 = vector.load %arg0[%c0, %c0_0] : memref<64x256xf32, #tpu.memory_space<vmem>>, vector<64x256xf32>
    %cst = arith.constant 0.000000e+00 : f32
    %1 = vector.broadcast %cst : f32 to vector<64x256xf32>
    %c0_1 = arith.constant 0 : index
    %c0_2 = arith.constant 0 : index
    %c0_3 = arith.constant 0 : index
    %2 = vector.load %arg1[%c0_1, %c0_2, %c0_3] : memref<9x256x256xf32, #tpu.memory_space<vmem>>, vector<1x256x256xf32>
    %3 = vector.shape_cast %2 : vector<1x256x256xf32> to vector<256x256xf32>
    %cst_4 = arith.constant dense<0.000000e+00> : vector<64x256xf32>
    %4 = tpu.matmul %0, %3, %cst_4 {dimension_numbers = #tpu.dot_dimension_numbers<[1], [0], [0], [1], [0, 0, 1, 1], [], []>} : vector<64x256xf32>, vector<256x256xf32>, vector<64x256xf32> -> vector<64x256xf32>
    %c0_5 = arith.constant 0 : index
    %c0_6 = arith.constant 0 : index
    %c0_7 = arith.constant 0 : index
    %5 = vector.load %arg2[%c0_5, %c0_6, %c0_7] : memref<9x64x64xf32, #tpu.memory_space<vmem>>, vector<1x64x64xf32>
    %6 = vector.shape_cast %5 : vector<1x64x64xf32> to vector<64x64xf32>
    %cst_8 = arith.constant dense<0.000000e+00> : vector<64x256xf32>
    %7 = tpu.matmul %6, %4, %cst_8 {dimension_numbers = #tpu.dot_dimension_numbers<[1], [0], [0], [1], [0, 0, 1, 1], [], []>} : vector<64x64xf32>, vector<64x256xf32>, vector<64x256xf32> -> vector<64x256xf32>
    %8 = arith.addf %1, %7 : vector<64x256xf32>
    %c1 = arith.constant 1 : index
    %c0_9 = arith.constant 0 : index
    %c0_10 = arith.constant 0 : index
    %9 = vector.load %arg1[%c1, %c0_9, %c0_10] : memref<9x256x256xf32, #tpu.memory_space<vmem>>, vector<1x256x256xf32>
    %10 = vector.shape_cast %9 : vector<1x256x256xf32> to vector<256x256xf32>
    %cst_11 = arith.constant dense<0.000000e+00> : vector<64x256xf32>
    %11 = tpu.matmul %0, %10, %cst_11 {dimension_numbers = #tpu.dot_dimension_numbers<[1], [0], [0], [1], [0, 0, 1, 1], [], []>} : vector<64x256xf32>, vector<256x256xf32>, vector<64x256xf32> -> vector<64x256xf32>
    %c1_12 = arith.constant 1 : index
    %c0_13 = arith.constant 0 : index
    %c0_14 = arith.constant 0 : index
    %12 = vector.load %arg2[%c1_12, %c0_13, %c0_14] : memref<9x64x64xf32, #tpu.memory_space<vmem>>, vector<1x64x64xf32>
    %13 = vector.shape_cast %12 : vector<1x64x64xf32> to vector<64x64xf32>
    %cst_15 = arith.constant dense<0.000000e+00> : vector<64x256xf32>
    %14 = tpu.matmul %13, %11, %cst_15 {dimension_numbers = #tpu.dot_dimension_numbers<[1], [0], [0], [1], [0, 0, 1, 1], [], []>} : vector<64x64xf32>, vector<64x256xf32>, vector<64x256xf32> -> vector<64x256xf32>
    %15 = arith.addf %8, %14 : vector<64x256xf32>
    %c2 = arith.constant 2 : index
    %c0_16 = arith.constant 0 : index
    %c0_17 = arith.constant 0 : index
    %16 = vector.load %arg1[%c2, %c0_16, %c0_17] : memref<9x256x256xf32, #tpu.memory_space<vmem>>, vector<1x256x256xf32>
    %17 = vector.shape_cast %16 : vector<1x256x256xf32> to vector<256x256xf32>
    %cst_18 = arith.constant dense<0.000000e+00> : vector<64x256xf32>
    %18 = tpu.matmul %0, %17, %cst_18 {dimension_numbers = #tpu.dot_dimension_numbers<[1], [0], [0], [1], [0, 0, 1, 1], [], []>} : vector<64x256xf32>, vector<256x256xf32>, vector<64x256xf32> -> vector<64x256xf32>
    %c2_19 = arith.constant 2 : index
    %c0_20 = arith.constant 0 : index
    %c0_21 = arith.constant 0 : index
    %19 = vector.load %arg2[%c2_19, %c0_20, %c0_21] : memref<9x64x64xf32, #tpu.memory_space<vmem>>, vector<1x64x64xf32>
    %20 = vector.shape_cast %19 : vector<1x64x64xf32> to vector<64x64xf32>
    %cst_22 = arith.constant dense<0.000000e+00> : vector<64x256xf32>
    %21 = tpu.matmul %20, %18, %cst_22 {dimension_numbers = #tpu.dot_dimension_numbers<[1], [0], [0], [1], [0, 0, 1, 1], [], []>} : vector<64x64xf32>, vector<64x256xf32>, vector<64x256xf32> -> vector<64x256xf32>
    %22 = arith.addf %15, %21 : vector<64x256xf32>
    %c3 = arith.constant 3 : index
    %c0_23 = arith.constant 0 : index
    %c0_24 = arith.constant 0 : index
    %23 = vector.load %arg1[%c3, %c0_23, %c0_24] : memref<9x256x256xf32, #tpu.memory_space<vmem>>, vector<1x256x256xf32>
    %24 = vector.shape_cast %23 : vector<1x256x256xf32> to vector<256x256xf32>
    %cst_25 = arith.constant dense<0.000000e+00> : vector<64x256xf32>
    %25 = tpu.matmul %0, %24, %cst_25 {dimension_numbers = #tpu.dot_dimension_numbers<[1], [0], [0], [1], [0, 0, 1, 1], [], []>} : vector<64x256xf32>, vector<256x256xf32>, vector<64x256xf32> -> vector<64x256xf32>
    %c3_26 = arith.constant 3 : index
    %c0_27 = arith.constant 0 : index
    %c0_28 = arith.constant 0 : index
    %26 = vector.load %arg2[%c3_26, %c0_27, %c0_28] : memref<9x64x64xf32, #tpu.memory_space<vmem>>, vector<1x64x64xf32>
    %27 = vector.shape_cast %26 : vector<1x64x64xf32> to vector<64x64xf32>
    %cst_29 = arith.constant dense<0.000000e+00> : vector<64x256xf32>
    %28 = tpu.matmul %27, %25, %cst_29 {dimension_numbers = #tpu.dot_dimension_numbers<[1], [0], [0], [1], [0, 0, 1, 1], [], []>} : vector<64x64xf32>, vector<64x256xf32>, vector<64x256xf32> -> vector<64x256xf32>
    %29 = arith.addf %22, %28 : vector<64x256xf32>
    %c4 = arith.constant 4 : index
    %c0_30 = arith.constant 0 : index
    %c0_31 = arith.constant 0 : index
    %30 = vector.load %arg1[%c4, %c0_30, %c0_31] : memref<9x256x256xf32, #tpu.memory_space<vmem>>, vector<1x256x256xf32>
    %31 = vector.shape_cast %30 : vector<1x256x256xf32> to vector<256x256xf32>
    %cst_32 = arith.constant dense<0.000000e+00> : vector<64x256xf32>
    %32 = tpu.matmul %0, %31, %cst_32 {dimension_numbers = #tpu.dot_dimension_numbers<[1], [0], [0], [1], [0, 0, 1, 1], [], []>} : vector<64x256xf32>, vector<256x256xf32>, vector<64x256xf32> -> vector<64x256xf32>
    %c4_33 = arith.constant 4 : index
    %c0_34 = arith.constant 0 : index
    %c0_35 = arith.constant 0 : index
    %33 = vector.load %arg2[%c4_33, %c0_34, %c0_35] : memref<9x64x64xf32, #tpu.memory_space<vmem>>, vector<1x64x64xf32>
    %34 = vector.shape_cast %33 : vector<1x64x64xf32> to vector<64x64xf32>
    %cst_36 = arith.constant dense<0.000000e+00> : vector<64x256xf32>
    %35 = tpu.matmul %34, %32, %cst_36 {dimension_numbers = #tpu.dot_dimension_numbers<[1], [0], [0], [1], [0, 0, 1, 1], [], []>} : vector<64x64xf32>, vector<64x256xf32>, vector<64x256xf32> -> vector<64x256xf32>
    %36 = arith.addf %29, %35 : vector<64x256xf32>
    %c5 = arith.constant 5 : index
    %c0_37 = arith.constant 0 : index
    %c0_38 = arith.constant 0 : index
    %37 = vector.load %arg1[%c5, %c0_37, %c0_38] : memref<9x256x256xf32, #tpu.memory_space<vmem>>, vector<1x256x256xf32>
    %38 = vector.shape_cast %37 : vector<1x256x256xf32> to vector<256x256xf32>
    %cst_39 = arith.constant dense<0.000000e+00> : vector<64x256xf32>
    %39 = tpu.matmul %0, %38, %cst_39 {dimension_numbers = #tpu.dot_dimension_numbers<[1], [0], [0], [1], [0, 0, 1, 1], [], []>} : vector<64x256xf32>, vector<256x256xf32>, vector<64x256xf32> -> vector<64x256xf32>
    %c5_40 = arith.constant 5 : index
    %c0_41 = arith.constant 0 : index
    %c0_42 = arith.constant 0 : index
    %40 = vector.load %arg2[%c5_40, %c0_41, %c0_42] : memref<9x64x64xf32, #tpu.memory_space<vmem>>, vector<1x64x64xf32>
    %41 = vector.shape_cast %40 : vector<1x64x64xf32> to vector<64x64xf32>
    %cst_43 = arith.constant dense<0.000000e+00> : vector<64x256xf32>
    %42 = tpu.matmul %41, %39, %cst_43 {dimension_numbers = #tpu.dot_dimension_numbers<[1], [0], [0], [1], [0, 0, 1, 1], [], []>} : vector<64x64xf32>, vector<64x256xf32>, vector<64x256xf32> -> vector<64x256xf32>
    %43 = arith.addf %36, %42 : vector<64x256xf32>
    %c6 = arith.constant 6 : index
    %c0_44 = arith.constant 0 : index
    %c0_45 = arith.constant 0 : index
    %44 = vector.load %arg1[%c6, %c0_44, %c0_45] : memref<9x256x256xf32, #tpu.memory_space<vmem>>, vector<1x256x256xf32>
    %45 = vector.shape_cast %44 : vector<1x256x256xf32> to vector<256x256xf32>
    %cst_46 = arith.constant dense<0.000000e+00> : vector<64x256xf32>
    %46 = tpu.matmul %0, %45, %cst_46 {dimension_numbers = #tpu.dot_dimension_numbers<[1], [0], [0], [1], [0, 0, 1, 1], [], []>} : vector<64x256xf32>, vector<256x256xf32>, vector<64x256xf32> -> vector<64x256xf32>
    %c6_47 = arith.constant 6 : index
    %c0_48 = arith.constant 0 : index
    %c0_49 = arith.constant 0 : index
    %47 = vector.load %arg2[%c6_47, %c0_48, %c0_49] : memref<9x64x64xf32, #tpu.memory_space<vmem>>, vector<1x64x64xf32>
    %48 = vector.shape_cast %47 : vector<1x64x64xf32> to vector<64x64xf32>
    %cst_50 = arith.constant dense<0.000000e+00> : vector<64x256xf32>
    %49 = tpu.matmul %48, %46, %cst_50 {dimension_numbers = #tpu.dot_dimension_numbers<[1], [0], [0], [1], [0, 0, 1, 1], [], []>} : vector<64x64xf32>, vector<64x256xf32>, vector<64x256xf32> -> vector<64x256xf32>
    %50 = arith.addf %43, %49 : vector<64x256xf32>
    %c7 = arith.constant 7 : index
    %c0_51 = arith.constant 0 : index
    %c0_52 = arith.constant 0 : index
    %51 = vector.load %arg1[%c7, %c0_51, %c0_52] : memref<9x256x256xf32, #tpu.memory_space<vmem>>, vector<1x256x256xf32>
    %52 = vector.shape_cast %51 : vector<1x256x256xf32> to vector<256x256xf32>
    %cst_53 = arith.constant dense<0.000000e+00> : vector<64x256xf32>
    %53 = tpu.matmul %0, %52, %cst_53 {dimension_numbers = #tpu.dot_dimension_numbers<[1], [0], [0], [1], [0, 0, 1, 1], [], []>} : vector<64x256xf32>, vector<256x256xf32>, vector<64x256xf32> -> vector<64x256xf32>
    %c7_54 = arith.constant 7 : index
    %c0_55 = arith.constant 0 : index
    %c0_56 = arith.constant 0 : index
    %54 = vector.load %arg2[%c7_54, %c0_55, %c0_56] : memref<9x64x64xf32, #tpu.memory_space<vmem>>, vector<1x64x64xf32>
    %55 = vector.shape_cast %54 : vector<1x64x64xf32> to vector<64x64xf32>
    %cst_57 = arith.constant dense<0.000000e+00> : vector<64x256xf32>
    %56 = tpu.matmul %55, %53, %cst_57 {dimension_numbers = #tpu.dot_dimension_numbers<[1], [0], [0], [1], [0, 0, 1, 1], [], []>} : vector<64x64xf32>, vector<64x256xf32>, vector<64x256xf32> -> vector<64x256xf32>
    %57 = arith.addf %50, %56 : vector<64x256xf32>
    %c8 = arith.constant 8 : index
    %c0_58 = arith.constant 0 : index
    %c0_59 = arith.constant 0 : index
    %58 = vector.load %arg1[%c8, %c0_58, %c0_59] : memref<9x256x256xf32, #tpu.memory_space<vmem>>, vector<1x256x256xf32>
    %59 = vector.shape_cast %58 : vector<1x256x256xf32> to vector<256x256xf32>
    %cst_60 = arith.constant dense<0.000000e+00> : vector<64x256xf32>
    %60 = tpu.matmul %0, %59, %cst_60 {dimension_numbers = #tpu.dot_dimension_numbers<[1], [0], [0], [1], [0, 0, 1, 1], [], []>} : vector<64x256xf32>, vector<256x256xf32>, vector<64x256xf32> -> vector<64x256xf32>
    %c8_61 = arith.constant 8 : index
    %c0_62 = arith.constant 0 : index
    %c0_63 = arith.constant 0 : index
    %61 = vector.load %arg2[%c8_61, %c0_62, %c0_63] : memref<9x64x64xf32, #tpu.memory_space<vmem>>, vector<1x64x64xf32>
    %62 = vector.shape_cast %61 : vector<1x64x64xf32> to vector<64x64xf32>
    %cst_64 = arith.constant dense<0.000000e+00> : vector<64x256xf32>
    %63 = tpu.matmul %62, %60, %cst_64 {dimension_numbers = #tpu.dot_dimension_numbers<[1], [0], [0], [1], [0, 0, 1, 1], [], []>} : vector<64x64xf32>, vector<64x256xf32>, vector<64x256xf32> -> vector<64x256xf32>
    %64 = arith.addf %57, %63 : vector<64x256xf32>
    %c0_65 = arith.constant 0 : index
    %c0_66 = arith.constant 0 : index
    %65 = vector.load %arg3[%c0_65, %c0_66] : memref<64x1xf32, #tpu.memory_space<vmem>>, vector<64x1xf32>
    %66 = vector.broadcast %65 : vector<64x1xf32> to vector<64x256xf32>
    %67 = arith.addf %64, %66 : vector<64x256xf32>
    %c0_67 = arith.constant 0 : index
    %c0_68 = arith.constant 0 : index
    %68 = vector.load %arg4[%c0_67, %c0_68] : memref<64x256xf32, #tpu.memory_space<vmem>>, vector<64x256xf32>
    tpu.vector_store %arg4[%c0_67, %c0_68], %67 {strides = array<i32>} : memref<64x256xf32, #tpu.memory_space<vmem>>, vector<64x256xf32>,
    return
  }
}

</mosaic_0001>

<bundles_post_ra>
// kernel: tpu_custom_call.1
= control target key start
LH: loop header
LB: loop body
LE: loop exit
PB: predicated region body
PF: predicated region fallthrough
CT: control target
= control target key end

     0   :  { %9 = vsyncpa [#allocation3], 0  ;;  %s5032_s0 = inlined_call_operand.hbm [shape: f32[64,256], index: 0, kind: input, shape index: {}]   ;;  %s5033_s1 = inlined_call_operand.hbm [shape: f32[9,256,256], index: 1, kind: input, shape index: {}]   ;;  %s5034_s2 = inlined_call_operand.hbm [shape: f32[9,64,64], index: 2, kind: input, shape index: {}]   ;;  %s5035_s3 = inlined_call_operand.vmem [shape: f32[64,1], index: 3, kind: input, shape index: {}]   ;;  %s5036_s4 = inlined_call_operand.hbm [shape: f32[64,256], index: 4, kind: output, shape index: {}]  }
   0x1   :  { %10 = vsyncpa [#allocation6], 0 }
   0x2   :  { %11 = vsyncpa [#allocation4], 0  ;;  %s4259_s15 = smov [#allocation5]   ;;  %s4260_s17 = smov [#allocation2]  }
   0x3   :  { %s29_s16 = sshll.u32 %s4259_s15, 4  ;;  %s17_s18 = sshll.u32 %s4260_s17, 4  ;;  %s30_s16 = int_to_ptr.vmem [resolvable:$true] %s29_s16  ;;  %s4294_s18 = int_to_ptr.vmem [resolvable:$true] %s17_s18 }
   0x4   :  { %s4165_s21 = scalar_lea.hbm %s5033_s1, 73728 }
   0x5   :  { %p4166_p0 = scmp.ne.s32.totalorder %s5033_s1, %s4165_s21  ;;  %p4169_p1 = scmp.lt.u32.totalorder %s4165_s21, %s5033_s1 }
   0x7   :  { %p4171_p2 = pnand %p4169_p1, %p4166_p0 }
   0x9   :  { %4174 = shalt.err (!%p4171_p2)
}
   0xa   :  { %s4175_s26 = scalar_lea.vmem %s30_s16, 73728  ;;  %p4180_p4 = scmp.lt.s32.totalorder %s30_s16, %s30_s16 }
   0xb   :  { %p4176_p3 = scmp.ne.s32.totalorder %s30_s16, %s4175_s26  ;;  %p4181_p5 = scmp.lt.s32.totalorder %s4175_s26, %s4175_s26 }
   0xd   :  { %p4182_p6 = por %p4181_p5, %p4180_p4 }
   0xf   :  { %p4183_p7 = pnand %p4182_p6, %p4176_p3 }
  0x11   :  { %4186 = shalt.err (!%p4183_p7)
}
  0x12   :  { %s4261_s27 = smov 256   ;;  %s4262_s28 = smov 16  }
  0x13   :  { %35 = dma.hbm_to_vmem [thread:$0]  %s5033_s1, 73728, %s30_s16, [#allocation6], %s4261_s27, %s4261_s27, %s4262_s28  }
  0x14   :  { %s4187_s7 = scalar_lea.hbm %s5032_s0, 2048 }
  0x15   :  { %p4188_p8 = scmp.ne.s32.totalorder %s5032_s0, %s4187_s7  ;;  %p4191_p9 = scmp.lt.u32.totalorder %s4187_s7, %s5032_s0 }
  0x17   :  { %p4193_p10 = pnand %p4191_p9, %p4188_p8 }
  0x19   :  { %4196 = shalt.err (!%p4193_p10)
}
  0x1a   :  { %s4197_s12 = scalar_lea.vmem %s4294_s18, 2048  ;;  %p4202_p12 = scmp.lt.s32.totalorder %s4294_s18, %s4294_s18 }
  0x1b   :  { %p4198_p11 = scmp.ne.s32.totalorder %s4294_s18, %s4197_s12  ;;  %p4203_p13 = scmp.lt.s32.totalorder %s4197_s12, %s4197_s12 }
  0x1d   :  { %p4204_p0 = por %p4203_p13, %p4202_p12 }
  0x1f   :  { %p4205_p1 = pnand %p4204_p0, %p4198_p11 }
  0x21   :  { %4208 = shalt.err (!%p4205_p1)
}
  0x22   :  { %23 = dma.hbm_to_vmem [thread:$0]  %s5032_s0, 2048, %s4294_s18, [#allocation3], %s4261_s27, %s4261_s27, %s4262_s28  }
  0x23   :  { %s4263_s14 = smov [#allocation7]   ;;  %s4209_s19 = scalar_lea.hbm %s5034_s2, 9216 }
  0x24   :  { %s41_s15 = sshll.u32 %s4263_s14, 4  ;;  %p4210_p2 = scmp.ne.s32.totalorder %s5034_s2, %s4209_s19  ;;  %s42_s15 = int_to_ptr.vmem [resolvable:$true] %s41_s15 }
  0x25   :  { %p4213_p3 = scmp.lt.u32.totalorder %s4209_s19, %s5034_s2 }
  0x27   :  { %p4215_p4 = pnand %p4213_p3, %p4210_p2 }
  0x29   :  { %4218 = shalt.err (!%p4215_p4)
}
  0x2a   :  { %s4219_s24 = scalar_lea.vmem %s42_s15, 9216  ;;  %p4224_p6 = scmp.lt.s32.totalorder %s42_s15, %s42_s15 }
  0x2b   :  { %p4220_p5 = scmp.ne.s32.totalorder %s42_s15, %s4219_s24  ;;  %p4225_p7 = scmp.lt.s32.totalorder %s4219_s24, %s4219_s24 }
  0x2d   :  { %p4226_p8 = por %p4225_p7, %p4224_p6 }
  0x2f   :  { %p4227_p9 = pnand %p4226_p8, %p4220_p5 }
  0x31   :  { %4230 = shalt.err (!%p4227_p9)
}
  0x32   :  { %s4264_s0 = smov 128   ;;  %s4265_s18 = smov 8  }
  0x33   :  { %47 = dma.hbm_to_vmem [thread:$0]  %s5034_s2, 9216, %s42_s15, [#allocation6], %s4264_s0, %s4264_s0, %s4265_s18  }
  0x34   :  { %4253 = dma.done.wait [#allocation3], 2048  }
  0x35   :  { %4254 = vsyncadd [#allocation3], 4294965248 }
  0x36   :  { %4255 = dma.done.wait [#allocation6], 82944  }
  0x37   :  { %4256 = vsyncadd [#allocation6], 4294884352  ;;  %v76_v0 = vld [vmem:[#allocation5 + $0x8] sm:$0xff]  ;;  %v78_v1 = vld [vmem:[#allocation5 + $0x18] sm:$0xff]  ;;  %vm447_vm0 = vcmask 523264  }
  0x38   :  { %v75_v2 = vld [vmem:[#allocation5] sm:$0xff]  ;;  %v3272_v3 = vpack.c.bf16 %v78_v1, %v76_v0  ;;  %v77_v4 = vld [vmem:[#allocation5 + $0x10] sm:$0xff]  ;;  %v80_v5 = vld [vmem:[#allocation5 + $0x28] sm:$0xff] }
  0x39   :  { %v82_v6 = vld [vmem:[#allocation5 + $0x38] sm:$0xff]  ;;  %v3274_v7 = vpack.c.bf16 %v77_v4, %v75_v2  ;;  %v79_v9 = vld [vmem:[#allocation5 + $0x20] sm:$0xff]  ;;  %v81_v10 = vld [vmem:[#allocation5 + $0x30] sm:$0xff] }
  0x3a   :  { %v3276_v8 = vpack.c.bf16 %v82_v6, %v80_v5  ;;  %v84_v11 = vld [vmem:[#allocation5 + $0x48] sm:$0xff]  ;;  %3273 = vmatprep.subr.bf16.mxu1 %v3272_v3  ;;  %v86_v12 = vld [vmem:[#allocation5 + $0x58] sm:$0xff]  ;;  %v3278_v13 = vpack.c.bf16 %v81_v10, %v79_v9  ;;  %v83_v15 = vld [vmem:[#allocation5 + $0x40] sm:$0xff] }
  0x3b   :  { %3275 = vmatpush1.bf16.msra.mxu1 %v3274_v7  ;;  %v3280_v14 = vpack.c.bf16 %v86_v12, %v84_v11  ;;  %v85_v16 = vld [vmem:[#allocation5 + $0x50] sm:$0xff]  ;;  %v88_v17 = vld [vmem:[#allocation5 + $0x68] sm:$0xff]  ;;  %v90_v18 = vld [vmem:[#allocation5 + $0x78] sm:$0xff] }
  0x3c   :  { %3277 = vmatprep.subr.bf16.mxu1 %v3276_v8  ;;  %v3282_v19 = vpack.c.bf16 %v85_v16, %v83_v15  ;;  %v3284_v20 = vpack.c.bf16 %v90_v18, %v88_v17  ;;  %v87_v21 = vld [vmem:[#allocation5 + $0x60] sm:$0xff]  ;;  %v89_v22 = vld [vmem:[#allocation5 + $0x70] sm:$0xff]  ;;  %v92_v23 = vld [vmem:[#allocation5 + $0x88] sm:$0xff] }
  0x3d   :  { %v94_v24 = vld [vmem:[#allocation5 + $0x98] sm:$0xff]  ;;  %v3286_v25 = vpack.c.bf16 %v89_v22, %v87_v21  ;;  %v91_v27 = vld [vmem:[#allocation5 + $0x80] sm:$0xff]  ;;  %v93_v28 = vld [vmem:[#allocation5 + $0x90] sm:$0xff] }
  0x3e   :  { %v3288_v26 = vpack.c.bf16 %v94_v24, %v92_v23  ;;  %v96_v29 = vld [vmem:[#allocation5 + $0xa8] sm:$0xff]  ;;  %v98_v30 = vld [vmem:[#allocation5 + $0xb8] sm:$0xff]  ;;  %v3290_v31 = vpack.c.bf16 %v93_v28, %v91_v27  ;;  %v95_v33 = vld [vmem:[#allocation5 + $0xa0] sm:$0xff] }
  0x3f   :  { %3279 = vmatpush1.bf16.msra.mxu1 %v3278_v13  ;;  %v3292_v32 = vpack.c.bf16 %v98_v30, %v96_v29  ;;  %v97_v34 = vld [vmem:[#allocation5 + $0xb0] sm:$0xff]  ;;  %v100_v35 = vld [vmem:[#allocation5 + $0xc8] sm:$0xff]  ;;  %v102_v36 = vld [vmem:[#allocation5 + $0xd8] sm:$0xff] }
  0x40   :  { %3281 = vmatprep.subr.bf16.mxu1 %v3280_v14  ;;  %v3294_v37 = vpack.c.bf16 %v97_v34, %v95_v33  ;;  %v3296_v38 = vpack.c.bf16 %v102_v36, %v100_v35  ;;  %v99_v39 = vld [vmem:[#allocation5 + $0xc0] sm:$0xff]  ;;  %v101_v40 = vld [vmem:[#allocation5 + $0xd0] sm:$0xff]  ;;  %v4343_v41 = vld [vmem:[#allocation2 + $0x8] sm:$0xff] }
  0x41   :  { %v104_v42 = vld [vmem:[#allocation5 + $0xe8] sm:$0xff]  ;;  %v106_v43 = vld [vmem:[#allocation5 + $0xf8] sm:$0xff]  ;;  %203 = vmatprep.mubr.f32.mxu1 %v4343_v41  ;;  %v3298_v44 = vpack.c.bf16 %v101_v40, %v99_v39  ;;  %v103_v46 = vld [vmem:[#allocation5 + $0xe0] sm:$0xff] }
  0x42   :  { %v3300_v45 = vpack.c.bf16 %v106_v43, %v104_v42  ;;  %v105_v47 = vld [vmem:[#allocation5 + $0xf0] sm:$0xff]  ;;  %v108_v48 = vld [vmem:[#allocation5 + $0x108] sm:$0xff]  ;;  %v110_v49 = vld [vmem:[#allocation5 + $0x118] sm:$0xff] }
  0x43   :  { %3283 = vmatpush1.bf16.msra.mxu1 %v3282_v19  ;;  %v3302_v50 = vpack.c.bf16 %v105_v47, %v103_v46  ;;  %v3304_v51 = vpack.c.bf16 %v110_v49, %v108_v48  ;;  %v107_v52 = vld [vmem:[#allocation5 + $0x100] sm:$0xff]  ;;  %v109_v53 = vld [vmem:[#allocation5 + $0x110] sm:$0xff]  ;;  %v112_v54 = vld [vmem:[#allocation5 + $0x128] sm:$0xff] }
  0x44   :  { %3285 = vmatprep.subr.bf16.mxu1 %v3284_v20  ;;  %v114_v55 = vld [vmem:[#allocation5 + $0x138] sm:$0xff]  ;;  %v3306_v56 = vpack.c.bf16 %v109_v53, %v107_v52  ;;  %v111_v58 = vld [vmem:[#allocation5 + $0x120] sm:$0xff]  ;;  %v113_v59 = vld [vmem:[#allocation5 + $0x130] sm:$0xff] }
  0x45   :  { %v3308_v57 = vpack.c.bf16 %v114_v55, %v112_v54  ;;  %v116_v60 = vld [vmem:[#allocation5 + $0x148] sm:$0xff]  ;;  %v118_v61 = vld [vmem:[#allocation5 + $0x158] sm:$0xff]  ;;  %v3310_v62 = vpack.c.bf16 %v113_v59, %v111_v58  ;;  %v115_v0 = vld [vmem:[#allocation5 + $0x140] sm:$0xff] }
  0x46   :  { %v3312_v63 = vpack.c.bf16 %v118_v61, %v116_v60  ;;  %v117_v1 = vld [vmem:[#allocation5 + $0x150] sm:$0xff]  ;;  %v120_v2 = vld [vmem:[#allocation5 + $0x168] sm:$0xff]  ;;  %v122_v3 = vld [vmem:[#allocation5 + $0x178] sm:$0xff] }
  0x47   :  { %3287 = vmatpush1.bf16.msra.mxu1 %v3286_v25  ;;  %v3314_v4 = vpack.c.bf16 %v117_v1, %v115_v0  ;;  %v3316_v5 = vpack.c.bf16 %v122_v3, %v120_v2  ;;  %v119_v6 = vld [vmem:[#allocation5 + $0x160] sm:$0xff]  ;;  %v121_v7 = vld [vmem:[#allocation5 + $0x170] sm:$0xff]  ;;  %v124_v8 = vld [vmem:[#allocation5 + $0x188] sm:$0xff] }
  0x48   :  { %3289 = vmatprep.subr.bf16.mxu1 %v3288_v26  ;;  %v126_v9 = vld [vmem:[#allocation5 + $0x198] sm:$0xff]  ;;  %v3318_v10 = vpack.c.bf16 %v121_v7, %v119_v6  ;;  %v123_v12 = vld [vmem:[#allocation5 + $0x180] sm:$0xff]  ;;  %v125_v13 = vld [vmem:[#allocation5 + $0x190] sm:$0xff] }
  0x49   :  { %v3320_v11 = vpack.c.bf16 %v126_v9, %v124_v8  ;;  %v128_v14 = vld [vmem:[#allocation5 + $0x1a8] sm:$0xff]  ;;  %v130_v15 = vld [vmem:[#allocation5 + $0x1b8] sm:$0xff]  ;;  %v3322_v16 = vpack.c.bf16 %v125_v13, %v123_v12  ;;  %v127_v18 = vld [vmem:[#allocation5 + $0x1a0] sm:$0xff] }
  0x4a   :  { %v3324_v17 = vpack.c.bf16 %v130_v15, %v128_v14  ;;  %v129_v19 = vld [vmem:[#allocation5 + $0x1b0] sm:$0xff]  ;;  %v132_v20 = vld [vmem:[#allocation5 + $0x1c8] sm:$0xff]  ;;  %v134_v21 = vld [vmem:[#allocation5 + $0x1d8] sm:$0xff] }
  0x4b   :  { %3291 = vmatpush1.bf16.msra.mxu1 %v3290_v31  ;;  %v3326_v22 = vpack.c.bf16 %v129_v19, %v127_v18  ;;  %v3328_v23 = vpack.c.bf16 %v134_v21, %v132_v20  ;;  %v131_v24 = vld [vmem:[#allocation5 + $0x1c0] sm:$0xff]  ;;  %v133_v25 = vld [vmem:[#allocation5 + $0x1d0] sm:$0xff]  ;;  %v136_v26 = vld [vmem:[#allocation5 + $0x1e8] sm:$0xff] }
  0x4c   :  { %3293 = vmatprep.subr.bf16.mxu1 %v3292_v32  ;;  %v138_v27 = vld [vmem:[#allocation5 + $0x1f8] sm:$0xff]  ;;  %v3330_v28 = vpack.c.bf16 %v133_v25, %v131_v24  ;;  %v135_v30 = vld [vmem:[#allocation5 + $0x1e0] sm:$0xff]  ;;  %v137_v31 = vld [vmem:[#allocation5 + $0x1f0] sm:$0xff] }
  0x4d   :  { %v3332_v29 = vpack.c.bf16 %v138_v27, %v136_v26  ;;  %v262_v32 = vld [vmem:[#allocation5 + $0x208] sm:$0xff]  ;;  %v264_v33 = vld [vmem:[#allocation5 + $0x218] sm:$0xff]  ;;  %v3334_v34 = vpack.c.bf16 %v137_v31, %v135_v30  ;;  %v261_v36 = vld [vmem:[#allocation5 + $0x200] sm:$0xff] }
  0x4e   :  { %v3336_v35 = vpack.c.bf16 %v264_v33, %v262_v32  ;;  %v268_v39 = vld [vmem:[#allocation5 + $0x238] sm:$0xff]  ;;  %v4346_v40 = vld [vmem:[#allocation2] sm:$0xff]  ;;  %v267_v46 = vld [vmem:[#allocation5 + $0x230] sm:$0xff] }
  0x4f   :  { %3295 = vmatpush1.bf16.msra.mxu1 %v3294_v37  ;;  %v263_v37 = vld [vmem:[#allocation5 + $0x210] sm:$0xff]  ;;  %v4348_v43 = vld [vmem:[#allocation2 + $0x18] sm:$0xff]  ;;  %v270_v47 = vld [vmem:[#allocation5 + $0x248] sm:$0xff] }
  0x50   :  { %3297 = vmatprep.subr.bf16.mxu1 %v3296_v38  ;;  %v266_v38 = vld [vmem:[#allocation5 + $0x228] sm:$0xff]  ;;  %v3338_v42 = vpack.c.bf16 %v263_v37, %v261_v36  ;;  %v272_v48 = vld [vmem:[#allocation5 + $0x258] sm:$0xff]  ;;  %v4352_v49 = vld [vmem:[#allocation2 + $0x10] sm:$0xff] }
  0x51   :  { %v269_v52 = vld [vmem:[#allocation5 + $0x240] sm:$0xff]  ;;  %v271_v53 = vld [vmem:[#allocation5 + $0x250] sm:$0xff]  ;;  %v4354_v54 = vld [vmem:[#allocation2 + $0x28] sm:$0xff] }
  0x52   :  { %v274_v55 = vld [vmem:[#allocation5 + $0x268] sm:$0xff]  ;;  %v4358_v58 = vld [vmem:[#allocation2 + $0x20] sm:$0xff]  ;;  %v275_v61 = vld [vmem:[#allocation5 + $0x270] sm:$0xff] }
  0x53   :  { %3299 = vmatpush1.bf16.msra.mxu1 %v3298_v44  ;;  %v3340_v44 = vpack.c.bf16 %v268_v39, %v266_v38  ;;  %v273_v60 = vld [vmem:[#allocation5 + $0x260] sm:$0xff]  ;;  %v280_v0 = vld [vmem:[#allocation5 + $0x298] sm:$0xff]  ;;  %v4364_v2 = vld [vmem:[#allocation2 + $0x30] sm:$0xff] }
  0x54   :  { %3301 = vmatprep.subr.bf16.mxu1 %v3300_v45  ;;  %v265_v45 = vld [vmem:[#allocation5 + $0x220] sm:$0xff]  ;;  %v3350_v1 = vpack.c.bf16 %v275_v61, %v273_v60  ;;  %v4366_v6 = vld [vmem:[#allocation2 + $0x48] sm:$0xff]  ;;  %v284_v8 = vld [vmem:[#allocation5 + $0x2b8] sm:$0xff] }
  0x55   :  { %v282_v7 = vld [vmem:[#allocation5 + $0x2a8] sm:$0xff]  ;;  %v281_v12 = vld [vmem:[#allocation5 + $0x2a0] sm:$0xff]  ;;  %v283_v13 = vld [vmem:[#allocation5 + $0x2b0] sm:$0xff] }
  0x56   :  { %v4372_v14 = vld [vmem:[#allocation2 + $0x58] sm:$0xff]  ;;  %v286_v15 = vld [vmem:[#allocation5 + $0x2c8] sm:$0xff]  ;;  %v4376_v18 = vld [vmem:[#allocation2 + $0x50] sm:$0xff] }
  0x57   :  { %3303 = vmatpush1.bf16.msra.mxu1 %v3302_v50  ;;  %v3342_v50 = vpack.c.bf16 %v267_v46, %v265_v45  ;;  %v285_v20 = vld [vmem:[#allocation5 + $0x2c0] sm:$0xff]  ;;  %v287_v21 = vld [vmem:[#allocation5 + $0x2d0] sm:$0xff]  ;;  %v292_v24 = vld [vmem:[#allocation5 + $0x2f8] sm:$0xff] }
  0x58   :  { %3305 = vmatprep.subr.bf16.mxu1 %v3304_v51  ;;  %v3344_v51 = vpack.c.bf16 %v272_v48, %v270_v47  ;;  %v3362_v25 = vpack.c.bf16 %v287_v21, %v285_v20  ;;  %v4382_v26 = vld [vmem:[#allocation2 + $0x60] sm:$0xff]  ;;  %v4384_v30 = vld [vmem:[#allocation2 + $0x78] sm:$0xff]  ;;  %v294_v31 = vld [vmem:[#allocation5 + $0x308] sm:$0xff] }
  0x59   :  { %v296_v32 = vld [vmem:[#allocation5 + $0x318] sm:$0xff]  ;;  %v293_v36 = vld [vmem:[#allocation5 + $0x300] sm:$0xff]  ;;  %v295_v37 = vld [vmem:[#allocation5 + $0x310] sm:$0xff] }
  0x5a   :  { %v298_v38 = vld [vmem:[#allocation5 + $0x328] sm:$0xff]  ;;  %v300_v39 = vld [vmem:[#allocation5 + $0x338] sm:$0xff]  ;;  %v297_v45 = vld [vmem:[#allocation5 + $0x320] sm:$0xff] }
  0x5b   :  { %3307 = vmatpush1.bf16.msra.mxu1 %v3306_v56  ;;  %v276_v56 = vld [vmem:[#allocation5 + $0x278] sm:$0xff]  ;;  %v299_v46 = vld [vmem:[#allocation5 + $0x330] sm:$0xff]  ;;  %v302_v47 = vld [vmem:[#allocation5 + $0x348] sm:$0xff] }
  0x5c   :  { %3309 = vmatprep.subr.bf16.mxu1 %v3308_v57  ;;  %v3346_v57 = vpack.c.bf16 %v271_v53, %v269_v52  ;;  %v3348_v59 = vpack.c.bf16 %v276_v56, %v274_v55  ;;  %v304_v48 = vld [vmem:[#allocation5 + $0x358] sm:$0xff]  ;;  %v301_v52 = vld [vmem:[#allocation5 + $0x340] sm:$0xff]  ;;  %v303_v53 = vld [vmem:[#allocation5 + $0x350] sm:$0xff] }
  0x5d   :  { %v306_v55 = vld [vmem:[#allocation5 + $0x368] sm:$0xff]  ;;  %v308_v56 = vld [vmem:[#allocation5 + $0x378] sm:$0xff]  ;;  %v305_v60 = vld [vmem:[#allocation5 + $0x360] sm:$0xff] }
  0x5e   :  { %v307_v61 = vld [vmem:[#allocation5 + $0x370] sm:$0xff]  ;;  %v317_v20 = vld [vmem:[#allocation5 + $0x3c0] sm:$0xff] }
  0x5f   :  { %3311 = vmatpush1.bf16.msra.mxu1 %v3310_v62  ;;  %v4360_v62 = vld [vmem:[#allocation2 + $0x38] sm:$0xff]  ;;  %v319_v21 = vld [vmem:[#allocation5 + $0x3d0] sm:$0xff] }
  0x60   :  { %3313 = vmatprep.subr.bf16.mxu1 %v3312_v63  ;;  %v278_v63 = vld [vmem:[#allocation5 + $0x288] sm:$0xff] }
  0x61   :  { %v3352_v3 = vpack.c.bf16 %v280_v0, %v278_v63  ;;  %v310_v63 = vld [vmem:[#allocation5 + $0x388] sm:$0xff]  ;;  %v312_v0 = vld [vmem:[#allocation5 + $0x398] sm:$0xff] }
  0x63   :  { %3315 = vmatpush1.bf16.msra.mxu1 %v3314_v4  ;;  %v277_v4 = vld [vmem:[#allocation5 + $0x280] sm:$0xff] }
  0x64   :  { %3317 = vmatprep.subr.bf16.mxu1 %v3316_v5  ;;  %v279_v5 = vld [vmem:[#allocation5 + $0x290] sm:$0xff] }
  0x65   :  { %v3354_v9 = vpack.c.bf16 %v279_v5, %v277_v4  ;;  %v309_v4 = vld [vmem:[#allocation5 + $0x380] sm:$0xff]  ;;  %v311_v5 = vld [vmem:[#allocation5 + $0x390] sm:$0xff] }
  0x67   :  { %3319 = vmatpush1.bf16.msra.mxu1 %v3318_v10  ;;  %v4370_v10 = vld [vmem:[#allocation2 + $0x40] sm:$0xff] }
  0x68   :  { %3321 = vmatprep.subr.bf16.mxu1 %v3320_v11  ;;  %v3356_v11 = vpack.c.bf16 %v284_v8, %v282_v7  ;;  %v314_v7 = vld [vmem:[#allocation5 + $0x3a8] sm:$0xff]  ;;  %v316_v8 = vld [vmem:[#allocation5 + $0x3b8] sm:$0xff] }
  0x6b   :  { %3323 = vmatpush1.bf16.msra.mxu1 %v3322_v16  ;;  %v288_v16 = vld [vmem:[#allocation5 + $0x2d8] sm:$0xff] }
  0x6c   :  { %3325 = vmatprep.subr.bf16.mxu1 %v3324_v17  ;;  %v3358_v17 = vpack.c.bf16 %v283_v13, %v281_v12  ;;  %v3360_v19 = vpack.c.bf16 %v288_v16, %v286_v15  ;;  %v313_v12 = vld [vmem:[#allocation5 + $0x3a0] sm:$0xff]  ;;  %v315_v13 = vld [vmem:[#allocation5 + $0x3b0] sm:$0xff]  ;;  %v318_v15 = vld [vmem:[#allocation5 + $0x3c8] sm:$0xff] }
  0x6d   :  { %v320_v16 = vld [vmem:[#allocation5 + $0x3d8] sm:$0xff] }
  0x6f   :  { %3327 = vmatpush1.bf16.msra.mxu1 %v3326_v22  ;;  %v4378_v22 = vld [vmem:[#allocation2 + $0x68] sm:$0xff] }
  0x70   :  { %3329 = vmatprep.subr.bf16.mxu1 %v3328_v23  ;;  %v290_v23 = vld [vmem:[#allocation5 + $0x2e8] sm:$0xff] }
  0x71   :  { %v3364_v27 = vpack.c.bf16 %v292_v24, %v290_v23  ;;  %v322_v23 = vld [vmem:[#allocation5 + $0x3e8] sm:$0xff]  ;;  %v324_v24 = vld [vmem:[#allocation5 + $0x3f8] sm:$0xff] }
  0x73   :  { %3331 = vmatpush1.bf16.msra.mxu1 %v3330_v28  ;;  %v289_v28 = vld [vmem:[#allocation5 + $0x2e0] sm:$0xff] }
  0x74   :  { %3333 = vmatprep.subr.bf16.mxu1 %v3332_v29  ;;  %v291_v29 = vld [vmem:[#allocation5 + $0x2f0] sm:$0xff] }
  0x75   :  { %v3366_v33 = vpack.c.bf16 %v291_v29, %v289_v28  ;;  %v321_v28 = vld [vmem:[#allocation5 + $0x3e0] sm:$0xff]  ;;  %v323_v29 = vld [vmem:[#allocation5 + $0x3f0] sm:$0xff] }
  0x77   :  { %3335 = vmatpush1.bf16.msra.mxu1 %v3334_v34  ;;  %v4388_v34 = vld [vmem:[#allocation2 + $0x70] sm:$0xff] }
  0x78   :  { %3337 = vmatprep.subr.bf16.mxu1 %v3336_v35  ;;  %v3368_v35 = vpack.c.bf16 %v296_v32, %v294_v31  ;;  %v724_v31 = vld [vmem:[#allocation5 + $0x408] sm:$0xff]  ;;  %v726_v32 = vld [vmem:[#allocation5 + $0x418] sm:$0xff] }
  0x7a   :  { %204 = vmatmul.mubr.f32.vlgmr.msra.gmra.mrb[0].mxu1 %v4346_v40 }
  0x7b   :  { %3339 = vmatpush1.bf16.msra.mxu1 %v3338_v42  ;;  %209 = vmatprep.mubr.f32.mxu1 %v4348_v43  ;;  %v3370_v42 = vpack.c.bf16 %v295_v37, %v293_v36  ;;  %v723_v36 = vld [vmem:[#allocation5 + $0x400] sm:$0xff]  ;;  %v725_v37 = vld [vmem:[#allocation5 + $0x410] sm:$0xff] }
  0x7c   :  { %3341 = vmatprep.subr.bf16.mxu1 %v3340_v44  ;;  %v3372_v44 = vpack.c.bf16 %v300_v39, %v298_v38  ;;  %v728_v38 = vld [vmem:[#allocation5 + $0x428] sm:$0xff]  ;;  %v730_v39 = vld [vmem:[#allocation5 + $0x438] sm:$0xff] }
  0x7e   :  { %210 = vmatmul.mubr.f32.gmra.mrb[2].mxu1 %v4352_v49 }
  0x7f   :  { %3343 = vmatpush1.bf16.msra.mxu1 %v3342_v50  ;;  %215 = vmatprep.mubr.f32.mxu1 %v4354_v54  ;;  %v3374_v50 = vpack.c.bf16 %v299_v46, %v297_v45  ;;  %v727_v45 = vld [vmem:[#allocation5 + $0x420] sm:$0xff]  ;;  %v729_v46 = vld [vmem:[#allocation5 + $0x430] sm:$0xff] }
  0x80   :  { %3345 = vmatprep.subr.bf16.mxu1 %v3344_v51  ;;  %v3376_v51 = vpack.c.bf16 %v304_v48, %v302_v47  ;;  %v732_v47 = vld [vmem:[#allocation5 + $0x448] sm:$0xff]  ;;  %v734_v48 = vld [vmem:[#allocation5 + $0x458] sm:$0xff] }
  0x82   :  { %216 = vmatmul.mubr.f32.gmra.mrb[4].mxu1 %v4358_v58 }
  0x83   :  { %3347 = vmatpush1.bf16.msra.mxu1 %v3346_v57  ;;  %221 = vmatprep.mubr.f32.mxu1 %v4360_v62  ;;  %v3378_v57 = vpack.c.bf16 %v303_v53, %v301_v52  ;;  %v731_v52 = vld [vmem:[#allocation5 + $0x440] sm:$0xff]  ;;  %v733_v53 = vld [vmem:[#allocation5 + $0x450] sm:$0xff] }
  0x84   :  { %3349 = vmatprep.subr.bf16.mxu1 %v3348_v59  ;;  %v3380_v59 = vpack.c.bf16 %v308_v56, %v306_v55  ;;  %v736_v55 = vld [vmem:[#allocation5 + $0x468] sm:$0xff]  ;;  %v738_v56 = vld [vmem:[#allocation5 + $0x478] sm:$0xff] }
  0x86   :  { %222 = vmatmul.mubr.f32.gmra.mrb[6].mxu1 %v4364_v2 }
  0x87   :  { %3351 = vmatpush1.bf16.msra.mxu1 %v3350_v1  ;;  %227 = vmatprep.mubr.f32.mxu1 %v4366_v6  ;;  %v3382_v1 = vpack.c.bf16 %v307_v61, %v305_v60  ;;  %v735_v60 = vld [vmem:[#allocation5 + $0x460] sm:$0xff]  ;;  %v737_v61 = vld [vmem:[#allocation5 + $0x470] sm:$0xff] }
  0x88   :  { %3353 = vmatprep.subr.bf16.mxu1 %v3352_v3  ;;  %v3384_v3 = vpack.c.bf16 %v312_v0, %v310_v63  ;;  %v740_v63 = vld [vmem:[#allocation5 + $0x488] sm:$0xff]  ;;  %v742_v0 = vld [vmem:[#allocation5 + $0x498] sm:$0xff] }
  0x8a   :  { %228 = vmatmul.mubr.f32.gmra.mrb[8].mxu1 %v4370_v10 }
  0x8b   :  { %3355 = vmatpush1.bf16.msra.mxu1 %v3354_v9  ;;  %233 = vmatprep.mubr.f32.mxu1 %v4372_v14  ;;  %v3386_v9 = vpack.c.bf16 %v311_v5, %v309_v4  ;;  %v739_v4 = vld [vmem:[#allocation5 + $0x480] sm:$0xff]  ;;  %v741_v5 = vld [vmem:[#allocation5 + $0x490] sm:$0xff] }
  0x8c   :  { %3357 = vmatprep.subr.bf16.mxu1 %v3356_v11  ;;  %v3388_v11 = vpack.c.bf16 %v316_v8, %v314_v7  ;;  %v744_v7 = vld [vmem:[#allocation5 + $0x4a8] sm:$0xff]  ;;  %v746_v8 = vld [vmem:[#allocation5 + $0x4b8] sm:$0xff] }
  0x8e   :  { %234 = vmatmul.mubr.f32.gmra.mrb[10].mxu1 %v4376_v18 }
  0x8f   :  { %3359 = vmatpush1.bf16.msra.mxu1 %v3358_v17  ;;  %239 = vmatprep.mubr.f32.mxu1 %v4378_v22  ;;  %v3390_v17 = vpack.c.bf16 %v315_v13, %v313_v12  ;;  %v743_v12 = vld [vmem:[#allocation5 + $0x4a0] sm:$0xff]  ;;  %v745_v13 = vld [vmem:[#allocation5 + $0x4b0] sm:$0xff] }
  0x90   :  { %3361 = vmatprep.subr.bf16.mxu1 %v3360_v19  ;;  %v3392_v19 = vpack.c.bf16 %v320_v16, %v318_v15  ;;  %v748_v15 = vld [vmem:[#allocation5 + $0x4c8] sm:$0xff]  ;;  %v750_v16 = vld [vmem:[#allocation5 + $0x4d8] sm:$0xff] }
  0x92   :  { %240 = vmatmul.mubr.f32.gmra.mrb[12].mxu1 %v4382_v26 }
  0x93   :  { %3363 = vmatpush1.bf16.msra.mxu1 %v3362_v25  ;;  %245 = vmatprep.mubr.f32.mxu1 %v4384_v30  ;;  %v3394_v25 = vpack.c.bf16 %v319_v21, %v317_v20  ;;  %v747_v20 = vld [vmem:[#allocation5 + $0x4c0] sm:$0xff]  ;;  %v749_v21 = vld [vmem:[#allocation5 + $0x4d0] sm:$0xff] }
  0x94   :  { %3365 = vmatprep.subr.bf16.mxu1 %v3364_v27  ;;  %v3396_v27 = vpack.c.bf16 %v324_v24, %v322_v23  ;;  %v752_v23 = vld [vmem:[#allocation5 + $0x4e8] sm:$0xff]  ;;  %v754_v24 = vld [vmem:[#allocation5 + $0x4f8] sm:$0xff] }
  0x96   :  { %246 = vmatmul.mubr.f32.gmra.mrb[14].mxu1 %v4388_v34 }
  0x97   :  { %3367 = vmatpush1.bf16.msra.mxu1 %v3366_v33  ;;  %389 = vmatprep.mubr.f32.mxu1 %v4343_v41  ;;  %v3398_v33 = vpack.c.bf16 %v323_v29, %v321_v28  ;;  %v751_v28 = vld [vmem:[#allocation5 + $0x4e0] sm:$0xff]  ;;  %v753_v29 = vld [vmem:[#allocation5 + $0x4f0] sm:$0xff] }
  0x98   :  { %3369 = vmatprep.subr.bf16.mxu1 %v3368_v35  ;;  %v3432_v35 = vpack.c.bf16 %v726_v32, %v724_v31  ;;  %v756_v31 = vld [vmem:[#allocation5 + $0x508] sm:$0xff]  ;;  %v758_v32 = vld [vmem:[#allocation5 + $0x518] sm:$0xff] }
  0x9b   :  { %3371 = vmatpush1.bf16.msra.mxu1 %v3370_v42  ;;  %v3434_v42 = vpack.c.bf16 %v725_v37, %v723_v36  ;;  %v755_v36 = vld [vmem:[#allocation5 + $0x500] sm:$0xff]  ;;  %v757_v37 = vld [vmem:[#allocation5 + $0x510] sm:$0xff] }
  0x9c   :  { %3373 = vmatprep.subr.bf16.mxu1 %v3372_v44  ;;  %v3436_v44 = vpack.c.bf16 %v730_v39, %v728_v38  ;;  %v760_v38 = vld [vmem:[#allocation5 + $0x528] sm:$0xff]  ;;  %v762_v39 = vld [vmem:[#allocation5 + $0x538] sm:$0xff] }
  0x9f   :  { %3375 = vmatpush1.bf16.msra.mxu1 %v3374_v50  ;;  %v3438_v50 = vpack.c.bf16 %v729_v46, %v727_v45  ;;  %v759_v45 = vld [vmem:[#allocation5 + $0x520] sm:$0xff]  ;;  %v761_v46 = vld [vmem:[#allocation5 + $0x530] sm:$0xff] }
  0xa0   :  { %3377 = vmatprep.subr.bf16.mxu1 %v3376_v51  ;;  %v3440_v51 = vpack.c.bf16 %v734_v48, %v732_v47  ;;  %v764_v47 = vld [vmem:[#allocation5 + $0x548] sm:$0xff]  ;;  %v766_v48 = vld [vmem:[#allocation5 + $0x558] sm:$0xff] }
  0xa3   :  { %3379 = vmatpush1.bf16.msra.mxu1 %v3378_v57  ;;  %v3442_v57 = vpack.c.bf16 %v733_v53, %v731_v52  ;;  %v763_v52 = vld [vmem:[#allocation5 + $0x540] sm:$0xff]  ;;  %v765_v53 = vld [vmem:[#allocation5 + $0x550] sm:$0xff] }
  0xa4   :  { %3381 = vmatprep.subr.bf16.mxu1 %v3380_v59  ;;  %v3444_v59 = vpack.c.bf16 %v738_v56, %v736_v55  ;;  %v768_v55 = vld [vmem:[#allocation5 + $0x568] sm:$0xff]  ;;  %v770_v56 = vld [vmem:[#allocation5 + $0x578] sm:$0xff] }
  0xa7   :  { %3383 = vmatpush1.bf16.msra.mxu1 %v3382_v1  ;;  %v3446_v1 = vpack.c.bf16 %v737_v61, %v735_v60  ;;  %v767_v60 = vld [vmem:[#allocation5 + $0x560] sm:$0xff]  ;;  %v769_v61 = vld [vmem:[#allocation5 + $0x570] sm:$0xff] }
  0xa8   :  { %3385 = vmatprep.subr.bf16.mxu1 %v3384_v3  ;;  %v3448_v3 = vpack.c.bf16 %v742_v0, %v740_v63  ;;  %v772_v63 = vld [vmem:[#allocation5 + $0x588] sm:$0xff]  ;;  %v774_v0 = vld [vmem:[#allocation5 + $0x598] sm:$0xff] }
  0xab   :  { %3387 = vmatpush1.bf16.msra.mxu1 %v3386_v9  ;;  %v3450_v9 = vpack.c.bf16 %v741_v5, %v739_v4  ;;  %v771_v4 = vld [vmem:[#allocation5 + $0x580] sm:$0xff]  ;;  %v773_v5 = vld [vmem:[#allocation5 + $0x590] sm:$0xff] }
  0xac   :  { %3389 = vmatprep.subr.bf16.mxu1 %v3388_v11  ;;  %v3452_v11 = vpack.c.bf16 %v746_v8, %v744_v7  ;;  %v776_v7 = vld [vmem:[#allocation5 + $0x5a8] sm:$0xff]  ;;  %v778_v8 = vld [vmem:[#allocation5 + $0x5b8] sm:$0xff] }
  0xaf   :  { %3391 = vmatpush1.bf16.msra.mxu1 %v3390_v17  ;;  %v3454_v17 = vpack.c.bf16 %v745_v13, %v743_v12  ;;  %v775_v12 = vld [vmem:[#allocation5 + $0x5a0] sm:$0xff]  ;;  %v777_v13 = vld [vmem:[#allocation5 + $0x5b0] sm:$0xff] }
  0xb0   :  { %3393 = vmatprep.subr.bf16.mxu1 %v3392_v19  ;;  %v3456_v19 = vpack.c.bf16 %v750_v16, %v748_v15  ;;  %v780_v15 = vld [vmem:[#allocation5 + $0x5c8] sm:$0xff]  ;;  %v782_v16 = vld [vmem:[#allocation5 + $0x5d8] sm:$0xff] }
  0xb3   :  { %3395 = vmatpush1.bf16.msra.mxu1 %v3394_v25  ;;  %v3458_v25 = vpack.c.bf16 %v749_v21, %v747_v20  ;;  %v779_v20 = vld [vmem:[#allocation5 + $0x5c0] sm:$0xff]  ;;  %v781_v21 = vld [vmem:[#allocation5 + $0x5d0] sm:$0xff] }
  0xb4   :  { %3397 = vmatprep.subr.bf16.mxu1 %v3396_v27  ;;  %v3460_v27 = vpack.c.bf16 %v754_v24, %v752_v23  ;;  %v784_v23 = vld [vmem:[#allocation5 + $0x5e8] sm:$0xff]  ;;  %v786_v24 = vld [vmem:[#allocation5 + $0x5f8] sm:$0xff] }
  0xb7   :  { %3399 = vmatpush1.bf16.msra.mxu1 %v3398_v33  ;;  %v3462_v33 = vpack.c.bf16 %v753_v29, %v751_v28  ;;  %v783_v28 = vld [vmem:[#allocation5 + $0x5e0] sm:$0xff]  ;;  %v785_v29 = vld [vmem:[#allocation5 + $0x5f0] sm:$0xff] }
  0xb8   :  { %3433 = vmatprep.subr.bf16.mxu1 %v3432_v35  ;;  %v3464_v35 = vpack.c.bf16 %v758_v32, %v756_v31  ;;  %v1064_v31 = vld [vmem:[#allocation5 + $0x608] sm:$0xff]  ;;  %v1066_v32 = vld [vmem:[#allocation5 + $0x618] sm:$0xff] }
  0xba   :  { %390 = vmatmul.mubr.f32.vlgmr.msra.gmra.mrb[16].mxu1 %v4346_v40 }
  0xbb   :  { %3435 = vmatpush1.bf16.msra.mxu1 %v3434_v42  ;;  %395 = vmatprep.mubr.f32.mxu1 %v4348_v43  ;;  %v3466_v42 = vpack.c.bf16 %v757_v37, %v755_v36  ;;  %v1063_v36 = vld [vmem:[#allocation5 + $0x600] sm:$0xff]  ;;  %v1065_v37 = vld [vmem:[#allocation5 + $0x610] sm:$0xff] }
  0xbc   :  { %3437 = vmatprep.subr.bf16.mxu1 %v3436_v44  ;;  %v3468_v44 = vpack.c.bf16 %v762_v39, %v760_v38  ;;  %v1068_v38 = vld [vmem:[#allocation5 + $0x628] sm:$0xff]  ;;  %v1070_v39 = vld [vmem:[#allocation5 + $0x638] sm:$0xff] }
  0xbe   :  { %396 = vmatmul.mubr.f32.gmra.mrb[18].mxu1 %v4352_v49 }
  0xbf   :  { %3439 = vmatpush1.bf16.msra.mxu1 %v3438_v50  ;;  %401 = vmatprep.mubr.f32.mxu1 %v4354_v54  ;;  %v3470_v50 = vpack.c.bf16 %v761_v46, %v759_v45  ;;  %v1067_v45 = vld [vmem:[#allocation5 + $0x620] sm:$0xff]  ;;  %v1069_v46 = vld [vmem:[#allocation5 + $0x630] sm:$0xff] }
  0xc0   :  { %3441 = vmatprep.subr.bf16.mxu1 %v3440_v51  ;;  %v3472_v51 = vpack.c.bf16 %v766_v48, %v764_v47  ;;  %v1072_v47 = vld [vmem:[#allocation5 + $0x648] sm:$0xff]  ;;  %v1074_v48 = vld [vmem:[#allocation5 + $0x658] sm:$0xff] }
  0xc2   :  { %402 = vmatmul.mubr.f32.gmra.mrb[20].mxu1 %v4358_v58 }
  0xc3   :  { %3443 = vmatpush1.bf16.msra.mxu1 %v3442_v57  ;;  %407 = vmatprep.mubr.f32.mxu1 %v4360_v62  ;;  %v3474_v57 = vpack.c.bf16 %v765_v53, %v763_v52  ;;  %v1071_v52 = vld [vmem:[#allocation5 + $0x640] sm:$0xff]  ;;  %v1073_v53 = vld [vmem:[#allocation5 + $0x650] sm:$0xff] }
  0xc4   :  { %3445 = vmatprep.subr.bf16.mxu1 %v3444_v59  ;;  %v3476_v59 = vpack.c.bf16 %v770_v56, %v768_v55  ;;  %v1076_v55 = vld [vmem:[#allocation5 + $0x668] sm:$0xff]  ;;  %v1078_v56 = vld [vmem:[#allocation5 + $0x678] sm:$0xff] }
  0xc6   :  { %408 = vmatmul.mubr.f32.gmra.mrb[22].mxu1 %v4364_v2 }
  0xc7   :  { %3447 = vmatpush1.bf16.msra.mxu1 %v3446_v1  ;;  %413 = vmatprep.mubr.f32.mxu1 %v4366_v6  ;;  %v3478_v1 = vpack.c.bf16 %v769_v61, %v767_v60  ;;  %v1075_v60 = vld [vmem:[#allocation5 + $0x660] sm:$0xff]  ;;  %v1077_v61 = vld [vmem:[#allocation5 + $0x670] sm:$0xff] }
  0xc8   :  { %3449 = vmatprep.subr.bf16.mxu1 %v3448_v3  ;;  %v3480_v3 = vpack.c.bf16 %v774_v0, %v772_v63  ;;  %v1080_v63 = vld [vmem:[#allocation5 + $0x688] sm:$0xff]  ;;  %v1082_v0 = vld [vmem:[#allocation5 + $0x698] sm:$0xff] }
  0xca   :  { %414 = vmatmul.mubr.f32.gmra.mrb[24].mxu1 %v4370_v10 }
  0xcb   :  { %3451 = vmatpush1.bf16.msra.mxu1 %v3450_v9  ;;  %419 = vmatprep.mubr.f32.mxu1 %v4372_v14  ;;  %v3482_v9 = vpack.c.bf16 %v773_v5, %v771_v4  ;;  %v1079_v4 = vld [vmem:[#allocation5 + $0x680] sm:$0xff]  ;;  %v1081_v5 = vld [vmem:[#allocation5 + $0x690] sm:$0xff] }
  0xcc   :  { %3453 = vmatprep.subr.bf16.mxu1 %v3452_v11  ;;  %v3484_v11 = vpack.c.bf16 %v778_v8, %v776_v7  ;;  %v1084_v7 = vld [vmem:[#allocation5 + $0x6a8] sm:$0xff]  ;;  %v1086_v8 = vld [vmem:[#allocation5 + $0x6b8] sm:$0xff] }
  0xce   :  { %420 = vmatmul.mubr.f32.gmra.mrb[26].mxu1 %v4376_v18 }
  0xcf   :  { %3455 = vmatpush1.bf16.msra.mxu1 %v3454_v17  ;;  %425 = vmatprep.mubr.f32.mxu1 %v4378_v22  ;;  %v3486_v17 = vpack.c.bf16 %v777_v13, %v775_v12  ;;  %v1083_v12 = vld [vmem:[#allocation5 + $0x6a0] sm:$0xff]  ;;  %v1085_v13 = vld [vmem:[#allocation5 + $0x6b0] sm:$0xff] }
  0xd0   :  { %3457 = vmatprep.subr.bf16.mxu1 %v3456_v19  ;;  %v3488_v19 = vpack.c.bf16 %v782_v16, %v780_v15  ;;  %v1088_v15 = vld [vmem:[#allocation5 + $0x6c8] sm:$0xff]  ;;  %v1090_v16 = vld [vmem:[#allocation5 + $0x6d8] sm:$0xff] }
  0xd2   :  { %426 = vmatmul.mubr.f32.gmra.mrb[28].mxu1 %v4382_v26 }
  0xd3   :  { %3459 = vmatpush1.bf16.msra.mxu1 %v3458_v25  ;;  %431 = vmatprep.mubr.f32.mxu1 %v4384_v30  ;;  %v3490_v25 = vpack.c.bf16 %v781_v21, %v779_v20  ;;  %v1087_v20 = vld [vmem:[#allocation5 + $0x6c0] sm:$0xff]  ;;  %v1089_v21 = vld [vmem:[#allocation5 + $0x6d0] sm:$0xff] }
  0xd4   :  { %3461 = vmatprep.subr.bf16.mxu1 %v3460_v27  ;;  %v3492_v27 = vpack.c.bf16 %v786_v24, %v784_v23  ;;  %v1092_v23 = vld [vmem:[#allocation5 + $0x6e8] sm:$0xff]  ;;  %v1094_v24 = vld [vmem:[#allocation5 + $0x6f8] sm:$0xff] }
  0xd6   :  { %432 = vmatmul.mubr.f32.gmra.mrb[30].mxu1 %v4388_v34 }
  0xd7   :  { %3463 = vmatpush1.bf16.msra.mxu1 %v3462_v33  ;;  %851 = vmatprep.mubr.f32.mxu1 %v4343_v41  ;;  %v3494_v33 = vpack.c.bf16 %v785_v29, %v783_v28  ;;  %v1091_v28 = vld [vmem:[#allocation5 + $0x6e0] sm:$0xff]  ;;  %v1093_v29 = vld [vmem:[#allocation5 + $0x6f0] sm:$0xff] }
  0xd8   :  { %3465 = vmatprep.subr.bf16.mxu1 %v3464_v35  ;;  %v3512_v35 = vpack.c.bf16 %v1066_v32, %v1064_v31  ;;  %v1096_v31 = vld [vmem:[#allocation5 + $0x708] sm:$0xff]  ;;  %v1098_v32 = vld [vmem:[#allocation5 + $0x718] sm:$0xff] }
  0xdb   :  { %3467 = vmatpush1.bf16.msra.mxu1 %v3466_v42  ;;  %v3514_v42 = vpack.c.bf16 %v1065_v37, %v1063_v36  ;;  %v1095_v36 = vld [vmem:[#allocation5 + $0x700] sm:$0xff]  ;;  %v1097_v37 = vld [vmem:[#allocation5 + $0x710] sm:$0xff] }
  0xdc   :  { %3469 = vmatprep.subr.bf16.mxu1 %v3468_v44  ;;  %v3516_v44 = vpack.c.bf16 %v1070_v39, %v1068_v38  ;;  %v1100_v38 = vld [vmem:[#allocation5 + $0x728] sm:$0xff]  ;;  %v1102_v39 = vld [vmem:[#allocation5 + $0x738] sm:$0xff] }
  0xdf   :  { %3471 = vmatpush1.bf16.msra.mxu1 %v3470_v50  ;;  %v3518_v50 = vpack.c.bf16 %v1069_v46, %v1067_v45  ;;  %v1099_v45 = vld [vmem:[#allocation5 + $0x720] sm:$0xff]  ;;  %v1101_v46 = vld [vmem:[#allocation5 + $0x730] sm:$0xff] }
  0xe0   :  { %3473 = vmatprep.subr.bf16.mxu1 %v3472_v51  ;;  %v3520_v51 = vpack.c.bf16 %v1074_v48, %v1072_v47  ;;  %v1104_v47 = vld [vmem:[#allocation5 + $0x748] sm:$0xff]  ;;  %v1106_v48 = vld [vmem:[#allocation5 + $0x758] sm:$0xff] }
  0xe3   :  { %3475 = vmatpush1.bf16.msra.mxu1 %v3474_v57  ;;  %v3522_v57 = vpack.c.bf16 %v1073_v53, %v1071_v52  ;;  %v1103_v52 = vld [vmem:[#allocation5 + $0x740] sm:$0xff]  ;;  %v1105_v53 = vld [vmem:[#allocation5 + $0x750] sm:$0xff] }
  0xe4   :  { %3477 = vmatprep.subr.bf16.mxu1 %v3476_v59  ;;  %v3524_v59 = vpack.c.bf16 %v1078_v56, %v1076_v55  ;;  %v1108_v55 = vld [vmem:[#allocation5 + $0x768] sm:$0xff]  ;;  %v1110_v56 = vld [vmem:[#allocation5 + $0x778] sm:$0xff] }
  0xe7   :  { %3479 = vmatpush1.bf16.msra.mxu1 %v3478_v1  ;;  %v3526_v1 = vpack.c.bf16 %v1077_v61, %v1075_v60  ;;  %v1107_v60 = vld [vmem:[#allocation5 + $0x760] sm:$0xff]  ;;  %v1112_v61 = vld [vmem:[#allocation5 + $0x788] sm:$0xff] }
  0xe8   :  { %3481 = vmatprep.subr.bf16.mxu1 %v3480_v3  ;;  %v3528_v3 = vpack.c.bf16 %v1082_v0, %v1080_v63  ;;  %v1114_v63 = vld [vmem:[#allocation5 + $0x798] sm:$0xff] }
  0xeb   :  { %3483 = vmatpush1.bf16.msra.mxu1 %v3482_v9  ;;  %v3530_v9 = vpack.c.bf16 %v1081_v5, %v1079_v4  ;;  %v1113_v4 = vld [vmem:[#allocation5 + $0x790] sm:$0xff]  ;;  %v1116_v5 = vld [vmem:[#allocation5 + $0x7a8] sm:$0xff] }
  0xec   :  { %3485 = vmatprep.subr.bf16.mxu1 %v3484_v11  ;;  %v3532_v11 = vpack.c.bf16 %v1086_v8, %v1084_v7  ;;  %v1118_v7 = vld [vmem:[#allocation5 + $0x7b8] sm:$0xff] }
  0xef   :  { %3487 = vmatpush1.bf16.msra.mxu1 %v3486_v17  ;;  %v3534_v17 = vpack.c.bf16 %v1085_v13, %v1083_v12  ;;  %v1117_v12 = vld [vmem:[#allocation5 + $0x7b0] sm:$0xff]  ;;  %v1120_v13 = vld [vmem:[#allocation5 + $0x7c8] sm:$0xff] }
  0xf0   :  { %3489 = vmatprep.subr.bf16.mxu1 %v3488_v19  ;;  %v3536_v19 = vpack.c.bf16 %v1090_v16, %v1088_v15  ;;  %v1122_v15 = vld [vmem:[#allocation5 + $0x7d8] sm:$0xff] }
  0xf3   :  { %3491 = vmatpush1.bf16.msra.mxu1 %v3490_v25  ;;  %v3538_v25 = vpack.c.bf16 %v1089_v21, %v1087_v20  ;;  %v1121_v20 = vld [vmem:[#allocation5 + $0x7d0] sm:$0xff]  ;;  %v1124_v21 = vld [vmem:[#allocation5 + $0x7e8] sm:$0xff] }
  0xf4   :  { %3493 = vmatprep.subr.bf16.mxu1 %v3492_v27  ;;  %v3540_v27 = vpack.c.bf16 %v1094_v24, %v1092_v23  ;;  %v1126_v23 = vld [vmem:[#allocation5 + $0x7f8] sm:$0xff] }
  0xf7   :  { %3495 = vmatpush1.bf16.msra.mxu1 %v3494_v33  ;;  %v3542_v33 = vpack.c.bf16 %v1093_v29, %v1091_v28  ;;  %v1125_v28 = vld [vmem:[#allocation5 + $0x7f0] sm:$0xff]  ;;  %v5037_v29 = vmov 0.0  }
  0xf8   :  { %3513 = vmatprep.subr.bf16.mxu1 %v3512_v35  ;;  %v3544_v35 = vpack.c.bf16 %v1098_v32, %v1096_v31  ;;  %536 = vmatprep.mubr.f32.mxu0 %v5037_v29 }
  0xfa   :  { %852 = vmatmul.mubr.f32.vlgmr.msra.gmra.mrb[32].mxu1 %v4346_v40 }
  0xfb   :  { %3515 = vmatpush1.bf16.msra.mxu1 %v3514_v42  ;;  %857 = vmatprep.mubr.f32.mxu1 %v4348_v43  ;;  %v3546_v42 = vpack.c.bf16 %v1097_v37, %v1095_v36 }
  0xfc   :  { %3517 = vmatprep.subr.bf16.mxu1 %v3516_v44  ;;  %v3548_v44 = vpack.c.bf16 %v1102_v39, %v1100_v38 }
  0xfe   :  { %858 = vmatmul.mubr.f32.gmra.mrb[34].mxu1 %v4352_v49 }
  0xff   :  { %3519 = vmatpush1.bf16.msra.mxu1 %v3518_v50  ;;  %863 = vmatprep.mubr.f32.mxu1 %v4354_v54  ;;  %v3550_v50 = vpack.c.bf16 %v1101_v46, %v1099_v45  ;;  %v1744_v46 = vld [vmem:[#allocation5 + $0xa08] sm:$0xff] }
 0x100   :  { %3521 = vmatprep.subr.bf16.mxu1 %v3520_v51  ;;  %v3552_v51 = vpack.c.bf16 %v1106_v48, %v1104_v47  ;;  %v1746_v47 = vld [vmem:[#allocation5 + $0xa18] sm:$0xff] }
 0x101   :  { %v3672_v48 = vpack.c.bf16 %v1746_v47, %v1744_v46 }
 0x102   :  { %864 = vmatmul.mubr.f32.gmra.mrb[36].mxu1 %v4358_v58 }
 0x103   :  { %3523 = vmatpush1.bf16.msra.mxu1 %v3522_v57  ;;  %869 = vmatprep.mubr.f32.mxu1 %v4360_v62  ;;  %v3554_v57 = vpack.c.bf16 %v1105_v53, %v1103_v52  ;;  %v1748_v53 = vld [vmem:[#allocation5 + $0xa28] sm:$0xff] }
 0x104   :  { %3525 = vmatprep.subr.bf16.mxu1 %v3524_v59  ;;  %v3556_v59 = vpack.c.bf16 %v1110_v56, %v1108_v55  ;;  %v1750_v55 = vld [vmem:[#allocation5 + $0xa38] sm:$0xff] }
 0x105   :  { %v3676_v56 = vpack.c.bf16 %v1750_v55, %v1748_v53  ;;  %v1763_v55 = vld [vmem:[#allocation5 + $0xaa0] sm:$0xff] }
 0x106   :  { %870 = vmatmul.mubr.f32.gmra.mrb[38].mxu1 %v4364_v2 }
 0x107   :  { %3527 = vmatpush1.bf16.msra.mxu1 %v3526_v1  ;;  %875 = vmatprep.mubr.f32.mxu1 %v4366_v6  ;;  %v3560_v1 = vpack.c.bf16 %v1114_v63, %v1112_v61  ;;  %v1752_v63 = vld [vmem:[#allocation5 + $0xa48] sm:$0xff] }
 0x108   :  { %3529 = vmatprep.subr.bf16.mxu1 %v3528_v3  ;;  %v1111_v3 = vld [vmem:[#allocation5 + $0x780] sm:$0xff] }
 0x109   :  { %v3562_v8 = vpack.c.bf16 %v1113_v4, %v1111_v3  ;;  %v1751_v3 = vld [vmem:[#allocation5 + $0xa40] sm:$0xff]  ;;  %v1753_v4 = vld [vmem:[#allocation5 + $0xa50] sm:$0xff] }
 0x10a   :  { %876 = vmatmul.mubr.f32.gmra.mrb[40].mxu1 %v4370_v10 }
 0x10b   :  { %3531 = vmatpush1.bf16.msra.mxu1 %v3530_v9  ;;  %881 = vmatprep.mubr.f32.mxu1 %v4372_v14  ;;  %v3564_v9 = vpack.c.bf16 %v1118_v7, %v1116_v5  ;;  %v3682_v7 = vpack.c.bf16 %v1753_v4, %v1751_v3 }
 0x10c   :  { %3533 = vmatprep.subr.bf16.mxu1 %v3532_v11  ;;  %v1115_v11 = vld [vmem:[#allocation5 + $0x7a0] sm:$0xff] }
 0x10d   :  { %v3566_v16 = vpack.c.bf16 %v1117_v12, %v1115_v11  ;;  %v1756_v12 = vld [vmem:[#allocation5 + $0xa68] sm:$0xff] }
 0x10e   :  { %882 = vmatmul.mubr.f32.gmra.mrb[42].mxu1 %v4376_v18 }
 0x10f   :  { %3535 = vmatpush1.bf16.msra.mxu1 %v3534_v17  ;;  %887 = vmatprep.mubr.f32.mxu1 %v4378_v22  ;;  %v3568_v17 = vpack.c.bf16 %v1122_v15, %v1120_v13  ;;  %v1758_v13 = vld [vmem:[#allocation5 + $0xa78] sm:$0xff] }
 0x110   :  { %3537 = vmatprep.subr.bf16.mxu1 %v3536_v19  ;;  %v1119_v19 = vld [vmem:[#allocation5 + $0x7c0] sm:$0xff]  ;;  %v3684_v15 = vpack.c.bf16 %v1758_v13, %v1756_v12 }
 0x111   :  { %v3570_v24 = vpack.c.bf16 %v1121_v20, %v1119_v19  ;;  %v1771_v13 = vld [vmem:[#allocation5 + $0xae0] sm:$0xff] }
 0x112   :  { %888 = vmatmul.mubr.f32.gmra.mrb[44].mxu1 %v4382_v26 }
 0x113   :  { %3539 = vmatpush1.bf16.msra.mxu1 %v3538_v25  ;;  %893 = vmatprep.mubr.f32.mxu1 %v4384_v30  ;;  %v3572_v25 = vpack.c.bf16 %v1126_v23, %v1124_v21  ;;  %v1760_v23 = vld [vmem:[#allocation5 + $0xa88] sm:$0xff] }
 0x114   :  { %3541 = vmatprep.subr.bf16.mxu1 %v3540_v27  ;;  %v1123_v27 = vld [vmem:[#allocation5 + $0x7e0] sm:$0xff] }
 0x115   :  { %v3574_v31 = vpack.c.bf16 %v1125_v28, %v1123_v27  ;;  %v1759_v27 = vld [vmem:[#allocation5 + $0xa80] sm:$0xff]  ;;  %v1761_v28 = vld [vmem:[#allocation5 + $0xa90] sm:$0xff] }
 0x116   :  { %894 = vmatmul.mubr.f32.gmra.mrb[46].mxu1 %v4388_v34  ;;  %v3690_v46 = vpack.c.bf16 %v1761_v28, %v1759_v27 }
 0x117   :  { %3543 = vmatpush1.bf16.msra.mxu1 %v3542_v33  ;;  %1191 = vmatprep.mubr.f32.mxu1 %v4343_v41  ;;  %v1109_v41 = vld [vmem:[#allocation5 + $0x770] sm:$0xff] }
 0x118   :  { %3545 = vmatprep.subr.bf16.mxu1 %v3544_v35  ;;  %v3558_v0 = vpack.c.bf16 %v1109_v41, %v1107_v60 }
 0x11b   :  { %3547 = vmatpush1.bf16.msra.mxu1 %v3546_v42 }
 0x11c   :  { %3549 = vmatprep.subr.bf16.mxu1 %v3548_v44 }
 0x11f   :  { %3551 = vmatpush1.bf16.msra.mxu1 %v3550_v50  ;;  %v1743_v50 = vld [vmem:[#allocation5 + $0xa00] sm:$0xff] }
 0x120   :  { %3553 = vmatprep.subr.bf16.mxu1 %v3552_v51  ;;  %v1745_v51 = vld [vmem:[#allocation5 + $0xa10] sm:$0xff] }
 0x121   :  { %v3674_v52 = vpack.c.bf16 %v1745_v51, %v1743_v50  ;;  %v1764_v51 = vld [vmem:[#allocation5 + $0xaa8] sm:$0xff] }
 0x123   :  { %3555 = vmatpush1.bf16.msra.mxu1 %v3554_v57  ;;  %v1747_v57 = vld [vmem:[#allocation5 + $0xa20] sm:$0xff] }
 0x124   :  { %3557 = vmatprep.subr.bf16.mxu1 %v3556_v59  ;;  %v1749_v59 = vld [vmem:[#allocation5 + $0xa30] sm:$0xff] }
 0x125   :  { %v3678_v41 = vpack.c.bf16 %v1749_v59, %v1747_v57 }
 0x127   :  { %3559 = vmatpush1.bf16.msra.mxu1 %v3558_v0  ;;  %v1754_v0 = vld [vmem:[#allocation5 + $0xa58] sm:$0xff] }
 0x128   :  { %3561 = vmatprep.subr.bf16.mxu1 %v3560_v1  ;;  %v3680_v1 = vpack.c.bf16 %v1754_v0, %v1752_v63  ;;  %v1767_v0 = vld [vmem:[#allocation5 + $0xac0] sm:$0xff] }
 0x12b   :  { %3563 = vmatpush1.bf16.msra.mxu1 %v3562_v8 }
 0x12c   :  { %3565 = vmatprep.subr.bf16.mxu1 %v3564_v9 }
 0x12f   :  { %3567 = vmatpush1.bf16.msra.mxu1 %v3566_v16  ;;  %v1755_v16 = vld [vmem:[#allocation5 + $0xa60] sm:$0xff] }
 0x130   :  { %3569 = vmatprep.subr.bf16.mxu1 %v3568_v17  ;;  %v1757_v17 = vld [vmem:[#allocation5 + $0xa70] sm:$0xff] }
 0x131   :  { %v3686_v20 = vpack.c.bf16 %v1757_v17, %v1755_v16 }
 0x133   :  { %3571 = vmatpush1.bf16.msra.mxu1 %v3570_v24  ;;  %v1762_v24 = vld [vmem:[#allocation5 + $0xa98] sm:$0xff] }
 0x134   :  { %3573 = vmatprep.subr.bf16.mxu1 %v3572_v25  ;;  %v3688_v25 = vpack.c.bf16 %v1762_v24, %v1760_v23  ;;  %v1775_v24 = vld [vmem:[#allocation5 + $0xb00] sm:$0xff] }
 0x137   :  { %3575 = vmatpush1.bf16.msra.mxu1 %v3574_v31 }
 0x138   :  { %3673 = vmatprep.subr.bf16.mxu1 %v3672_v48 }
 0x13a   :  { %1192 = vmatmul.mubr.f32.vlgmr.msra.gmra.mrb[48].mxu1 %v4346_v40 }
 0x13b   :  { %1197 = vmatprep.mubr.f32.mxu1 %v4348_v43  ;;  %3675 = vmatpush1.bf16.msra.mxu1 %v3674_v52  ;;  %v1766_v52 = vld [vmem:[#allocation5 + $0xab8] sm:$0xff] }
 0x13c   :  { %3677 = vmatprep.subr.bf16.mxu1 %v3676_v56  ;;  %v3692_v53 = vpack.c.bf16 %v1766_v52, %v1764_v51  ;;  %v1765_v56 = vld [vmem:[#allocation5 + $0xab0] sm:$0xff]  ;;  %v1779_v52 = vld [vmem:[#allocation5 + $0xb20] sm:$0xff] }
 0x13d   :  { %v3694_v59 = vpack.c.bf16 %v1765_v56, %v1763_v55  ;;  %v439_v56 = vld [vmem:[#allocation7 + $0x40] sm:$0xff] }
 0x13e   :  { %1198 = vmatmul.mubr.f32.gmra.mrb[50].mxu1 %v4352_v49 }
 0x13f   :  { %1203 = vmatprep.mubr.f32.mxu1 %v4354_v54  ;;  %3679 = vmatpush1.bf16.msra.mxu1 %v3678_v41  ;;  %v1768_v41 = vld [vmem:[#allocation5 + $0xac8] sm:$0xff] }
 0x140   :  { %3681 = vmatprep.subr.bf16.mxu1 %v3680_v1  ;;  %v1769_v1 = vld [vmem:[#allocation5 + $0xad0] sm:$0xff] }
 0x141   :  { %v3698_v4 = vpack.c.bf16 %v1769_v1, %v1767_v0  ;;  %v1789_v1 = vld [vmem:[#allocation5 + $0xb70] sm:$0xff] }
 0x142   :  { %1204 = vmatmul.mubr.f32.gmra.mrb[52].mxu1 %v4358_v58 }
 0x143   :  { %1209 = vmatprep.mubr.f32.mxu1 %v4360_v62  ;;  %3683 = vmatpush1.bf16.msra.mxu1 %v3682_v7 }
 0x144   :  { %3685 = vmatprep.subr.bf16.mxu1 %v3684_v15  ;;  %v1773_v15 = vld [vmem:[#allocation5 + $0xaf0] sm:$0xff] }
 0x145   :  { %v3702_v17 = vpack.c.bf16 %v1773_v15, %v1771_v13  ;;  %v445_v15 = vld [vmem:[#allocation7 + $0x70] sm:$0xff] }
 0x146   :  { %1210 = vmatmul.mubr.f32.gmra.mrb[54].mxu1 %v4364_v2 }
 0x147   :  { %1215 = vmatprep.mubr.f32.mxu1 %v4366_v6  ;;  %v4456_v6 = vld [vmem:[#allocation2 + $0x8] sm:$0xff]  ;;  %3687 = vmatpush1.bf16.msra.mxu1 %v3686_v20 }
 0x148   :  { %3689 = vmatprep.subr.bf16.mxu1 %v3688_v25  ;;  %v1776_v20 = vld [vmem:[#allocation5 + $0xb08] sm:$0xff]  ;;  %v1777_v25 = vld [vmem:[#allocation5 + $0xb10] sm:$0xff] }
 0x149   :  { %v3706_v28 = vpack.c.bf16 %v1777_v25, %v1775_v24  ;;  %v446_v24 = vld [vmem:[#allocation7 + $0x78] sm:$0xff]  ;;  %v4529_v25 = vld [vmem:[#allocation2] sm:$0xff] }
 0x14a   :  { %1216 = vmatmul.mubr.f32.gmra.mrb[56].mxu1 %v4370_v10 }
 0x14b   :  { %1221 = vmatprep.mubr.f32.mxu1 %v4372_v14  ;;  %3691 = vmatpush1.bf16.msra.mxu1 %v3690_v46 }
 0x14c   :  { %3693 = vmatprep.subr.bf16.mxu1 %v3692_v53  ;;  %v1781_v53 = vld [vmem:[#allocation5 + $0xb30] sm:$0xff] }
 0x14d   :  { %v4435_v32 = vpop.f32.mrb[0].mxu1  ;;  %v3710_v55 = vpack.c.bf16 %v1781_v53, %v1779_v52  ;;  %v252_v53 = vld [vmem:[#allocation7] sm:$0xff] }
 0x14e   :  { %v4437_v40 = vpop.f32.mrb[1].mxu1  ;;  %1222 = vmatmul.mubr.f32.gmra.mrb[58].mxu1 %v4376_v18 }
 0x14f   :  { %1227 = vmatprep.mubr.f32.mxu1 %v4378_v22  ;;  %3695 = vmatpush1.bf16.msra.mxu1 %v3694_v59  ;;  %v1786_v59 = vld [vmem:[#allocation5 + $0xb58] sm:$0xff] }
 0x151   :  { %v4441_v43 = vpop.f32.mrb[2].mxu1 }
 0x152   :  { %v3418_v49 = vpack.c.bf16 %v4441_v43, %v4435_v32  ;;  %v4445_v54 = vpop.f32.mrb[3].mxu1  ;;  %1228 = vmatmul.mubr.f32.gmra.mrb[60].mxu1 %v4382_v26  ;;  %v441_v32 = vld [vmem:[#allocation7 + $0x50] sm:$0xff]  ;;  %v1792_v43 = vld [vmem:[#allocation5 + $0xb88] sm:$0xff] }
 0x153   :  { %v3416_v58 = vpack.c.bf16 %v4445_v54, %v4437_v40  ;;  %1233 = vmatprep.mubr.f32.mxu1 %v4384_v30  ;;  %v1788_v40 = vld [vmem:[#allocation5 + $0xb68] sm:$0xff]  ;;  %v1790_v54 = vld [vmem:[#allocation5 + $0xb78] sm:$0xff] }
 0x155   :  { %v4451_v62 = vpop.f32.mrb[4].mxu1 }
 0x156   :  { %1234 = vmatmul.mubr.f32.gmra.mrb[62].mxu1 %v4388_v34  ;;  %v4454_v2 = vpop.f32.mrb[5].mxu1 }
 0x157   :  { %1871 = vmatprep.mubr.f32.mxu1 %v4456_v6 }
 0x159   :  { %v4459_v10 = vpop.f32.mrb[6].mxu1 }
 0x15a   :  { %v3422_v14 = vpack.c.bf16 %v4459_v10, %v4451_v62  ;;  %v4463_v18 = vpop.f32.mrb[7].mxu1  ;;  %v442_v62 = vld [vmem:[#allocation7 + $0x58] sm:$0xff]  ;;  %v1796_v10 = vld [vmem:[#allocation5 + $0xba8] sm:$0xff] }
 0x15b   :  { %v3420_v22 = vpack.c.bf16 %v4463_v18, %v4454_v2  ;;  %v1791_v2 = vld [vmem:[#allocation5 + $0xb80] sm:$0xff]  ;;  %v1793_v18 = vld [vmem:[#allocation5 + $0xb90] sm:$0xff] }
 0x15d   :  { %v4467_v26 = vpop.f32.mrb[8].mxu1 }
 0x15e   :  { %v4469_v30 = vpop.f32.mrb[9].mxu1 }
 0x161   :  { %v4471_v34 = vpop.f32.mrb[10].mxu1 }
 0x162   :  { %v3426_v33 = vpack.c.bf16 %v4471_v34, %v4467_v26  ;;  %v4475_v35 = vpop.f32.mrb[11].mxu1  ;;  %v443_v26 = vld [vmem:[#allocation7 + $0x60] sm:$0xff]  ;;  %v1800_v34 = vld [vmem:[#allocation5 + $0xbc8] sm:$0xff] }
 0x163   :  { %v3424_v36 = vpack.c.bf16 %v4475_v35, %v4469_v30  ;;  %v1795_v30 = vld [vmem:[#allocation5 + $0xba0] sm:$0xff]  ;;  %v1797_v35 = vld [vmem:[#allocation5 + $0xbb0] sm:$0xff] }
 0x165   :  { %v4479_v37 = vpop.f32.mrb[12].mxu1 }
 0x166   :  { %v4481_v38 = vpop.f32.mrb[13].mxu1 }
 0x169   :  { %v4483_v39 = vpop.f32.mrb[14].mxu1 }
 0x16a   :  { %v3430_v42 = vpack.c.bf16 %v4483_v39, %v4479_v37  ;;  %v4487_v44 = vpop.f32.mrb[15].mxu1  ;;  %v1806_v37 = vld [vmem:[#allocation5 + $0xbf8] sm:$0xff]  ;;  %v1803_v39 = vld [vmem:[#allocation5 + $0xbe0] sm:$0xff] }
 0x16b   :  { %v3428_v45 = vpack.c.bf16 %v4487_v44, %v4481_v38  ;;  %v1799_v38 = vld [vmem:[#allocation5 + $0xbc0] sm:$0xff]  ;;  %v1801_v44 = vld [vmem:[#allocation5 + $0xbd0] sm:$0xff] }
 0x18d   :  { %v391_v60 = vpop.f32.mrb[16].mxu1 }
 0x18e   :  { %v393_v61 = vpop.f32.mrb[17].mxu1 }
 0x191   :  { %v397_v5 = vpop.f32.mrb[18].mxu1 }
 0x192   :  { %v3402_v8 = vpack.c.bf16 %v397_v5, %v391_v60  ;;  %v399_v9 = vpop.f32.mrb[19].mxu1 }
 0x193   :  { %v3400_v11 = vpack.c.bf16 %v399_v9, %v393_v61  ;;  %v1770_v61 = vld [vmem:[#allocation5 + $0xad8] sm:$0xff]  ;;  %v1772_v9 = vld [vmem:[#allocation5 + $0xae8] sm:$0xff] }
 0x194   :  { %v3696_v63 = vpack.c.bf16 %v1770_v61, %v1768_v41  ;;  %v1785_v61 = vld [vmem:[#allocation5 + $0xb50] sm:$0xff] }
 0x195   :  { %3401 = vmatprep.subr.bf16.mxu0 %v3400_v11  ;;  %v403_v19 = vpop.f32.mrb[20].mxu1  ;;  %v1774_v11 = vld [vmem:[#allocation5 + $0xaf8] sm:$0xff] }
 0x196   :  { %3403 = vmatpush1.bf16.msra.mxu0 %v3402_v8  ;;  %v405_v21 = vpop.f32.mrb[21].mxu1  ;;  %3697 = vmatprep.subr.bf16.mxu1 %v3696_v63  ;;  %v3700_v12 = vpack.c.bf16 %v1774_v11, %v1772_v9  ;;  %v440_v63 = vld [vmem:[#allocation7 + $0x48] sm:$0xff] }
 0x197   :  { %3699 = vmatpush1.bf16.msra.mxu1 %v3698_v4  ;;  %v444_v9 = vld [vmem:[#allocation7 + $0x68] sm:$0xff] }
 0x198   :  { %3701 = vmatprep.subr.bf16.mxu1 %v3700_v12  ;;  %v1804_v11 = vld [vmem:[#allocation5 + $0xbe8] sm:$0xff] }
 0x199   :  { %v409_v31 = vpop.f32.mrb[22].mxu1  ;;  %v3732_v12 = vpack.c.bf16 %v1806_v37, %v1804_v11  ;;  %v2104_v11 = vld [vmem:[#allocation5 + $0xca8] sm:$0xff]  ;;  %v4561_v37 = vld [vmem:[#allocation2 + $0x40] sm:$0xff] }
 0x19a   :  { %v3406_v47 = vpack.c.bf16 %v409_v31, %v403_v19  ;;  %v411_v48 = vpop.f32.mrb[23].mxu1 }
 0x19b   :  { %v3404_v50 = vpack.c.bf16 %v411_v48, %v405_v21  ;;  %3703 = vmatpush1.bf16.msra.mxu1 %v3702_v17  ;;  %v1778_v21 = vld [vmem:[#allocation5 + $0xb18] sm:$0xff]  ;;  %v1780_v48 = vld [vmem:[#allocation5 + $0xb28] sm:$0xff] }
 0x19c   :  { %v3704_v23 = vpack.c.bf16 %v1778_v21, %v1776_v20  ;;  %v2086_v17 = vld [vmem:[#allocation5 + $0xc18] sm:$0xff]  ;;  %v2085_v20 = vld [vmem:[#allocation5 + $0xc10] sm:$0xff] }
 0x19d   :  { %v415_v57 = vpop.f32.mrb[24].mxu1  ;;  %3405 = vmatprep.subr.bf16.mxu0 %v3404_v50  ;;  %v1782_v50 = vld [vmem:[#allocation5 + $0xb38] sm:$0xff] }
 0x19e   :  { %v417_v60 = vpop.f32.mrb[25].mxu1  ;;  %3407 = vmatpush1.bf16.msra.mxu0 %v3406_v47  ;;  %3705 = vmatprep.subr.bf16.mxu1 %v3704_v23  ;;  %v3708_v51 = vpack.c.bf16 %v1782_v50, %v1780_v48 }
 0x19f   :  { %3707 = vmatpush1.bf16.msra.mxu1 %v3706_v28  ;;  %v2090_v28 = vld [vmem:[#allocation5 + $0xc38] sm:$0xff] }
 0x1a0   :  { %3709 = vmatprep.subr.bf16.mxu1 %v3708_v51 }
 0x1a1   :  { %v421_v3 = vpop.f32.mrb[26].mxu1 }
 0x1a2   :  { %v3410_v5 = vpack.c.bf16 %v421_v3, %v415_v57  ;;  %v423_v7 = vpop.f32.mrb[27].mxu1  ;;  %v1784_v57 = vld [vmem:[#allocation5 + $0xb48] sm:$0xff]  ;;  %v3716_v3 = vpack.c.bf16 %v1790_v54, %v1788_v40 }
 0x1a3   :  { %v3408_v8 = vpack.c.bf16 %v423_v7, %v417_v60  ;;  %3711 = vmatpush1.bf16.msra.mxu1 %v3710_v55  ;;  %v1783_v60 = vld [vmem:[#allocation5 + $0xb40] sm:$0xff]  ;;  %v3712_v41 = vpack.c.bf16 %v1786_v59, %v1784_v57  ;;  %v3726_v7 = vpack.c.bf16 %v1797_v35, %v1795_v30  ;;  %v4537_v55 = vld [vmem:[#allocation2 + $0x10] sm:$0xff]  ;;  %v2094_v57 = vld [vmem:[#allocation5 + $0xc58] sm:$0xff] }
 0x1a4   :  { %v3714_v0 = vpack.c.bf16 %v1785_v61, %v1783_v60  ;;  %v2091_v59 = vld [vmem:[#allocation5 + $0xc40] sm:$0xff]  ;;  %v2093_v60 = vld [vmem:[#allocation5 + $0xc50] sm:$0xff]  ;;  %v2102_v35 = vld [vmem:[#allocation5 + $0xc98] sm:$0xff] }
 0x1a5   :  { %v427_v16 = vpop.f32.mrb[28].mxu1  ;;  %3409 = vmatprep.subr.bf16.mxu0 %v3408_v8  ;;  %3713 = vmatprep.subr.bf16.mxu1 %v3712_v41  ;;  %v3730_v8 = vpack.c.bf16 %v1801_v44, %v1799_v38  ;;  %v4540_v41 = vld [vmem:[#allocation2 + $0x28] sm:$0xff]  ;;  %v4553_v30 = vld [vmem:[#allocation2 + $0x30] sm:$0xff] }
 0x1a6   :  { %v429_v19 = vpop.f32.mrb[29].mxu1  ;;  %3411 = vmatpush1.bf16.msra.mxu0 %v3410_v5  ;;  %v3722_v5 = vpack.c.bf16 %v1793_v18, %v1791_v2  ;;  %v4548_v2 = vld [vmem:[#allocation2 + $0x38] sm:$0xff] }
 0x1a7   :  { %3715 = vmatpush1.bf16.msra.mxu1 %v3714_v0  ;;  %v3762_v0 = vpack.c.bf16 %v2093_v60, %v2091_v59  ;;  %v4577_v59 = vld [vmem:[#allocation2 + $0x60] sm:$0xff]  ;;  %v2114_v60 = vld [vmem:[#allocation5 + $0xcf8] sm:$0xff] }
 0x1a8   :  { %3717 = vmatprep.subr.bf16.mxu1 %v3716_v3  ;;  %v2096_v3 = vld [vmem:[#allocation5 + $0xc68] sm:$0xff] }
 0x1a9   :  { %v433_v27 = vpop.f32.mrb[30].mxu1 }
 0x1aa   :  { %v3414_v31 = vpack.c.bf16 %v433_v27, %v427_v16  ;;  %v435_v46 = vpop.f32.mrb[31].mxu1  ;;  %v2084_v16 = vld [vmem:[#allocation5 + $0xc08] sm:$0xff] }
 0x1ab   :  { %v3412_v47 = vpack.c.bf16 %v435_v46, %v429_v19  ;;  %v2083_v19 = vld [vmem:[#allocation5 + $0xc00] sm:$0xff]  ;;  %v3752_v21 = vpack.c.bf16 %v2086_v17, %v2084_v16  ;;  %v2088_v27 = vld [vmem:[#allocation5 + $0xc28] sm:$0xff] }
 0x1ac   :  { %v3754_v23 = vpack.c.bf16 %v2085_v20, %v2083_v19  ;;  %v2087_v46 = vld [vmem:[#allocation5 + $0xc20] sm:$0xff]  ;;  %v3756_v50 = vpack.c.bf16 %v2090_v28, %v2088_v27  ;;  %v2109_v28 = vld [vmem:[#allocation5 + $0xcd0] sm:$0xff] }
 0x1ad   :  { %3413 = vmatprep.subr.bf16.mxu0 %v3412_v47  ;;  %v2089_v47 = vld [vmem:[#allocation5 + $0xc30] sm:$0xff]  ;;  %v256_v20 = vld [vmem:[#allocation7 + $0x20] sm:$0xff] }
 0x1ae   :  { %3415 = vmatpush1.bf16.msra.mxu0 %v3414_v31  ;;  %v4532_v31 = vld [vmem:[#allocation2 + $0x18] sm:$0xff]  ;;  %v3758_v51 = vpack.c.bf16 %v2089_v47, %v2087_v46  ;;  %v2107_v27 = vld [vmem:[#allocation5 + $0xcc0] sm:$0xff]  ;;  %v4572_v46 = vld [vmem:[#allocation2 + $0x68] sm:$0xff] }
 0x1af   :  { %3417 = vmatprep.subr.bf16.mxu0 %v3416_v58  ;;  %v1787_v58 = vld [vmem:[#allocation5 + $0xb60] sm:$0xff] }
 0x1b0   :  { %v3718_v4 = vpack.c.bf16 %v1789_v1, %v1787_v58  ;;  %v253_v58 = vld [vmem:[#allocation7 + $0x8] sm:$0xff] }
 0x1b1   :  { %3200 = vmatmul.mubr.msk.f32.vlgmr.msra.gmra.mrb[0].mxu0 %vm447_vm0, %v439_v56  ;;  %v2092_v56 = vld [vmem:[#allocation5 + $0xc48] sm:$0xff] }
 0x1b2   :  { %3419 = vmatpush1.bf16.msra.mxu0 %v3418_v49  ;;  %542 = vmatprep.mubr.f32.mxu0 %v5037_v29  ;;  %v1794_v49 = vld [vmem:[#allocation5 + $0xb98] sm:$0xff] }
 0x1b3   :  { %3421 = vmatprep.subr.bf16.mxu0 %v3420_v22  ;;  %3719 = vmatpush1.bf16.msra.mxu1 %v3718_v4  ;;  %v3720_v22 = vpack.c.bf16 %v1794_v49, %v1792_v43  ;;  %v4545_v4 = vld [vmem:[#allocation2 + $0x20] sm:$0xff]  ;;  %v2097_v49 = vld [vmem:[#allocation5 + $0xc70] sm:$0xff] }
 0x1b4   :  { %v2095_v43 = vld [vmem:[#allocation5 + $0xc60] sm:$0xff] }
 0x1b5   :  { %3201 = vmatmul.mubr.msk.f32.gmra.mrb[2].mxu0 %vm447_vm0, %v440_v63  ;;  %3721 = vmatprep.subr.bf16.mxu1 %v3720_v22  ;;  %v3760_v63 = vpack.c.bf16 %v2094_v57, %v2092_v56  ;;  %v2112_v57 = vld [vmem:[#allocation5 + $0xce8] sm:$0xff] }
 0x1b6   :  { %3423 = vmatpush1.bf16.msra.mxu0 %v3422_v14  ;;  %548 = vmatprep.mubr.f32.mxu0 %v5037_v29  ;;  %v1798_v14 = vld [vmem:[#allocation5 + $0xbb8] sm:$0xff] }
 0x1b7   :  { %3425 = vmatprep.subr.bf16.mxu0 %v3424_v36  ;;  %3723 = vmatpush1.bf16.msra.mxu1 %v3722_v5  ;;  %v3724_v36 = vpack.c.bf16 %v1798_v14, %v1796_v10  ;;  %v3766_v5 = vpack.c.bf16 %v2097_v49, %v2095_v43  ;;  %v254_v10 = vld [vmem:[#allocation7 + $0x10] sm:$0xff]  ;;  %v2100_v14 = vld [vmem:[#allocation5 + $0xc88] sm:$0xff]  ;;  %v2118_v49 = vld [vmem:[#allocation5 + $0xd18] sm:$0xff] }
 0x1b8   :  { %v4585_v43 = vld [vmem:[#allocation2 + $0x70] sm:$0xff] }
 0x1b9   :  { %3202 = vmatmul.mubr.msk.f32.gmra.mrb[4].mxu0 %vm447_vm0, %v441_v32  ;;  %3725 = vmatprep.subr.bf16.mxu1 %v3724_v36  ;;  %v2098_v32 = vld [vmem:[#allocation5 + $0xc78] sm:$0xff]  ;;  %v2099_v36 = vld [vmem:[#allocation5 + $0xc80] sm:$0xff] }
 0x1ba   :  { %3427 = vmatpush1.bf16.msra.mxu0 %v3426_v33  ;;  %554 = vmatprep.mubr.f32.mxu0 %v5037_v29  ;;  %v1802_v33 = vld [vmem:[#allocation5 + $0xbd8] sm:$0xff]  ;;  %v3764_v22 = vpack.c.bf16 %v2098_v32, %v2096_v3  ;;  %v258_v3 = vld [vmem:[#allocation7 + $0x30] sm:$0xff]  ;;  %v2116_v32 = vld [vmem:[#allocation5 + $0xd08] sm:$0xff] }
 0x1bb   :  { %3429 = vmatprep.subr.bf16.mxu0 %v3428_v45  ;;  %3727 = vmatpush1.bf16.msra.mxu1 %v3726_v7  ;;  %v3728_v45 = vpack.c.bf16 %v1802_v33, %v1800_v34  ;;  %v2101_v7 = vld [vmem:[#allocation5 + $0xc90] sm:$0xff]  ;;  %v3768_v33 = vpack.c.bf16 %v2102_v35, %v2100_v14 }
 0x1bc   :  { %v3770_v38 = vpack.c.bf16 %v2101_v7, %v2099_v36  ;;  %v259_v36 = vld [vmem:[#allocation7 + $0x38] sm:$0xff] }
 0x1bd   :  { %3203 = vmatmul.mubr.msk.f32.gmra.mrb[6].mxu0 %vm447_vm0, %v442_v62  ;;  %3729 = vmatprep.subr.bf16.mxu1 %v3728_v45 }
 0x1be   :  { %3431 = vmatpush1.bf16.msra.mxu0 %v3430_v42  ;;  %560 = vmatprep.mubr.f32.mxu0 %v5037_v29  ;;  %v1805_v42 = vld [vmem:[#allocation5 + $0xbf0] sm:$0xff] }
 0x1bf   :  { %3731 = vmatpush1.bf16.msra.mxu1 %v3730_v8  ;;  %v3734_v13 = vpack.c.bf16 %v1805_v42, %v1803_v39  ;;  %v255_v8 = vld [vmem:[#allocation7 + $0x18] sm:$0xff]  ;;  %v2103_v42 = vld [vmem:[#allocation5 + $0xca0] sm:$0xff] }
 0x1c0   :  { %3733 = vmatprep.subr.bf16.mxu1 %v3732_v12  ;;  %v2106_v39 = vld [vmem:[#allocation5 + $0xcb8] sm:$0xff]  ;;  %v2105_v12 = vld [vmem:[#allocation5 + $0xcb0] sm:$0xff] }
 0x1c1   :  { %3204 = vmatmul.mubr.msk.f32.gmra.mrb[8].mxu0 %vm447_vm0, %v443_v26  ;;  %v4556_v26 = vld [vmem:[#allocation2 + $0x48] sm:$0xff]  ;;  %v3772_v16 = vpack.c.bf16 %v2106_v39, %v2104_v11  ;;  %v3774_v17 = vpack.c.bf16 %v2105_v12, %v2103_v42  ;;  %v2126_v11 = vld [vmem:[#allocation5 + $0xd58] sm:$0xff]  ;;  %v2123_v42 = vld [vmem:[#allocation5 + $0xd40] sm:$0xff] }
 0x1c2   :  { %566 = vmatprep.mubr.f32.mxu0 %v5037_v29  ;;  %v2125_v12 = vld [vmem:[#allocation5 + $0xd50] sm:$0xff] }
 0x1c3   :  { %3735 = vmatpush1.bf16.msra.mxu1 %v3734_v13  ;;  %v4564_v13 = vld [vmem:[#allocation2 + $0x58] sm:$0xff] }
 0x1c4   :  { %3753 = vmatprep.subr.bf16.mxu1 %v3752_v21  ;;  %v2108_v21 = vld [vmem:[#allocation5 + $0xcc8] sm:$0xff] }
 0x1c5   :  { %3205 = vmatmul.mubr.msk.f32.gmra.mrb[10].mxu0 %vm447_vm0, %v444_v9 }
 0x1c6   :  { %572 = vmatprep.mubr.f32.mxu0 %v5037_v29  ;;  %1872 = vmatmul.mubr.f32.vlgmr.msra.gmra.mrb[64].mxu1 %v4529_v25 }
 0x1c7   :  { %3755 = vmatpush1.bf16.msra.mxu1 %v3754_v23  ;;  %1877 = vmatprep.mubr.f32.mxu1 %v4532_v31  ;;  %v4569_v23 = vld [vmem:[#allocation2 + $0x50] sm:$0xff] }
 0x1c8   :  { %3757 = vmatprep.subr.bf16.mxu1 %v3756_v50  ;;  %v3778_v50 = vpack.c.bf16 %v2109_v28, %v2107_v27  ;;  %v903_v28 = vld [vmem:[#allocation7 + $0x90] sm:$0xff] }
 0x1c9   :  { %3206 = vmatmul.mubr.msk.f32.gmra.mrb[12].mxu0 %vm447_vm0, %v445_v15 }
 0x1ca   :  { %578 = vmatprep.mubr.f32.mxu0 %v5037_v29  ;;  %1878 = vmatmul.mubr.f32.gmra.mrb[66].mxu1 %v4537_v55 }
 0x1cb   :  { %3759 = vmatpush1.bf16.msra.mxu1 %v3758_v51  ;;  %1883 = vmatprep.mubr.f32.mxu1 %v4540_v41 }
 0x1cc   :  { %3761 = vmatprep.subr.bf16.mxu1 %v3760_v63  ;;  %v2113_v63 = vld [vmem:[#allocation5 + $0xcf0] sm:$0xff] }
 0x1cd   :  { %v853_v48 = vpop.f32.mrb[32].mxu1  ;;  %3207 = vmatmul.mubr.msk.f32.gmra.mrb[14].mxu0 %vm447_vm0, %v446_v24  ;;  %v2110_v24 = vld [vmem:[#allocation5 + $0xcd8] sm:$0xff] }
 0x1ce   :  { %v855_v52 = vpop.f32.mrb[33].mxu1  ;;  %673 = vmatprep.mubr.f32.mxu0 %v5037_v29  ;;  %1884 = vmatmul.mubr.f32.gmra.mrb[68].mxu1 %v4545_v4 }
 0x1cf   :  { %3763 = vmatpush1.bf16.msra.mxu1 %v3762_v0  ;;  %1889 = vmatprep.mubr.f32.mxu1 %v4548_v2  ;;  %v4580_v0 = vld [vmem:[#allocation2 + $0x78] sm:$0xff] }
 0x1d0   :  { %3765 = vmatprep.subr.bf16.mxu1 %v3764_v22  ;;  %v2117_v22 = vld [vmem:[#allocation5 + $0xd10] sm:$0xff] }
 0x1d1   :  { %v859_v61 = vpop.f32.mrb[34].mxu1  ;;  %3208 = vmatmul.mubr.msk.f32.vlgmr.msra.gmra.mrb[0].mxu0 %vm447_vm0, %v252_v53  ;;  %v257_v53 = vld [vmem:[#allocation7 + $0x28] sm:$0xff] }
 0x1d2   :  { %v3498_v40 = vpack.c.bf16 %v859_v61, %v853_v48  ;;  %v861_v54 = vpop.f32.mrb[35].mxu1  ;;  %679 = vmatprep.mubr.f32.mxu0 %v5037_v29  ;;  %1890 = vmatmul.mubr.f32.gmra.mrb[70].mxu1 %v4553_v30  ;;  %v3776_v48 = vpack.c.bf16 %v2110_v24, %v2108_v21  ;;  %v2111_v61 = vld [vmem:[#allocation5 + $0xce0] sm:$0xff]  ;;  %v2129_v24 = vld [vmem:[#allocation5 + $0xd70] sm:$0xff] }
 0x1d3   :  { %v3496_v1 = vpack.c.bf16 %v861_v54, %v855_v52  ;;  %3767 = vmatpush1.bf16.msra.mxu1 %v3766_v5  ;;  %1895 = vmatprep.mubr.f32.mxu1 %v4556_v26  ;;  %v3780_v54 = vpack.c.bf16 %v2114_v60, %v2112_v57  ;;  %v2127_v21 = vld [vmem:[#allocation5 + $0xd60] sm:$0xff]  ;;  %v2136_v57 = vld [vmem:[#allocation5 + $0xda8] sm:$0xff]  ;;  %v2138_v60 = vld [vmem:[#allocation5 + $0xdb8] sm:$0xff] }
 0x1d4   :  { %3769 = vmatprep.subr.bf16.mxu1 %v3768_v33  ;;  %v2122_v33 = vld [vmem:[#allocation5 + $0xd38] sm:$0xff]  ;;  %v3798_v27 = vpack.c.bf16 %v2129_v24, %v2127_v21  ;;  %v2431_v21 = vld [vmem:[#allocation5 + $0xe40] sm:$0xff] }
 0x1d5   :  { %3497 = vmatprep.subr.bf16.mxu0 %v3496_v1  ;;  %v865_v18 = vpop.f32.mrb[36].mxu1  ;;  %3209 = vmatmul.mubr.msk.f32.gmra.mrb[2].mxu0 %vm447_vm0, %v253_v58  ;;  %v3782_v58 = vpack.c.bf16 %v2113_v63, %v2111_v61  ;;  %v3804_v61 = vpack.c.bf16 %v2138_v60, %v2136_v57  ;;  %v2135_v63 = vld [vmem:[#allocation5 + $0xda0] sm:$0xff] }
 0x1d6   :  { %3499 = vmatpush1.bf16.msra.mxu0 %v3498_v40  ;;  %v867_v62 = vpop.f32.mrb[37].mxu1  ;;  %685 = vmatprep.mubr.f32.mxu0 %v5037_v29 }
 0x1d7   :  { %1896 = vmatmul.mubr.f32.gmra.mrb[72].mxu1 %v4561_v37 }
 0x1d8   :  { %3771 = vmatpush1.bf16.msra.mxu1 %v3770_v38  ;;  %1901 = vmatprep.mubr.f32.mxu1 %v4564_v13  ;;  %v2119_v38 = vld [vmem:[#allocation5 + $0xd20] sm:$0xff] }
 0x1d9   :  { %v871_v34 = vpop.f32.mrb[38].mxu1  ;;  %3210 = vmatmul.mubr.msk.f32.gmra.mrb[4].mxu0 %vm447_vm0, %v254_v10  ;;  %3773 = vmatprep.subr.bf16.mxu1 %v3772_v16  ;;  %v902_v16 = vld [vmem:[#allocation7 + $0x88] sm:$0xff] }
 0x1da   :  { %v3502_v44 = vpack.c.bf16 %v871_v34, %v865_v18  ;;  %v873_v45 = vpop.f32.mrb[39].mxu1  ;;  %691 = vmatprep.mubr.f32.mxu0 %v5037_v29  ;;  %v2115_v18 = vld [vmem:[#allocation5 + $0xd00] sm:$0xff]  ;;  %v2120_v34 = vld [vmem:[#allocation5 + $0xd28] sm:$0xff] }
 0x1db   :  { %v3500_v9 = vpack.c.bf16 %v873_v45, %v867_v62  ;;  %1902 = vmatmul.mubr.f32.gmra.mrb[74].mxu1 %v4569_v23  ;;  %v3784_v62 = vpack.c.bf16 %v2118_v49, %v2116_v32  ;;  %v3786_v10 = vpack.c.bf16 %v2117_v22, %v2115_v18  ;;  %v2139_v49 = vld [vmem:[#allocation5 + $0xdc0] sm:$0xff]  ;;  %v2141_v18 = vld [vmem:[#allocation5 + $0xdd0] sm:$0xff] }
 0x1dc   :  { %3775 = vmatpush1.bf16.msra.mxu1 %v3774_v17  ;;  %1907 = vmatprep.mubr.f32.mxu1 %v4572_v46  ;;  %v2128_v17 = vld [vmem:[#allocation5 + $0xd68] sm:$0xff]  ;;  %v3810_v22 = vpack.c.bf16 %v2141_v18, %v2139_v49 }
 0x1dd   :  { %3501 = vmatprep.subr.bf16.mxu0 %v3500_v9  ;;  %v877_v15 = vpop.f32.mrb[40].mxu1  ;;  %3211 = vmatmul.mubr.msk.f32.gmra.mrb[6].mxu0 %vm447_vm0, %v255_v8  ;;  %v901_v8 = vld [vmem:[#allocation7 + $0x80] sm:$0xff]  ;;  %v2124_v9 = vld [vmem:[#allocation5 + $0xd48] sm:$0xff] }
 0x1de   :  { %3503 = vmatpush1.bf16.msra.mxu0 %v3502_v44  ;;  %v879_v19 = vpop.f32.mrb[41].mxu1  ;;  %697 = vmatprep.mubr.f32.mxu0 %v5037_v29  ;;  %v2121_v44 = vld [vmem:[#allocation5 + $0xd30] sm:$0xff]  ;;  %v3792_v39 = vpack.c.bf16 %v2126_v11, %v2124_v9  ;;  %v908_v9 = vld [vmem:[#allocation7 + $0xb8] sm:$0xff]  ;;  %v2428_v11 = vld [vmem:[#allocation5 + $0xe28] sm:$0xff] }
 0x1df   :  { %3777 = vmatprep.subr.bf16.mxu1 %v3776_v48  ;;  %1908 = vmatmul.mubr.f32.gmra.mrb[76].mxu1 %v4577_v59  ;;  %v3790_v45 = vpack.c.bf16 %v2121_v44, %v2119_v38  ;;  %v2134_v48 = vld [vmem:[#allocation5 + $0xd98] sm:$0xff]  ;;  %v2444_v18 = vld [vmem:[#allocation5 + $0xea8] sm:$0xff] }
 0x1e0   :  { %3779 = vmatpush1.bf16.msra.mxu1 %v3778_v50  ;;  %1913 = vmatprep.mubr.f32.mxu1 %v4580_v0  ;;  %v2426_v38 = vld [vmem:[#allocation5 + $0xe18] sm:$0xff] }
 0x1e1   :  { %v883_v47 = vpop.f32.mrb[42].mxu1  ;;  %3212 = vmatmul.mubr.msk.f32.gmra.mrb[8].mxu0 %vm447_vm0, %v256_v20  ;;  %3781 = vmatprep.subr.bf16.mxu1 %v3780_v54 }
 0x1e2   :  { %v3506_v51 = vpack.c.bf16 %v883_v47, %v877_v15  ;;  %v885_v52 = vpop.f32.mrb[43].mxu1  ;;  %703 = vmatprep.mubr.f32.mxu0 %v5037_v29  ;;  %v3794_v15 = vpack.c.bf16 %v2125_v12, %v2123_v42  ;;  %v2132_v47 = vld [vmem:[#allocation5 + $0xd88] sm:$0xff]  ;;  %v2427_v12 = vld [vmem:[#allocation5 + $0xe20] sm:$0xff] }
 0x1e3   :  { %v3504_v56 = vpack.c.bf16 %v885_v52, %v879_v19  ;;  %1914 = vmatmul.mubr.f32.gmra.mrb[78].mxu1 %v4585_v43  ;;  %v2130_v19 = vld [vmem:[#allocation5 + $0xd78] sm:$0xff]  ;;  %v3800_v50 = vpack.c.bf16 %v2134_v48, %v2132_v47  ;;  %v2133_v52 = vld [vmem:[#allocation5 + $0xd90] sm:$0xff]  ;;  %v2436_v47 = vld [vmem:[#allocation5 + $0xe68] sm:$0xff] }
 0x1e4   :  { %3783 = vmatpush1.bf16.msra.mxu1 %v3782_v58  ;;  %2211 = vmatprep.mubr.f32.mxu1 %v4456_v6  ;;  %v3788_v6 = vpack.c.bf16 %v2122_v33, %v2120_v34  ;;  %v3796_v20 = vpack.c.bf16 %v2130_v19, %v2128_v17  ;;  %v905_v58 = vld [vmem:[#allocation7 + $0xa0] sm:$0xff]  ;;  %v907_v34 = vld [vmem:[#allocation7 + $0xb0] sm:$0xff]  ;;  %v2424_v33 = vld [vmem:[#allocation5 + $0xe08] sm:$0xff] }
 0x1e5   :  { %3505 = vmatprep.subr.bf16.mxu0 %v3504_v56  ;;  %v889_v40 = vpop.f32.mrb[44].mxu1  ;;  %3213 = vmatmul.mubr.msk.f32.gmra.mrb[10].mxu0 %vm447_vm0, %v257_v53  ;;  %v904_v56 = vld [vmem:[#allocation7 + $0x98] sm:$0xff]  ;;  %v3832_v44 = vpack.c.bf16 %v2426_v38, %v2424_v33  ;;  %v2432_v19 = vld [vmem:[#allocation5 + $0xe48] sm:$0xff] }
 0x1e6   :  { %3507 = vmatpush1.bf16.msra.mxu0 %v3506_v51  ;;  %v891_v1 = vpop.f32.mrb[45].mxu1  ;;  %709 = vmatprep.mubr.f32.mxu0 %v5037_v29  ;;  %v2131_v51 = vld [vmem:[#allocation5 + $0xd80] sm:$0xff]  ;;  %v2438_v48 = vld [vmem:[#allocation5 + $0xe78] sm:$0xff] }
 0x1e7   :  { %3785 = vmatprep.subr.bf16.mxu1 %v3784_v62  ;;  %v3802_v53 = vpack.c.bf16 %v2133_v52, %v2131_v51  ;;  %v2144_v62 = vld [vmem:[#allocation5 + $0xde8] sm:$0xff]  ;;  %v3844_v52 = vpack.c.bf16 %v2438_v48, %v2436_v47  ;;  %v2450_v33 = vld [vmem:[#allocation5 + $0xed8] sm:$0xff] }
 0x1e8   :  { %3787 = vmatpush1.bf16.msra.mxu1 %v3786_v10  ;;  %v2146_v10 = vld [vmem:[#allocation5 + $0xdf8] sm:$0xff] }
 0x1e9   :  { %v895_v5 = vpop.f32.mrb[46].mxu1  ;;  %3214 = vmatmul.mubr.msk.f32.gmra.mrb[12].mxu0 %vm447_vm0, %v258_v3  ;;  %3789 = vmatprep.subr.bf16.mxu1 %v3788_v6  ;;  %v2142_v3 = vld [vmem:[#allocation5 + $0xdd8] sm:$0xff]  ;;  %v2423_v6 = vld [vmem:[#allocation5 + $0xe00] sm:$0xff] }
 0x1ea   :  { %v3510_v14 = vpack.c.bf16 %v895_v5, %v889_v40  ;;  %v897_v35 = vpop.f32.mrb[47].mxu1  ;;  %715 = vmatprep.mubr.f32.mxu0 %v5037_v29  ;;  %v2137_v40 = vld [vmem:[#allocation5 + $0xdb0] sm:$0xff]  ;;  %v906_v5 = vld [vmem:[#allocation7 + $0xa8] sm:$0xff] }
 0x1eb   :  { %v3508_v7 = vpack.c.bf16 %v897_v35, %v891_v1  ;;  %v3806_v54 = vpack.c.bf16 %v2137_v40, %v2135_v63  ;;  %v2140_v1 = vld [vmem:[#allocation5 + $0xdc8] sm:$0xff]  ;;  %v2143_v35 = vld [vmem:[#allocation5 + $0xde0] sm:$0xff]  ;;  %v2442_v63 = vld [vmem:[#allocation5 + $0xe98] sm:$0xff] }
 0x1ec   :  { %3791 = vmatpush1.bf16.msra.mxu1 %v3790_v45  ;;  %v3808_v32 = vpack.c.bf16 %v2142_v3, %v2140_v1  ;;  %v2425_v45 = vld [vmem:[#allocation5 + $0xe10] sm:$0xff]  ;;  %v2439_v3 = vld [vmem:[#allocation5 + $0xe80] sm:$0xff] }
 0x1ed   :  { %3509 = vmatprep.subr.bf16.mxu0 %v3508_v7  ;;  %3215 = vmatmul.mubr.msk.f32.gmra.mrb[14].mxu0 %vm447_vm0, %v259_v36  ;;  %v2145_v36 = vld [vmem:[#allocation5 + $0xdf0] sm:$0xff] }
 0x1ee   :  { %3511 = vmatpush1.bf16.msra.mxu0 %v3510_v14  ;;  %997 = vmatprep.mubr.f32.mxu0 %v5037_v29  ;;  %v3812_v14 = vpack.c.bf16 %v2146_v10, %v2144_v62  ;;  %v3814_v7 = vpack.c.bf16 %v2145_v36, %v2143_v35  ;;  %v2445_v35 = vld [vmem:[#allocation5 + $0xeb0] sm:$0xff] }
 0x1ef   :  { %3793 = vmatprep.subr.bf16.mxu1 %v3792_v39  ;;  %v2430_v39 = vld [vmem:[#allocation5 + $0xe38] sm:$0xff] }
 0x1f0   :  { %3795 = vmatpush1.bf16.msra.mxu1 %v3794_v15  ;;  %v3836_v42 = vpack.c.bf16 %v2430_v39, %v2428_v11  ;;  %v2429_v15 = vld [vmem:[#allocation5 + $0xe30] sm:$0xff]  ;;  %v2452_v39 = vld [vmem:[#allocation5 + $0xee8] sm:$0xff] }
 0x1f1   :  { %3216 = vmatmul.mubr.msk.f32.vlgmr.msra.gmra.mrb[0].mxu0 %vm447_vm0, %v901_v8  ;;  %3797 = vmatprep.subr.bf16.mxu1 %v3796_v20  ;;  %v3834_v8 = vpack.c.bf16 %v2425_v45, %v2423_v6  ;;  %v3838_v17 = vpack.c.bf16 %v2429_v15, %v2427_v12  ;;  %v2434_v20 = vld [vmem:[#allocation5 + $0xe58] sm:$0xff] }
 0x1f2   :  { %1003 = vmatprep.mubr.f32.mxu0 %v5037_v29 }
 0x1f4   :  { %3799 = vmatpush1.bf16.msra.mxu1 %v3798_v27  ;;  %v3840_v27 = vpack.c.bf16 %v2434_v20, %v2432_v19  ;;  %v2453_v19 = vld [vmem:[#allocation5 + $0xef0] sm:$0xff] }
 0x1f5   :  { %3217 = vmatmul.mubr.msk.f32.gmra.mrb[2].mxu0 %vm447_vm0, %v902_v16  ;;  %3801 = vmatprep.subr.bf16.mxu1 %v3800_v50 }
 0x1f6   :  { %1009 = vmatprep.mubr.f32.mxu0 %v5037_v29 }
 0x1f8   :  { %3803 = vmatpush1.bf16.msra.mxu1 %v3802_v53  ;;  %v2435_v53 = vld [vmem:[#allocation5 + $0xe60] sm:$0xff] }
 0x1f9   :  { %3218 = vmatmul.mubr.msk.f32.gmra.mrb[4].mxu0 %vm447_vm0, %v903_v28  ;;  %3805 = vmatprep.subr.bf16.mxu1 %v3804_v61  ;;  %v2433_v28 = vld [vmem:[#allocation5 + $0xe50] sm:$0xff]  ;;  %v2440_v61 = vld [vmem:[#allocation5 + $0xe88] sm:$0xff] }
 0x1fa   :  { %1015 = vmatprep.mubr.f32.mxu0 %v5037_v29  ;;  %v3842_v50 = vpack.c.bf16 %v2433_v28, %v2431_v21  ;;  %v3848_v1 = vpack.c.bf16 %v2442_v63, %v2440_v61  ;;  %v1406_v61 = vld [vmem:[#allocation5 + $0x818] sm:$0xff] }
 0x1fc   :  { %3807 = vmatpush1.bf16.msra.mxu1 %v3806_v54 }
 0x1fd   :  { %3219 = vmatmul.mubr.msk.f32.gmra.mrb[6].mxu0 %vm447_vm0, %v904_v56  ;;  %3809 = vmatprep.subr.bf16.mxu1 %v3808_v32  ;;  %v2437_v56 = vld [vmem:[#allocation5 + $0xe70] sm:$0xff] }
 0x1fe   :  { %1021 = vmatprep.mubr.f32.mxu0 %v5037_v29  ;;  %v3846_v54 = vpack.c.bf16 %v2437_v56, %v2435_v53  ;;  %v2441_v32 = vld [vmem:[#allocation5 + $0xe90] sm:$0xff]  ;;  %v2460_v56 = vld [vmem:[#allocation5 + $0xf28] sm:$0xff] }
 0x200   :  { %3811 = vmatpush1.bf16.msra.mxu1 %v3810_v22  ;;  %v2446_v22 = vld [vmem:[#allocation5 + $0xeb8] sm:$0xff] }
 0x201   :  { %3220 = vmatmul.mubr.msk.f32.gmra.mrb[8].mxu0 %vm447_vm0, %v905_v58  ;;  %3813 = vmatprep.subr.bf16.mxu1 %v3812_v14  ;;  %v3852_v10 = vpack.c.bf16 %v2446_v22, %v2444_v18  ;;  %v2443_v14 = vld [vmem:[#allocation5 + $0xea0] sm:$0xff]  ;;  %v2464_v18 = vld [vmem:[#allocation5 + $0xf48] sm:$0xff]  ;;  %v2466_v22 = vld [vmem:[#allocation5 + $0xf58] sm:$0xff] }
 0x202   :  { %1027 = vmatprep.mubr.f32.mxu0 %v5037_v29 }
 0x204   :  { %3815 = vmatpush1.bf16.msra.mxu1 %v3814_v7 }
 0x205   :  { %3221 = vmatmul.mubr.msk.f32.gmra.mrb[10].mxu0 %vm447_vm0, %v906_v5  ;;  %3833 = vmatprep.subr.bf16.mxu1 %v3832_v44  ;;  %v3850_v5 = vpack.c.bf16 %v2441_v32, %v2439_v3  ;;  %v3854_v44 = vpack.c.bf16 %v2445_v35, %v2443_v14  ;;  %v2461_v3 = vld [vmem:[#allocation5 + $0xf30] sm:$0xff]  ;;  %v1408_v35 = vld [vmem:[#allocation5 + $0x828] sm:$0xff] }
 0x206   :  { %1033 = vmatprep.mubr.f32.mxu0 %v5037_v29  ;;  %v1405_v14 = vld [vmem:[#allocation5 + $0x810] sm:$0xff] }
 0x207   :  { %2212 = vmatmul.mubr.f32.vlgmr.msra.gmra.mrb[80].mxu1 %v4529_v25 }
 0x208   :  { %3835 = vmatpush1.bf16.msra.mxu1 %v3834_v8  ;;  %2217 = vmatprep.mubr.f32.mxu1 %v4532_v31  ;;  %v2447_v8 = vld [vmem:[#allocation5 + $0xec0] sm:$0xff] }
 0x209   :  { %3222 = vmatmul.mubr.msk.f32.gmra.mrb[12].mxu0 %vm447_vm0, %v907_v34  ;;  %3837 = vmatprep.subr.bf16.mxu1 %v3836_v42  ;;  %v2448_v34 = vld [vmem:[#allocation5 + $0xec8] sm:$0xff]  ;;  %v2454_v42 = vld [vmem:[#allocation5 + $0xef8] sm:$0xff] }
 0x20a   :  { %1039 = vmatprep.mubr.f32.mxu0 %v5037_v29  ;;  %v3856_v45 = vpack.c.bf16 %v2450_v33, %v2448_v34  ;;  %v3872_v34 = vpack.c.bf16 %v2466_v22, %v2464_v18  ;;  %v2463_v33 = vld [vmem:[#allocation5 + $0xf40] sm:$0xff] }
 0x20b   :  { %2218 = vmatmul.mubr.f32.gmra.mrb[82].mxu1 %v4537_v55 }
 0x20c   :  { %3839 = vmatpush1.bf16.msra.mxu1 %v3838_v17  ;;  %2223 = vmatprep.mubr.f32.mxu1 %v4540_v41  ;;  %v2451_v17 = vld [vmem:[#allocation5 + $0xee0] sm:$0xff] }
 0x20d   :  { %v1193_v16 = vpop.f32.mrb[48].mxu1  ;;  %3223 = vmatmul.mubr.msk.f32.gmra.mrb[14].mxu0 %vm447_vm0, %v908_v9  ;;  %3841 = vmatprep.subr.bf16.mxu1 %v3840_v27  ;;  %v2449_v9 = vld [vmem:[#allocation5 + $0xed0] sm:$0xff]  ;;  %v2458_v27 = vld [vmem:[#allocation5 + $0xf18] sm:$0xff]  ;;  %v3862_v47 = vpack.c.bf16 %v2453_v19, %v2451_v17  ;;  %v2467_v17 = vld [vmem:[#allocation5 + $0xf60] sm:$0xff] }
 0x20e   :  { %v1195_v24 = vpop.f32.mrb[49].mxu1  ;;  %1337 = vmatprep.mubr.f32.mxu0 %v5037_v29  ;;  %v3858_v12 = vpack.c.bf16 %v2449_v9, %v2447_v8  ;;  %v2470_v8 = vld [vmem:[#allocation5 + $0xf78] sm:$0xff]  ;;  %v2469_v19 = vld [vmem:[#allocation5 + $0xf70] sm:$0xff] }
 0x20f   :  { %2224 = vmatmul.mubr.f32.gmra.mrb[84].mxu1 %v4545_v4 }
 0x210   :  { %3843 = vmatpush1.bf16.msra.mxu1 %v3842_v50  ;;  %2229 = vmatprep.mubr.f32.mxu1 %v4548_v2 }
 0x211   :  { %v1199_v51 = vpop.f32.mrb[50].mxu1  ;;  %3845 = vmatprep.subr.bf16.mxu1 %v3844_v52  ;;  %v2457_v52 = vld [vmem:[#allocation5 + $0xf10] sm:$0xff] }
 0x212   :  { %v3578_v57 = vpack.c.bf16 %v1199_v51, %v1193_v16  ;;  %v1201_v60 = vpop.f32.mrb[51].mxu1  ;;  %v3860_v16 = vpack.c.bf16 %v2454_v42, %v2452_v39  ;;  %v2455_v51 = vld [vmem:[#allocation5 + $0xf00] sm:$0xff]  ;;  %v1409_v39 = vld [vmem:[#allocation5 + $0x830] sm:$0xff]  ;;  %v1412_v42 = vld [vmem:[#allocation5 + $0x848] sm:$0xff] }
 0x213   :  { %v3576_v40 = vpack.c.bf16 %v1201_v60, %v1195_v24  ;;  %2230 = vmatmul.mubr.f32.gmra.mrb[86].mxu1 %v4553_v30  ;;  %v2456_v24 = vld [vmem:[#allocation5 + $0xf08] sm:$0xff]  ;;  %v3866_v63 = vpack.c.bf16 %v2457_v52, %v2455_v51  ;;  %v1418_v51 = vld [vmem:[#allocation5 + $0x878] sm:$0xff]  ;;  %v3878_v52 = vpack.c.bf16 %v2469_v19, %v2467_v17  ;;  %v1425_v17 = vld [vmem:[#allocation5 + $0x8b0] sm:$0xff] }
 0x214   :  { %3847 = vmatpush1.bf16.msra.mxu1 %v3846_v54  ;;  %2235 = vmatprep.mubr.f32.mxu1 %v4556_v26  ;;  %v3864_v50 = vpack.c.bf16 %v2458_v27, %v2456_v24  ;;  %v1404_v60 = vld [vmem:[#allocation5 + $0x808] sm:$0xff]  ;;  %v2474_v27 = vld [vmem:[#allocation5 + $0xf98] sm:$0xff] }
 0x215   :  { %v1205_v58 = vpop.f32.mrb[52].mxu1  ;;  %3577 = vmatprep.subr.bf16.mxu0 %v3576_v40  ;;  %3849 = vmatprep.subr.bf16.mxu1 %v3848_v1  ;;  %v4624_v40 = vld [vmem:[#allocation2 + $0x8] sm:$0xff]  ;;  %v2459_v1 = vld [vmem:[#allocation5 + $0xf20] sm:$0xff] }
 0x216   :  { %v1207_v49 = vpop.f32.mrb[53].mxu1  ;;  %3579 = vmatpush1.bf16.msra.mxu0 %v3578_v57  ;;  %v2462_v57 = vld [vmem:[#allocation5 + $0xf38] sm:$0xff]  ;;  %v2472_v24 = vld [vmem:[#allocation5 + $0xf88] sm:$0xff] }
 0x217   :  { %2236 = vmatmul.mubr.f32.gmra.mrb[88].mxu1 %v4561_v37  ;;  %v1428_v19 = vld [vmem:[#allocation5 + $0x8c8] sm:$0xff] }
 0x218   :  { %3851 = vmatpush1.bf16.msra.mxu1 %v3850_v5  ;;  %2241 = vmatprep.mubr.f32.mxu1 %v4564_v13 }
 0x219   :  { %v1211_v62 = vpop.f32.mrb[54].mxu1  ;;  %3853 = vmatprep.subr.bf16.mxu1 %v3852_v10  ;;  %v1403_v10 = vld [vmem:[#allocation5 + $0x800] sm:$0xff] }
 0x21a   :  { %v3582_v36 = vpack.c.bf16 %v1211_v62, %v1205_v58  ;;  %v1213_v7 = vpop.f32.mrb[55].mxu1  ;;  %v3868_v58 = vpack.c.bf16 %v2462_v57, %v2460_v56  ;;  %v3592_v62 = vpack.c.bf16 %v1406_v61, %v1404_v60  ;;  %v2471_v56 = vld [vmem:[#allocation5 + $0xf80] sm:$0xff]  ;;  %v2473_v57 = vld [vmem:[#allocation5 + $0xf90] sm:$0xff] }
 0x21b   :  { %v3580_v38 = vpack.c.bf16 %v1213_v7, %v1207_v49  ;;  %2242 = vmatmul.mubr.f32.gmra.mrb[90].mxu1 %v4569_v23  ;;  %v3870_v7 = vpack.c.bf16 %v2461_v3, %v2459_v1  ;;  %v1243_v61 = vld [vmem:[#allocation7 + $0xd0] sm:$0xff]  ;;  %v1415_v1 = vld [vmem:[#allocation5 + $0x860] sm:$0xff]  ;;  %v3882_v18 = vpack.c.bf16 %v2473_v57, %v2471_v56  ;;  %v1434_v56 = vld [vmem:[#allocation5 + $0x8f8] sm:$0xff] }
 0x21c   :  { %3855 = vmatpush1.bf16.msra.mxu1 %v3854_v44  ;;  %2247 = vmatprep.mubr.f32.mxu1 %v4572_v46  ;;  %v1241_v44 = vld [vmem:[#allocation7 + $0xc0] sm:$0xff]  ;;  %v1417_v3 = vld [vmem:[#allocation5 + $0x870] sm:$0xff] }
 0x21d   :  { %v1217_v6 = vpop.f32.mrb[56].mxu1  ;;  %3581 = vmatprep.subr.bf16.mxu0 %v3580_v38  ;;  %3857 = vmatprep.subr.bf16.mxu1 %v3856_v45  ;;  %v2465_v38 = vld [vmem:[#allocation5 + $0xf50] sm:$0xff]  ;;  %v2468_v45 = vld [vmem:[#allocation5 + $0xf68] sm:$0xff] }
 0x21e   :  { %v1219_v11 = vpop.f32.mrb[57].mxu1  ;;  %3583 = vmatpush1.bf16.msra.mxu0 %v3582_v36  ;;  %v1410_v36 = vld [vmem:[#allocation5 + $0x838] sm:$0xff] }
 0x21f   :  { %2248 = vmatmul.mubr.f32.gmra.mrb[92].mxu1 %v4577_v59  ;;  %v3596_v9 = vpack.c.bf16 %v1410_v36, %v1408_v35  ;;  %v2480_v35 = vld [vmem:[#allocation5 + $0xfc8] sm:$0xff]  ;;  %v2482_v36 = vld [vmem:[#allocation5 + $0xfd8] sm:$0xff] }
 0x220   :  { %3859 = vmatpush1.bf16.msra.mxu1 %v3858_v12  ;;  %2253 = vmatprep.mubr.f32.mxu1 %v4580_v0  ;;  %v1414_v12 = vld [vmem:[#allocation5 + $0x858] sm:$0xff] }
 0x221   :  { %v1223_v15 = vpop.f32.mrb[58].mxu1  ;;  %3861 = vmatprep.subr.bf16.mxu1 %v3860_v16  ;;  %v3876_v16 = vpack.c.bf16 %v2470_v8, %v2468_v45  ;;  %v3888_v45 = vpack.c.bf16 %v2482_v36, %v2480_v35  ;;  %v2479_v8 = vld [vmem:[#allocation5 + $0xfc0] sm:$0xff] }
 0x222   :  { %v3586_v20 = vpack.c.bf16 %v1223_v15, %v1217_v6  ;;  %v1225_v21 = vpop.f32.mrb[59].mxu1  ;;  %v3594_v6 = vpack.c.bf16 %v1405_v14, %v1403_v10  ;;  %v3874_v15 = vpack.c.bf16 %v2465_v38, %v2463_v33  ;;  %v3606_v10 = vpack.c.bf16 %v1417_v3, %v1415_v1  ;;  %v1244_v14 = vld [vmem:[#allocation7 + $0xd8] sm:$0xff]  ;;  %v1421_v33 = vld [vmem:[#allocation5 + $0x890] sm:$0xff]  ;;  %v1424_v38 = vld [vmem:[#allocation5 + $0x8a8] sm:$0xff] }
 0x223   :  { %v3584_v28 = vpack.c.bf16 %v1225_v21, %v1219_v11  ;;  %2254 = vmatmul.mubr.f32.gmra.mrb[94].mxu1 %v4585_v43  ;;  %v1407_v11 = vld [vmem:[#allocation5 + $0x820] sm:$0xff]  ;;  %v1242_v21 = vld [vmem:[#allocation7 + $0xc8] sm:$0xff]  ;;  %v1438_v3 = vld [vmem:[#allocation5 + $0x918] sm:$0xff] }
 0x224   :  { %3863 = vmatpush1.bf16.msra.mxu1 %v3862_v47  ;;  %2551 = vmatprep.mubr.f32.mxu1 %v4624_v40  ;;  %v1411_v47 = vld [vmem:[#allocation5 + $0x840] sm:$0xff]  ;;  %v1436_v1 = vld [vmem:[#allocation5 + $0x908] sm:$0xff] }
 0x225   :  { %v1229_v48 = vpop.f32.mrb[60].mxu1  ;;  %3585 = vmatprep.subr.bf16.mxu0 %v3584_v28  ;;  %3865 = vmatprep.subr.bf16.mxu1 %v3864_v50  ;;  %v3600_v28 = vpack.c.bf16 %v1414_v12, %v1412_v42  ;;  %v1416_v50 = vld [vmem:[#allocation5 + $0x868] sm:$0xff]  ;;  %v2486_v12 = vld [vmem:[#allocation5 + $0xff8] sm:$0xff]  ;;  %v1439_v36 = vld [vmem:[#allocation5 + $0x920] sm:$0xff] }
 0x226   :  { %v1231_v53 = vpop.f32.mrb[61].mxu1  ;;  %3587 = vmatpush1.bf16.msra.mxu0 %v3586_v20  ;;  %v3598_v20 = vpack.c.bf16 %v1409_v39, %v1407_v11  ;;  %v1245_v39 = vld [vmem:[#allocation7 + $0xe0] sm:$0xff]  ;;  %v2484_v42 = vld [vmem:[#allocation5 + $0xfe8] sm:$0xff] }
 0x228   :  { %3867 = vmatpush1.bf16.msra.mxu1 %v3866_v63  ;;  %v2476_v63 = vld [vmem:[#allocation5 + $0xfa8] sm:$0xff] }
 0x229   :  { %v1235_v54 = vpop.f32.mrb[62].mxu1  ;;  %3869 = vmatprep.subr.bf16.mxu1 %v3868_v58  ;;  %v3604_v58 = vpack.c.bf16 %v1418_v51, %v1416_v50  ;;  %v1427_v51 = vld [vmem:[#allocation5 + $0x8c0] sm:$0xff] }
 0x22a   :  { %v3590_v32 = vpack.c.bf16 %v1235_v54, %v1229_v48  ;;  %v1237_v49 = vpop.f32.mrb[63].mxu1  ;;  %v1413_v48 = vld [vmem:[#allocation5 + $0x850] sm:$0xff]  ;;  %v2478_v54 = vld [vmem:[#allocation5 + $0xfb8] sm:$0xff] }
 0x22b   :  { %v3588_v5 = vpack.c.bf16 %v1237_v49, %v1231_v53  ;;  %v3880_v53 = vpack.c.bf16 %v2474_v27, %v2472_v24  ;;  %v3602_v60 = vpack.c.bf16 %v1413_v48, %v1411_v47  ;;  %v1422_v49 = vld [vmem:[#allocation5 + $0x898] sm:$0xff]  ;;  %v3884_v22 = vpack.c.bf16 %v2478_v54, %v2476_v63  ;;  %v2483_v27 = vld [vmem:[#allocation5 + $0xfe0] sm:$0xff]  ;;  %v1246_v48 = vld [vmem:[#allocation7 + $0xe8] sm:$0xff] }
 0x22c   :  { %3871 = vmatpush1.bf16.msra.mxu1 %v3870_v7  ;;  %v3892_v24 = vpack.c.bf16 %v2486_v12, %v2484_v42  ;;  %v1431_v54 = vld [vmem:[#allocation5 + $0x8e0] sm:$0xff]  ;;  %v1453_v12 = vld [vmem:[#allocation5 + $0x990] sm:$0xff] }
 0x22d   :  { %3589 = vmatprep.subr.bf16.mxu0 %v3588_v5  ;;  %3873 = vmatprep.subr.bf16.mxu1 %v3872_v34  ;;  %v2475_v5 = vld [vmem:[#allocation5 + $0xfa0] sm:$0xff] }
 0x22e   :  { %3591 = vmatpush1.bf16.msra.mxu0 %v3590_v32  ;;  %v1420_v32 = vld [vmem:[#allocation5 + $0x888] sm:$0xff]  ;;  %v1419_v34 = vld [vmem:[#allocation5 + $0x880] sm:$0xff] }
 0x22f   :  { %3593 = vmatprep.subr.bf16.mxu0 %v3592_v62  ;;  %v2477_v62 = vld [vmem:[#allocation5 + $0xfb0] sm:$0xff]  ;;  %v3608_v7 = vpack.c.bf16 %v1422_v49, %v1420_v32  ;;  %v3610_v11 = vpack.c.bf16 %v1421_v33, %v1419_v34  ;;  %v1248_v49 = vld [vmem:[#allocation7 + $0xf8] sm:$0xff]  ;;  %v1444_v34 = vld [vmem:[#allocation5 + $0x948] sm:$0xff] }
 0x230   :  { %3875 = vmatpush1.bf16.msra.mxu1 %v3874_v15  ;;  %v1446_v33 = vld [vmem:[#allocation5 + $0x958] sm:$0xff]  ;;  %v1451_v42 = vld [vmem:[#allocation5 + $0x980] sm:$0xff] }
 0x231   :  { %3224 = vmatmul.mubr.msk.f32.vlgmr.msra.gmra.mrb[0].mxu0 %vm447_vm0, %v1241_v44  ;;  %3877 = vmatprep.subr.bf16.mxu1 %v3876_v16  ;;  %v1426_v44 = vld [vmem:[#allocation5 + $0x8b8] sm:$0xff]  ;;  %v1423_v16 = vld [vmem:[#allocation5 + $0x8a0] sm:$0xff] }
 0x232   :  { %3595 = vmatpush1.bf16.msra.mxu0 %v3594_v6  ;;  %1343 = vmatprep.mubr.f32.mxu0 %v5037_v29  ;;  %v3886_v6 = vpack.c.bf16 %v2477_v62, %v2475_v5  ;;  %v3612_v15 = vpack.c.bf16 %v1426_v44, %v1424_v38  ;;  %v3614_v47 = vpack.c.bf16 %v1425_v17, %v1423_v16  ;;  %v1437_v5 = vld [vmem:[#allocation5 + $0x910] sm:$0xff]  ;;  %v1440_v62 = vld [vmem:[#allocation5 + $0x928] sm:$0xff]  ;;  %v1443_v38 = vld [vmem:[#allocation5 + $0x940] sm:$0xff] }
 0x233   :  { %3597 = vmatprep.subr.bf16.mxu0 %v3596_v9  ;;  %v2481_v9 = vld [vmem:[#allocation5 + $0xfd0] sm:$0xff]  ;;  %v3642_v16 = vpack.c.bf16 %v1453_v12, %v1451_v42  ;;  %v1455_v17 = vld [vmem:[#allocation5 + $0x9a0] sm:$0xff] }
 0x234   :  { %3879 = vmatpush1.bf16.msra.mxu1 %v3878_v52  ;;  %v1429_v52 = vld [vmem:[#allocation5 + $0x8d0] sm:$0xff] }
 0x235   :  { %3225 = vmatmul.mubr.msk.f32.gmra.mrb[2].mxu0 %vm447_vm0, %v1242_v21  ;;  %3881 = vmatprep.subr.bf16.mxu1 %v3880_v53  ;;  %v3890_v21 = vpack.c.bf16 %v2481_v9, %v2479_v8  ;;  %v1432_v53 = vld [vmem:[#allocation5 + $0x8e8] sm:$0xff]  ;;  %v1445_v44 = vld [vmem:[#allocation5 + $0x950] sm:$0xff]  ;;  %v1447_v8 = vld [vmem:[#allocation5 + $0x960] sm:$0xff] }
 0x236   :  { %3599 = vmatpush1.bf16.msra.mxu0 %v3598_v20  ;;  %1349 = vmatprep.mubr.f32.mxu0 %v5037_v29  ;;  %v1430_v20 = vld [vmem:[#allocation5 + $0x8d8] sm:$0xff]  ;;  %v3620_v63 = vpack.c.bf16 %v1434_v56, %v1432_v53  ;;  %v1449_v9 = vld [vmem:[#allocation5 + $0x970] sm:$0xff] }
 0x237   :  { %3601 = vmatprep.subr.bf16.mxu0 %v3600_v28  ;;  %v2485_v28 = vld [vmem:[#allocation5 + $0xff0] sm:$0xff]  ;;  %v3616_v50 = vpack.c.bf16 %v1430_v20, %v1428_v19  ;;  %v1462_v20 = vld [vmem:[#allocation5 + $0x9d8] sm:$0xff] }
 0x238   :  { %3883 = vmatpush1.bf16.msra.mxu1 %v3882_v18  ;;  %v3894_v57 = vpack.c.bf16 %v2485_v28, %v2483_v27  ;;  %v3624_v18 = vpack.c.bf16 %v1438_v3, %v1436_v1  ;;  %v1457_v19 = vld [vmem:[#allocation5 + $0x9b0] sm:$0xff]  ;;  %v1459_v27 = vld [vmem:[#allocation5 + $0x9c0] sm:$0xff]  ;;  %v4679_v3 = vld [vmem:[#allocation2 + $0x48] sm:$0xff] }
 0x239   :  { %3226 = vmatmul.mubr.msk.f32.gmra.mrb[4].mxu0 %vm447_vm0, %v1243_v61  ;;  %3885 = vmatprep.subr.bf16.mxu1 %v3884_v22  ;;  %v1247_v61 = vld [vmem:[#allocation7 + $0xf0] sm:$0xff]  ;;  %v1435_v22 = vld [vmem:[#allocation5 + $0x900] sm:$0xff]  ;;  %5057 = vst [vmem:[#allocation19_spill] sm:$0xff] %v4679_v3 }
 0x23a   :  { %3603 = vmatpush1.bf16.msra.mxu0 %v3602_v60  ;;  %1355 = vmatprep.mubr.f32.mxu0 %v5037_v29  ;;  %v3618_v60 = vpack.c.bf16 %v1429_v52, %v1427_v51  ;;  %v1461_v28 = vld [vmem:[#allocation5 + $0x9d0] sm:$0xff]  ;;  %v1463_v52 = vld [vmem:[#allocation5 + $0x9e0] sm:$0xff] }
 0x23b   :  { %3605 = vmatprep.subr.bf16.mxu0 %v3604_v58  ;;  %v1433_v58 = vld [vmem:[#allocation5 + $0x8f0] sm:$0xff] }
 0x23c   :  { %3887 = vmatpush1.bf16.msra.mxu1 %v3886_v6  ;;  %v3622_v32 = vpack.c.bf16 %v1433_v58, %v1431_v54  ;;  %v1448_v6 = vld [vmem:[#allocation5 + $0x968] sm:$0xff]  ;;  %v1465_v53 = vld [vmem:[#allocation5 + $0x9f0] sm:$0xff]  ;;  %v4670_v54 = vld [vmem:[#allocation2 + $0x20] sm:$0xff] }
 0x23d   :  { %3227 = vmatmul.mubr.msk.f32.gmra.mrb[6].mxu0 %vm447_vm0, %v1244_v14  ;;  %3889 = vmatprep.subr.bf16.mxu1 %v3888_v45  ;;  %v3626_v14 = vpack.c.bf16 %v1437_v5, %v1435_v22  ;;  %v3634_v45 = vpack.c.bf16 %v1445_v44, %v1443_v38  ;;  %v3654_v56 = vpack.c.bf16 %v1465_v53, %v1463_v52  ;;  %v4673_v58 = vld [vmem:[#allocation2 + $0x38] sm:$0xff]  ;;  %v4676_v1 = vld [vmem:[#allocation2 + $0x30] sm:$0xff] }
 0x23e   :  { %3607 = vmatpush1.bf16.msra.mxu0 %v3606_v10  ;;  %1361 = vmatprep.mubr.f32.mxu0 %v5037_v29  ;;  %v1442_v10 = vld [vmem:[#allocation5 + $0x938] sm:$0xff]  ;;  %5054 = vst [vmem:[#allocation16_spill] sm:$0xff] %v4670_v54  ;;  %5055 = vst [vmem:[#allocation17_spill] sm:$0xff] %v4673_v58 }
 0x23f   :  { %3609 = vmatprep.subr.bf16.mxu0 %v3608_v7  ;;  %v3628_v35 = vpack.c.bf16 %v1442_v10, %v1440_v62  ;;  %v1441_v7 = vld [vmem:[#allocation5 + $0x930] sm:$0xff]  ;;  %5056 = vst [vmem:[#allocation18_spill] sm:$0xff] %v4676_v1 }
 0x240   :  { %3891 = vmatpush1.bf16.msra.mxu1 %v3890_v21  ;;  %v3646_v21 = vpack.c.bf16 %v1457_v19, %v1455_v17 }
 0x241   :  { %3228 = vmatmul.mubr.msk.f32.gmra.mrb[8].mxu0 %vm447_vm0, %v1245_v39  ;;  %3893 = vmatprep.subr.bf16.mxu1 %v3892_v24  ;;  %v3638_v39 = vpack.c.bf16 %v1449_v9, %v1447_v8 }
 0x242   :  { %3611 = vmatpush1.bf16.msra.mxu0 %v3610_v11  ;;  %1367 = vmatprep.mubr.f32.mxu0 %v5037_v29  ;;  %v1454_v11 = vld [vmem:[#allocation5 + $0x998] sm:$0xff] }
 0x243   :  { %3613 = vmatprep.subr.bf16.mxu0 %v3612_v15  ;;  %v1458_v15 = vld [vmem:[#allocation5 + $0x9b8] sm:$0xff] }
 0x244   :  { %3895 = vmatpush1.bf16.msra.mxu1 %v3894_v57  ;;  %v4658_v57 = vld [vmem:[#allocation2] sm:$0xff] }
 0x245   :  { %3229 = vmatmul.mubr.msk.f32.gmra.mrb[10].mxu0 %vm447_vm0, %v1246_v48  ;;  %v1466_v48 = vld [vmem:[#allocation5 + $0x9f8] sm:$0xff]  ;;  %5050 = vst [vmem:[#allocation12_spill] sm:$0xff] %v4658_v57 }
 0x246   :  { %3615 = vmatpush1.bf16.msra.mxu0 %v3614_v47  ;;  %1373 = vmatprep.mubr.f32.mxu0 %v5037_v29  ;;  %v1464_v47 = vld [vmem:[#allocation5 + $0x9e8] sm:$0xff] }
 0x247   :  { %3617 = vmatprep.subr.bf16.mxu0 %v3616_v50  ;;  %2552 = vmatmul.mubr.f32.vlgmr.msra.gmra.mrb[96].mxu1 %v4529_v25  ;;  %v3630_v25 = vpack.c.bf16 %v1441_v7, %v1439_v36  ;;  %v3650_v50 = vpack.c.bf16 %v1461_v28, %v1459_v27  ;;  %v3652_v51 = vpack.c.bf16 %v1466_v48, %v1464_v47 }
 0x248   :  { %2557 = vmatprep.mubr.f32.mxu1 %v4532_v31  ;;  %v3632_v31 = vpack.c.bf16 %v1446_v33, %v1444_v34 }
 0x249   :  { %3230 = vmatmul.mubr.msk.f32.gmra.mrb[12].mxu0 %vm447_vm0, %v1247_v61  ;;  %v4664_v61 = vld [vmem:[#allocation2 + $0x10] sm:$0xff] }
 0x24a   :  { %3619 = vmatpush1.bf16.msra.mxu0 %v3618_v60  ;;  %1379 = vmatprep.mubr.f32.mxu0 %v5037_v29  ;;  %v4661_v60 = vld [vmem:[#allocation2 + $0x18] sm:$0xff]  ;;  %5052 = vst [vmem:[#allocation14_spill] sm:$0xff] %v4664_v61 }
 0x24b   :  { %3621 = vmatprep.subr.bf16.mxu0 %v3620_v63  ;;  %2558 = vmatmul.mubr.f32.gmra.mrb[98].mxu1 %v4537_v55  ;;  %5051 = vst [vmem:[#allocation13_spill] sm:$0xff] %v4661_v60  ;;  %v4667_v63 = vld [vmem:[#allocation2 + $0x28] sm:$0xff] }
 0x24c   :  { %2563 = vmatprep.mubr.f32.mxu1 %v4540_v41  ;;  %v1452_v41 = vld [vmem:[#allocation5 + $0x988] sm:$0xff]  ;;  %5053 = vst [vmem:[#allocation15_spill] sm:$0xff] %v4667_v63 }
 0x24d   :  { %3231 = vmatmul.mubr.msk.f32.gmra.mrb[14].mxu0 %vm447_vm0, %v1248_v49 }
 0x24e   :  { %3623 = vmatpush1.bf16.msra.mxu0 %v3622_v32  ;;  %1531 = vmatprep.mubr.f32.mxu0 %v4624_v40  ;;  %v1450_v40 = vld [vmem:[#allocation5 + $0x978] sm:$0xff] }
 0x24f   :  { %3625 = vmatprep.subr.bf16.mxu0 %v3624_v18  ;;  %2564 = vmatmul.mubr.f32.gmra.mrb[100].mxu1 %v4545_v4  ;;  %v3636_v55 = vpack.c.bf16 %v1450_v40, %v1448_v6  ;;  %v3640_v4 = vpack.c.bf16 %v1454_v11, %v1452_v41 }
 0x250   :  { %2569 = vmatprep.mubr.f32.mxu1 %v4548_v2  ;;  %v1456_v2 = vld [vmem:[#allocation5 + $0x9a8] sm:$0xff] }
 0x252   :  { %3627 = vmatpush1.bf16.msra.mxu0 %v3626_v14 }
 0x253   :  { %3629 = vmatprep.subr.bf16.mxu0 %v3628_v35  ;;  %2570 = vmatmul.mubr.f32.gmra.mrb[102].mxu1 %v4553_v30  ;;  %v3644_v30 = vpack.c.bf16 %v1458_v15, %v1456_v2 }
 0x254   :  { %2575 = vmatprep.mubr.f32.mxu1 %v4556_v26  ;;  %v1460_v26 = vld [vmem:[#allocation5 + $0x9c8] sm:$0xff] }
 0x255   :  { %v3648_v24 = vpack.c.bf16 %v1462_v20, %v1460_v26 }
 0x256   :  { %3631 = vmatpush1.bf16.msra.mxu0 %v3630_v25 }
 0x257   :  { %3633 = vmatprep.subr.bf16.mxu0 %v3632_v31  ;;  %2576 = vmatmul.mubr.f32.gmra.mrb[104].mxu1 %v4561_v37 }
 0x258   :  { %2581 = vmatprep.mubr.f32.mxu1 %v4564_v13 }
 0x25a   :  { %3635 = vmatpush1.bf16.msra.mxu0 %v3634_v45 }
 0x25b   :  { %3637 = vmatprep.subr.bf16.mxu0 %v3636_v55  ;;  %2582 = vmatmul.mubr.f32.gmra.mrb[106].mxu1 %v4569_v23 }
 0x25c   :  { %2587 = vmatprep.mubr.f32.mxu1 %v4572_v46 }
 0x25e   :  { %3639 = vmatpush1.bf16.msra.mxu0 %v3638_v39 }
 0x25f   :  { %3641 = vmatprep.subr.bf16.mxu0 %v3640_v4  ;;  %2588 = vmatmul.mubr.f32.gmra.mrb[108].mxu1 %v4577_v59 }
 0x260   :  { %2593 = vmatprep.mubr.f32.mxu1 %v4580_v0 }
 0x262   :  { %3643 = vmatpush1.bf16.msra.mxu0 %v3642_v16 }
 0x263   :  { %3645 = vmatprep.subr.bf16.mxu0 %v3644_v30  ;;  %2594 = vmatmul.mubr.f32.gmra.mrb[110].mxu1 %v4585_v43 }
 0x266   :  { %3647 = vmatpush1.bf16.msra.mxu0 %v3646_v21 }
 0x267   :  { %3649 = vmatprep.subr.bf16.mxu0 %v3648_v24 }
 0x26a   :  { %3651 = vmatpush1.bf16.msra.mxu0 %v3650_v50 }
 0x26b   :  { %3653 = vmatprep.subr.bf16.mxu0 %v3652_v51 }
 0x26e   :  { %3655 = vmatpush1.bf16.msra.mxu0 %v3654_v56 }
 0x271   :  { %1532 = vmatmul.mubr.f32.vlgmr.msra.gmra.mrb[16].mxu0 %v4658_v57 }
 0x272   :  { %1537 = vmatprep.mubr.f32.mxu0 %v4661_v60 }
 0x275   :  { %1538 = vmatmul.mubr.f32.gmra.mrb[18].mxu0 %v4664_v61 }
 0x276   :  { %1543 = vmatprep.mubr.f32.mxu0 %v4667_v63 }
 0x279   :  { %1544 = vmatmul.mubr.f32.gmra.mrb[20].mxu0 %v4670_v54 }
 0x27a   :  { %1549 = vmatprep.mubr.f32.mxu0 %v4673_v58 }
 0x27d   :  { %1550 = vmatmul.mubr.f32.gmra.mrb[22].mxu0 %v4676_v1 }
 0x27e   :  { %1555 = vmatprep.mubr.f32.mxu0 %v4679_v3 }
 0x281   :  { %1556 = vmatmul.mubr.f32.gmra.mrb[24].mxu0 %v4561_v37 }
 0x282   :  { %1561 = vmatprep.mubr.f32.mxu0 %v4564_v13 }
 0x285   :  { %1562 = vmatmul.mubr.f32.gmra.mrb[26].mxu0 %v4569_v23 }
 0x286   :  { %1567 = vmatprep.mubr.f32.mxu0 %v4572_v46 }
 0x289   :  { %1568 = vmatmul.mubr.f32.gmra.mrb[28].mxu0 %v4577_v59 }
 0x28a   :  { %1573 = vmatprep.mubr.f32.mxu0 %v4580_v0 }
 0x28d   :  { %1574 = vmatmul.mubr.f32.gmra.mrb[30].mxu0 %v4585_v43 }
 0x28e   :  { %1677 = vmatprep.mubr.f32.mxu0 %v5037_v29 }
 0x299   :  { %v4690_v32 = vpop.f32.mrb[64].mxu1 }
 0x29a   :  { %v4692_v49 = vpop.f32.mrb[65].mxu1 }
 0x29d   :  { %v4694_v18 = vpop.f32.mrb[66].mxu1 }
 0x29e   :  { %v4698_v13 = vpop.f32.mrb[67].mxu1 }
 0x2a1   :  { %v4702_v46 = vpop.f32.mrb[68].mxu1 }
 0x2a2   :  { %v4704_v59 = vpop.f32.mrb[69].mxu1 }
 0x2a5   :  { %v4706_v0 = vpop.f32.mrb[70].mxu1 }
 0x2a6   :  { %v4710_v22 = vpop.f32.mrb[71].mxu1 }
 0x2aa   :  { %v4714_v62 = vpop.f32.mrb[72].mxu1 }
 0x2ab   :  { %v4716_v10 = vpop.f32.mrb[73].mxu1 }
 0x2ae   :  { %v4718_v14 = vpop.f32.mrb[74].mxu1 }
 0x2af   :  { %v4722_v36 = vpop.f32.mrb[75].mxu1 }
 0x2b2   :  { %v4726_v34 = vpop.f32.mrb[76].mxu1 }
 0x2b3   :  { %v4728_v33 = vpop.f32.mrb[77].mxu1 }
 0x2b6   :  { %v4730_v25 = vpop.f32.mrb[78].mxu1 }
 0x2b7   :  { %v4734_v38 = vpop.f32.mrb[79].mxu1 }
 0x2da   :  { %v4738_v6 = vpop.f32.mrb[80].mxu1 }
 0x2db   :  { %v4740_v40 = vpop.f32.mrb[81].mxu1 }
 0x2de   :  { %v4742_v45 = vpop.f32.mrb[82].mxu1 }
 0x2df   :  { %v4746_v8 = vpop.f32.mrb[83].mxu1 }
 0x2e2   :  { %v4750_v41 = vpop.f32.mrb[84].mxu1 }
 0x2e3   :  { %v4752_v11 = vpop.f32.mrb[85].mxu1 }
 0x2e6   :  { %v4754_v39 = vpop.f32.mrb[86].mxu1 }
 0x2e7   :  { %v4758_v42 = vpop.f32.mrb[87].mxu1 }
 0x2ea   :  { %v4762_v2 = vpop.f32.mrb[88].mxu1 }
 0x2eb   :  { %v4764_v15 = vpop.f32.mrb[89].mxu1 }
 0x2ee   :  { %v4766_v16 = vpop.f32.mrb[90].mxu1 }
 0x2ef   :  { %v4770_v17 = vpop.f32.mrb[91].mxu1 }
 0x2f2   :  { %v4774_v26 = vpop.f32.mrb[92].mxu1 }
 0x2f3   :  { %v4776_v20 = vpop.f32.mrb[93].mxu1 }
 0x2f6   :  { %v4778_v21 = vpop.f32.mrb[94].mxu1 }
 0x2f7   :  { %v4782_v27 = vpop.f32.mrb[95].mxu1 }
 0x31a   :  { %v4786_v47 = vpop.f32.mrb[96].mxu1 }
 0x31b   :  { %v4788_v48 = vpop.f32.mrb[97].mxu1 }
 0x31e   :  { %v4790_v50 = vpop.f32.mrb[98].mxu1 }
 0x31f   :  { %v4794_v52 = vpop.f32.mrb[99].mxu1 }
 0x322   :  { %v4798_v56 = vpop.f32.mrb[100].mxu1 }
 0x323   :  { %v4800_v24 = vpop.f32.mrb[101].mxu1 }
 0x326   :  { %v4802_v30 = vpop.f32.mrb[102].mxu1 }
 0x327   :  { %v4806_v19 = vpop.f32.mrb[103].mxu1 }
 0x32a   :  { %v4810_v51 = vpop.f32.mrb[104].mxu1 }
 0x32b   :  { %v4812_v12 = vpop.f32.mrb[105].mxu1 }
 0x32e   :  { %v4814_v55 = vpop.f32.mrb[106].mxu1 }
 0x32f   :  { %v4818_v9 = vpop.f32.mrb[107].mxu1 }
 0x332   :  { %v4822_v28 = vpop.f32.mrb[108].mxu1 }
 0x333   :  { %5058 = vst [vmem:[#allocation20_spill] sm:$0xff] %v4822_v28  ;;  %v4824_v44 = vpop.f32.mrb[109].mxu1 }
 0x334   :  { %5059 = vst [vmem:[#allocation21_spill] sm:$0xff] %v4824_v44 }
 0x336   :  { %v4826_v35 = vpop.f32.mrb[110].mxu1 }
 0x337   :  { %5060 = vst [vmem:[#allocation22_spill] sm:$0xff] %v4826_v35  ;;  %v4830_v7 = vpop.f32.mrb[111].mxu1 }
 0x344   :  { %v1533_v53 = vpop.f32.mrb[16].mxu0 }
 0x345   :  { %v1535_v5 = vpop.f32.mrb[17].mxu0 }
 0x348   :  { %v1539_v29 = vpop.f32.mrb[18].mxu0 }
 0x349   :  { %v3658_v37 = vpack.c.bf16 %v1539_v29, %v1533_v53  ;;  %v1541_v23 = vpop.f32.mrb[19].mxu0  ;;  %v2768_v53 = vld [vmem:[#allocation5 + $0x1028] sm:$0xff] }
 0x34a   :  { %v3656_v31 = vpack.c.bf16 %v1541_v23, %v1535_v5 }
 0x34c   :  { %v1545_v3 = vpop.f32.mrb[20].mxu0  ;;  %3657 = vmatprep.subr.bf16.mxu0 %v3656_v31 }
 0x34d   :  { %v1547_v1 = vpop.f32.mrb[21].mxu0  ;;  %3659 = vmatpush1.bf16.msra.mxu0 %v3658_v37 }
 0x350   :  { %v1551_v58 = vpop.f32.mrb[22].mxu0 }
 0x351   :  { %v3662_v54 = vpack.c.bf16 %v1551_v58, %v1545_v3  ;;  %v1553_v63 = vpop.f32.mrb[23].mxu0  ;;  %v1581_v58 = vld [vmem:[#allocation7 + $0x100] sm:$0xff]  ;;  %v1583_v3 = vld [vmem:[#allocation7 + $0x110] sm:$0xff] }
 0x352   :  { %v3660_v61 = vpack.c.bf16 %v1553_v63, %v1547_v1  ;;  %v1582_v63 = vld [vmem:[#allocation7 + $0x108] sm:$0xff]  ;;  %v5065_v1 = vpack.c.bf16 %v4706_v0, %v4702_v46  ;;  %v5069_v46 = vpack.c.bf16 %v4730_v25, %v4726_v34  ;;  %v5070_v0 = vpack.c.bf16 %v4746_v8, %v4740_v40  ;;  %v1925_v40 = vld [vmem:[#allocation7 + $0x160] sm:$0xff] }
 0x353   :  { %v5073_v34 = vpack.c.bf16 %v4754_v39, %v4750_v41  ;;  %v5074_v25 = vpack.c.bf16 %v4770_v17, %v4764_v15  ;;  %v5078_v8 = vpack.c.bf16 %v4794_v52, %v4788_v48  ;;  %v1926_v41 = vld [vmem:[#allocation7 + $0x168] sm:$0xff]  ;;  %v1928_v39 = vld [vmem:[#allocation7 + $0x178] sm:$0xff]  ;;  %v5080_v15 = vpack.c.bf16 %v4806_v19, %v4800_v24  ;;  %v2263_v17 = vld [vmem:[#allocation7 + $0x190] sm:$0xff] }
 0x354   :  { %v1557_v4 = vpop.f32.mrb[24].mxu0  ;;  %3661 = vmatprep.subr.bf16.mxu0 %v3660_v61  ;;  %v5061_v61 = vpack.c.bf16 %v4698_v13, %v4692_v49  ;;  %v5067_v49 = vpack.c.bf16 %v4718_v14, %v4714_v62  ;;  %v5068_v13 = vpack.c.bf16 %v4734_v38, %v4728_v33  ;;  %v1588_v62 = vld [vmem:[#allocation7 + $0x138] sm:$0xff]  ;;  %v5071_v14 = vpack.c.bf16 %v4742_v45, %v4738_v6  ;;  %v1923_v33 = vld [vmem:[#allocation7 + $0x150] sm:$0xff] }
 0x355   :  { %v1559_v60 = vpop.f32.mrb[25].mxu0  ;;  %3663 = vmatpush1.bf16.msra.mxu0 %v3662_v54  ;;  %v5064_v54 = vpack.c.bf16 %v4710_v22, %v4704_v59  ;;  %v1585_v59 = vld [vmem:[#allocation7 + $0x120] sm:$0xff]  ;;  %v1587_v22 = vld [vmem:[#allocation7 + $0x130] sm:$0xff]  ;;  %v1924_v38 = vld [vmem:[#allocation7 + $0x158] sm:$0xff]  ;;  %v5076_v6 = vpack.c.bf16 %v4782_v27, %v4776_v20  ;;  %v5077_v45 = vpack.c.bf16 %v4778_v21, %v4774_v26  ;;  %v5082_v26 = vpack.c.bf16 %v4818_v9, %v4812_v12 }
 0x356   :  { %v2764_v20 = vld [vmem:[#allocation5 + $0x1008] sm:$0xff]  ;;  %v2766_v21 = vld [vmem:[#allocation5 + $0x1018] sm:$0xff]  ;;  %v5083_v24 = vpack.c.bf16 %v4814_v55, %v4810_v51  ;;  %v2265_v9 = vld [vmem:[#allocation7 + $0x1a0] sm:$0xff] }
 0x357   :  { %v2264_v19 = vld [vmem:[#allocation7 + $0x198] sm:$0xff]  ;;  %v5086_v12 = vld [vmem:[#allocation22_spill] sm:$0xff]  ;;  %v2266_v55 = vld [vmem:[#allocation7 + $0x1a8] sm:$0xff] }
 0x358   :  { %v1563_v57 = vpop.f32.mrb[26].mxu0  ;;  %v2763_v51 = vld [vmem:[#allocation5 + $0x1000] sm:$0xff]  ;;  %v2765_v52 = vld [vmem:[#allocation5 + $0x1010] sm:$0xff] }
 0x359   :  { %v3666_v43 = vpack.c.bf16 %v1563_v57, %v1557_v4  ;;  %v1565_v28 = vpop.f32.mrb[27].mxu0  ;;  %v5062_v57 = vpack.c.bf16 %v4694_v18, %v4690_v32  ;;  %v5066_v32 = vpack.c.bf16 %v4722_v36, %v4716_v10  ;;  %v1584_v18 = vld [vmem:[#allocation7 + $0x118] sm:$0xff]  ;;  %v1921_v10 = vld [vmem:[#allocation7 + $0x140] sm:$0xff]  ;;  %v5072_v36 = vpack.c.bf16 %v4758_v42, %v4752_v11  ;;  %v1927_v11 = vld [vmem:[#allocation7 + $0x170] sm:$0xff] }
 0x35a   :  { %v3664_v35 = vpack.c.bf16 %v1565_v28, %v1559_v60  ;;  %v5063_v60 = vmov 0.0   ;;  %v2261_v4 = vld [vmem:[#allocation7 + $0x180] sm:$0xff]  ;;  %v5079_v42 = vpack.c.bf16 %v4790_v50, %v4786_v47  ;;  %v3912_v28 = vpack.c.bf16 %v2766_v21, %v2764_v20  ;;  %v2268_v50 = vld [vmem:[#allocation7 + $0x1b8] sm:$0xff]  ;;  %v2793_v21 = vld [vmem:[#allocation5 + $0x10f0] sm:$0xff] }
 0x35b   :  { %v5087_v47 = vld [vmem:[#allocation20_spill] sm:$0xff] }
 0x35c   :  { %v1569_v44 = vpop.f32.mrb[28].mxu0  ;;  %3665 = vmatprep.subr.bf16.mxu0 %v3664_v35  ;;  %v1922_v35 = vld [vmem:[#allocation7 + $0x148] sm:$0xff]  ;;  %v5088_v48 = vpack.c.bf16 %v5086_v12, %v5087_v47  ;;  %v2791_v20 = vld [vmem:[#allocation5 + $0x10e0] sm:$0xff]  ;;  %v2797_v12 = vld [vmem:[#allocation5 + $0x1110] sm:$0xff] }
 0x35d   :  { %v1571_v29 = vpop.f32.mrb[29].mxu0  ;;  %3667 = vmatpush1.bf16.msra.mxu0 %v3666_v43  ;;  %v1586_v43 = vld [vmem:[#allocation7 + $0x128] sm:$0xff] }
 0x35e   :  { %v2800_v47 = vld [vmem:[#allocation5 + $0x1128] sm:$0xff] }
 0x360   :  { %v1575_v23 = vpop.f32.mrb[30].mxu0 }
 0x361   :  { %v3670_v5 = vpack.c.bf16 %v1575_v23, %v1569_v44  ;;  %v1577_v31 = vpop.f32.mrb[31].mxu0  ;;  %v5075_v44 = vpack.c.bf16 %v4766_v16, %v4762_v2  ;;  %v2262_v2 = vld [vmem:[#allocation7 + $0x188] sm:$0xff]  ;;  %v5081_v16 = vpack.c.bf16 %v4802_v30, %v4798_v56  ;;  %v2770_v56 = vld [vmem:[#allocation5 + $0x1038] sm:$0xff]  ;;  %v3914_v23 = vpack.c.bf16 %v2765_v52, %v2763_v51  ;;  %v2799_v51 = vld [vmem:[#allocation5 + $0x1120] sm:$0xff] }
 0x362   :  { %v3668_v37 = vpack.c.bf16 %v1577_v31, %v1571_v29  ;;  %v5084_v30 = vld [vmem:[#allocation21_spill] sm:$0xff]  ;;  %v2601_v29 = vld [vmem:[#allocation7 + $0x1c0] sm:$0xff]  ;;  %v2801_v52 = vld [vmem:[#allocation5 + $0x1130] sm:$0xff] }
 0x363   :  { %v5085_v27 = vpack.c.bf16 %v4830_v7, %v5084_v30  ;;  %v2267_v7 = vld [vmem:[#allocation7 + $0x1b0] sm:$0xff]  ;;  %v2767_v31 = vld [vmem:[#allocation5 + $0x1020] sm:$0xff]  ;;  %v3942_v30 = vpack.c.bf16 %v2793_v21, %v2791_v20  ;;  %v4161_v21 = vld [vmem:[#allocation2 + $0x68] sm:$0xff] }
 0x364   :  { %3669 = vmatprep.subr.bf16.mxu0 %v3668_v37  ;;  %v2769_v37 = vld [vmem:[#allocation5 + $0x1030] sm:$0xff] }
 0x365   :  { %3671 = vmatpush1.bf16.msra.mxu0 %v3670_v5  ;;  %v3916_v5 = vpack.c.bf16 %v2770_v56, %v2768_v53  ;;  %v2804_v53 = vld [vmem:[#allocation5 + $0x1148] sm:$0xff]  ;;  %v2806_v56 = vld [vmem:[#allocation5 + $0x1158] sm:$0xff]  ;;  %v4160_v20 = vld [vmem:[#allocation2 + $0x50] sm:$0xff] }
 0x366   :  { %3737 = vmatprep.subr.bf16.mxu0 %v5061_v61  ;;  %v2774_v61 = vld [vmem:[#allocation5 + $0x1058] sm:$0xff] }
 0x368   :  { %3232 = vmatmul.mubr.msk.f32.vlgmr.msra.gmra.mrb[0].mxu0 %vm447_vm0, %v1581_v58  ;;  %v2772_v58 = vld [vmem:[#allocation5 + $0x1048] sm:$0xff] }
 0x369   :  { %3739 = vmatpush1.bf16.msra.mxu0 %v5062_v57  ;;  %1683 = vmatprep.mubr.f32.mxu0 %v5063_v60  ;;  %v3918_v57 = vpack.c.bf16 %v2769_v37, %v2767_v31  ;;  %v2805_v31 = vld [vmem:[#allocation5 + $0x1150] sm:$0xff]  ;;  %v2808_v37 = vld [vmem:[#allocation5 + $0x1168] sm:$0xff] }
 0x36a   :  { %3741 = vmatprep.subr.bf16.mxu0 %v5064_v54  ;;  %v3920_v54 = vpack.c.bf16 %v2774_v61, %v2772_v58  ;;  %v2810_v58 = vld [vmem:[#allocation5 + $0x1178] sm:$0xff] }
 0x36c   :  { %3233 = vmatmul.mubr.msk.f32.gmra.mrb[2].mxu0 %vm447_vm0, %v1582_v63  ;;  %v2602_v63 = vld [vmem:[#allocation7 + $0x1c8] sm:$0xff] }
 0x36d   :  { %3743 = vmatpush1.bf16.msra.mxu0 %v5065_v1  ;;  %1689 = vmatprep.mubr.f32.mxu0 %v5063_v60  ;;  %v2771_v1 = vld [vmem:[#allocation5 + $0x1040] sm:$0xff] }
 0x36e   :  { %3745 = vmatprep.subr.bf16.mxu0 %v5066_v32  ;;  %v2776_v32 = vld [vmem:[#allocation5 + $0x1068] sm:$0xff] }
 0x370   :  { %3234 = vmatmul.mubr.msk.f32.gmra.mrb[4].mxu0 %vm447_vm0, %v1583_v3  ;;  %v2773_v3 = vld [vmem:[#allocation5 + $0x1050] sm:$0xff] }
 0x371   :  { %3747 = vmatpush1.bf16.msra.mxu0 %v5067_v49  ;;  %1695 = vmatprep.mubr.f32.mxu0 %v5063_v60  ;;  %v2778_v49 = vld [vmem:[#allocation5 + $0x1078] sm:$0xff] }
 0x372   :  { %3749 = vmatprep.subr.bf16.mxu0 %v5068_v13  ;;  %v2603_v13 = vld [vmem:[#allocation7 + $0x1d0] sm:$0xff] }
 0x374   :  { %3235 = vmatmul.mubr.msk.f32.gmra.mrb[6].mxu0 %vm447_vm0, %v1584_v18  ;;  %v3922_v18 = vpack.c.bf16 %v2773_v3, %v2771_v1  ;;  %v2812_v1 = vld [vmem:[#allocation5 + $0x1188] sm:$0xff]  ;;  %v2814_v3 = vld [vmem:[#allocation5 + $0x1198] sm:$0xff] }
 0x375   :  { %3751 = vmatpush1.bf16.msra.mxu0 %v5069_v46  ;;  %1701 = vmatprep.mubr.f32.mxu0 %v5063_v60  ;;  %v3924_v46 = vpack.c.bf16 %v2778_v49, %v2776_v32  ;;  %v3960_v49 = vpack.c.bf16 %v2814_v3, %v2812_v1 }
 0x376   :  { %3817 = vmatprep.subr.bf16.mxu0 %v5070_v0  ;;  %v2777_v0 = vld [vmem:[#allocation5 + $0x1070] sm:$0xff] }
 0x378   :  { %3236 = vmatmul.mubr.msk.f32.gmra.mrb[8].mxu0 %vm447_vm0, %v1585_v59  ;;  %v2775_v59 = vld [vmem:[#allocation5 + $0x1060] sm:$0xff] }
 0x379   :  { %1707 = vmatprep.mubr.f32.mxu0 %v5063_v60 }
 0x37c   :  { %3237 = vmatmul.mubr.msk.f32.gmra.mrb[10].mxu0 %vm447_vm0, %v1586_v43  ;;  %v2780_v43 = vld [vmem:[#allocation5 + $0x1088] sm:$0xff] }
 0x37d   :  { %1713 = vmatprep.mubr.f32.mxu0 %v5063_v60 }
 0x380   :  { %3238 = vmatmul.mubr.msk.f32.gmra.mrb[12].mxu0 %vm447_vm0, %v1587_v22  ;;  %v2782_v22 = vld [vmem:[#allocation5 + $0x1098] sm:$0xff] }
 0x381   :  { %1719 = vmatprep.mubr.f32.mxu0 %v5063_v60 }
 0x384   :  { %3239 = vmatmul.mubr.msk.f32.gmra.mrb[14].mxu0 %vm447_vm0, %v1588_v62  ;;  %v3926_v62 = vpack.c.bf16 %v2777_v0, %v2775_v59  ;;  %v2818_v59 = vld [vmem:[#allocation5 + $0x11b8] sm:$0xff] }
 0x385   :  { %2017 = vmatprep.mubr.f32.mxu0 %v5063_v60 }
 0x388   :  { %3240 = vmatmul.mubr.msk.f32.vlgmr.msra.gmra.mrb[0].mxu0 %vm447_vm0, %v1921_v10  ;;  %v2604_v10 = vld [vmem:[#allocation7 + $0x1d8] sm:$0xff] }
 0x389   :  { %3819 = vmatpush1.bf16.msra.mxu0 %v5071_v14  ;;  %2023 = vmatprep.mubr.f32.mxu0 %v5063_v60  ;;  %v3928_v14 = vpack.c.bf16 %v2782_v22, %v2780_v43  ;;  %v2815_v22 = vld [vmem:[#allocation5 + $0x11a0] sm:$0xff] }
 0x38a   :  { %3821 = vmatprep.subr.bf16.mxu0 %v5072_v36  ;;  %v2781_v36 = vld [vmem:[#allocation5 + $0x1090] sm:$0xff] }
 0x38c   :  { %3241 = vmatmul.mubr.msk.f32.gmra.mrb[2].mxu0 %vm447_vm0, %v1922_v35  ;;  %v2779_v35 = vld [vmem:[#allocation5 + $0x1080] sm:$0xff] }
 0x38d   :  { %3823 = vmatpush1.bf16.msra.mxu0 %v5073_v34  ;;  %2029 = vmatprep.mubr.f32.mxu0 %v5063_v60  ;;  %v2784_v34 = vld [vmem:[#allocation5 + $0x10a8] sm:$0xff] }
 0x38e   :  { %3825 = vmatprep.subr.bf16.mxu0 %v5074_v25  ;;  %v3930_v25 = vpack.c.bf16 %v2781_v36, %v2779_v35 }
 0x390   :  { %3242 = vmatmul.mubr.msk.f32.gmra.mrb[4].mxu0 %vm447_vm0, %v1923_v33  ;;  %v2786_v33 = vld [vmem:[#allocation5 + $0x10b8] sm:$0xff] }
 0x391   :  { %2035 = vmatprep.mubr.f32.mxu0 %v5063_v60  ;;  %3827 = vmatpush1.bf16.msra.mxu0 %v5075_v44  ;;  %v3932_v44 = vpack.c.bf16 %v2786_v33, %v2784_v34  ;;  %v2819_v34 = vld [vmem:[#allocation5 + $0x11c0] sm:$0xff]  ;;  %v2821_v33 = vld [vmem:[#allocation5 + $0x11d0] sm:$0xff] }
 0x392   :  { %3829 = vmatprep.subr.bf16.mxu0 %v5076_v6  ;;  %v2783_v6 = vld [vmem:[#allocation5 + $0x10a0] sm:$0xff] }
 0x394   :  { %3243 = vmatmul.mubr.msk.f32.gmra.mrb[6].mxu0 %vm447_vm0, %v1924_v38  ;;  %v2605_v38 = vld [vmem:[#allocation7 + $0x1e0] sm:$0xff] }
 0x395   :  { %2041 = vmatprep.mubr.f32.mxu0 %v5063_v60  ;;  %3831 = vmatpush1.bf16.msra.mxu0 %v5077_v45  ;;  %v2788_v45 = vld [vmem:[#allocation5 + $0x10c8] sm:$0xff] }
 0x396   :  { %3897 = vmatprep.subr.bf16.mxu0 %v5078_v8  ;;  %v2790_v8 = vld [vmem:[#allocation5 + $0x10d8] sm:$0xff] }
 0x398   :  { %3244 = vmatmul.mubr.msk.f32.gmra.mrb[8].mxu0 %vm447_vm0, %v1925_v40  ;;  %v2785_v40 = vld [vmem:[#allocation5 + $0x10b0] sm:$0xff] }
 0x399   :  { %2047 = vmatprep.mubr.f32.mxu0 %v5063_v60 }
 0x39c   :  { %3245 = vmatmul.mubr.msk.f32.gmra.mrb[10].mxu0 %vm447_vm0, %v1926_v41  ;;  %v3934_v41 = vpack.c.bf16 %v2785_v40, %v2783_v6  ;;  %v2823_v40 = vld [vmem:[#allocation5 + $0x11e0] sm:$0xff] }
 0x39d   :  { %2053 = vmatprep.mubr.f32.mxu0 %v5063_v60 }
 0x3a0   :  { %3246 = vmatmul.mubr.msk.f32.gmra.mrb[12].mxu0 %vm447_vm0, %v1927_v11  ;;  %v2606_v11 = vld [vmem:[#allocation7 + $0x1e8] sm:$0xff] }
 0x3a1   :  { %2059 = vmatprep.mubr.f32.mxu0 %v5063_v60 }
 0x3a4   :  { %3247 = vmatmul.mubr.msk.f32.gmra.mrb[14].mxu0 %vm447_vm0, %v1928_v39  ;;  %v3936_v39 = vpack.c.bf16 %v2790_v8, %v2788_v45  ;;  %v2825_v45 = vld [vmem:[#allocation5 + $0x11f0] sm:$0xff] }
 0x3a5   :  { %2357 = vmatprep.mubr.f32.mxu0 %v5063_v60  ;;  %v3974_v8 = vpack.c.bf16 %v2825_v45, %v2823_v40 }
 0x3a8   :  { %3248 = vmatmul.mubr.msk.f32.vlgmr.msra.gmra.mrb[0].mxu0 %vm447_vm0, %v2261_v4  ;;  %v2787_v4 = vld [vmem:[#allocation5 + $0x10c0] sm:$0xff] }
 0x3a9   :  { %3899 = vmatpush1.bf16.msra.mxu0 %v5079_v42  ;;  %2363 = vmatprep.mubr.f32.mxu0 %v5063_v60  ;;  %v2789_v42 = vld [vmem:[#allocation5 + $0x10d0] sm:$0xff] }
 0x3aa   :  { %3901 = vmatprep.subr.bf16.mxu0 %v5080_v15  ;;  %v2794_v15 = vld [vmem:[#allocation5 + $0x10f8] sm:$0xff] }
 0x3ac   :  { %3249 = vmatmul.mubr.msk.f32.gmra.mrb[2].mxu0 %vm447_vm0, %v2262_v2  ;;  %v2792_v2 = vld [vmem:[#allocation5 + $0x10e8] sm:$0xff] }
 0x3ad   :  { %3903 = vmatpush1.bf16.msra.mxu0 %v5081_v16  ;;  %2369 = vmatprep.mubr.f32.mxu0 %v5063_v60  ;;  %v3938_v16 = vpack.c.bf16 %v2789_v42, %v2787_v4  ;;  %v5092_v4 = vld [vmem:[#allocation15_spill] sm:$0xff]  ;;  %v5093_v42 = vld [vmem:[#allocation16_spill] sm:$0xff] }
 0x3ae   :  { %3905 = vmatprep.subr.bf16.mxu0 %v5082_v26  ;;  %v3940_v26 = vpack.c.bf16 %v2794_v15, %v2792_v2  ;;  %v5094_v2 = vld [vmem:[#allocation17_spill] sm:$0xff]  ;;  %v5095_v15 = vld [vmem:[#allocation18_spill] sm:$0xff] }
 0x3b0   :  { %3250 = vmatmul.mubr.msk.f32.gmra.mrb[4].mxu0 %vm447_vm0, %v2263_v17  ;;  %v2607_v17 = vld [vmem:[#allocation7 + $0x1f0] sm:$0xff] }
 0x3b1   :  { %2375 = vmatprep.mubr.f32.mxu0 %v5063_v60  ;;  %3907 = vmatpush1.bf16.msra.mxu0 %v5083_v24  ;;  %v2798_v24 = vld [vmem:[#allocation5 + $0x1118] sm:$0xff] }
 0x3b2   :  { %3909 = vmatprep.subr.bf16.mxu0 %v5085_v27  ;;  %v2608_v27 = vld [vmem:[#allocation7 + $0x1f8] sm:$0xff] }
 0x3b4   :  { %3251 = vmatmul.mubr.msk.f32.gmra.mrb[6].mxu0 %vm447_vm0, %v2264_v19  ;;  %v2796_v19 = vld [vmem:[#allocation5 + $0x1108] sm:$0xff] }
 0x3b5   :  { %2381 = vmatprep.mubr.f32.mxu0 %v5063_v60  ;;  %3911 = vmatpush1.bf16.msra.mxu0 %v5088_v48  ;;  %v2802_v48 = vld [vmem:[#allocation5 + $0x1138] sm:$0xff] }
 0x3b6   :  { %3913 = vmatprep.subr.bf16.mxu0 %v3912_v28  ;;  %v3944_v28 = vpack.c.bf16 %v2798_v24, %v2796_v19  ;;  %v4162_v19 = vld [vmem:[#allocation2 + $0x60] sm:$0xff]  ;;  %v4163_v24 = vld [vmem:[#allocation2 + $0x78] sm:$0xff] }
 0x3b8   :  { %3252 = vmatmul.mubr.msk.f32.gmra.mrb[8].mxu0 %vm447_vm0, %v2265_v9  ;;  %v2795_v9 = vld [vmem:[#allocation5 + $0x1100] sm:$0xff] }
 0x3b9   :  { %2387 = vmatprep.mubr.f32.mxu0 %v5063_v60 }
 0x3bc   :  { %3253 = vmatmul.mubr.msk.f32.gmra.mrb[10].mxu0 %vm447_vm0, %v2266_v55  ;;  %v3946_v55 = vpack.c.bf16 %v2797_v12, %v2795_v9  ;;  %v4267_v9 = vmov 0   ;;  %v3103_v12 = vld [vmem:[%s5035_s3 + $0x8] sm:$0xff] }
 0x3bd   :  { %2393 = vmatprep.mubr.f32.mxu0 %v5063_v60  ;;  %4130 = vset.pattern.permute.xlu0 %v4267_v9 }
 0x3be   :  { %4131 = vset.pattern.permute.xlu1 %v4267_v9 }
 0x3c0   :  { %3254 = vmatmul.mubr.msk.f32.gmra.mrb[12].mxu0 %vm447_vm0, %v2267_v7  ;;  %v4157_v7 = vld [vmem:[#allocation2 + $0x8] sm:$0xff] }
 0x3c1   :  { %2399 = vmatprep.mubr.f32.mxu0 %v5063_v60 }
 0x3c4   :  { %3255 = vmatmul.mubr.msk.f32.gmra.mrb[14].mxu0 %vm447_vm0, %v2268_v50  ;;  %v3948_v50 = vpack.c.bf16 %v2802_v48, %v2800_v47  ;;  %v3105_v47 = vld [vmem:[%s5035_s3 + $0x18] sm:$0xff]  ;;  %v3106_v48 = vld [vmem:[%s5035_s3 + $0x20] sm:$0xff] }
 0x3c5   :  { %2697 = vmatprep.mubr.f32.mxu0 %v5063_v60 }
 0x3c8   :  { %3256 = vmatmul.mubr.msk.f32.vlgmr.msra.gmra.mrb[0].mxu0 %vm447_vm0, %v2601_v29  ;;  %v3950_v29 = vpack.c.bf16 %v2801_v52, %v2799_v51 }
 0x3c9   :  { %3915 = vmatpush1.bf16.msra.mxu0 %v3914_v23  ;;  %2703 = vmatprep.mubr.f32.mxu0 %v5063_v60  ;;  %v3952_v23 = vpack.c.bf16 %v2806_v56, %v2804_v53 }
 0x3ca   :  { %3917 = vmatprep.subr.bf16.mxu0 %v3916_v5  ;;  %v2803_v5 = vld [vmem:[#allocation5 + $0x1140] sm:$0xff] }
 0x3cb   :  { %v3954_v61 = vpack.c.bf16 %v2805_v31, %v2803_v5 }
 0x3cc   :  { %3257 = vmatmul.mubr.msk.f32.gmra.mrb[2].mxu0 %vm447_vm0, %v2602_v63  ;;  %v2807_v63 = vld [vmem:[#allocation5 + $0x1160] sm:$0xff] }
 0x3cd   :  { %3919 = vmatpush1.bf16.msra.mxu0 %v3918_v57  ;;  %2709 = vmatprep.mubr.f32.mxu0 %v5063_v60  ;;  %v3956_v57 = vpack.c.bf16 %v2810_v58, %v2808_v37 }
 0x3ce   :  { %3921 = vmatprep.subr.bf16.mxu0 %v3920_v54  ;;  %v2809_v54 = vld [vmem:[#allocation5 + $0x1170] sm:$0xff] }
 0x3cf   :  { %v3958_v32 = vpack.c.bf16 %v2809_v54, %v2807_v63 }
 0x3d0   :  { %3258 = vmatmul.mubr.msk.f32.gmra.mrb[4].mxu0 %vm447_vm0, %v2603_v13  ;;  %v2813_v13 = vld [vmem:[#allocation5 + $0x1190] sm:$0xff] }
 0x3d1   :  { %3923 = vmatpush1.bf16.msra.mxu0 %v3922_v18  ;;  %2715 = vmatprep.mubr.f32.mxu0 %v5063_v60  ;;  %v2811_v18 = vld [vmem:[#allocation5 + $0x1180] sm:$0xff] }
 0x3d2   :  { %3925 = vmatprep.subr.bf16.mxu0 %v3924_v46  ;;  %v2816_v46 = vld [vmem:[#allocation5 + $0x11a8] sm:$0xff]  ;;  %v3962_v0 = vpack.c.bf16 %v2813_v13, %v2811_v18 }
 0x3d3   :  { %v3964_v43 = vpack.c.bf16 %v2818_v59, %v2816_v46 }
 0x3d4   :  { %3259 = vmatmul.mubr.msk.f32.gmra.mrb[6].mxu0 %vm447_vm0, %v2604_v10  ;;  %v2820_v10 = vld [vmem:[#allocation5 + $0x11c8] sm:$0xff] }
 0x3d5   :  { %3927 = vmatpush1.bf16.msra.mxu0 %v3926_v62  ;;  %2721 = vmatprep.mubr.f32.mxu0 %v5063_v60  ;;  %v2817_v62 = vld [vmem:[#allocation5 + $0x11b0] sm:$0xff] }
 0x3d6   :  { %3929 = vmatprep.subr.bf16.mxu0 %v3928_v14  ;;  %v2822_v14 = vld [vmem:[#allocation5 + $0x11d8] sm:$0xff]  ;;  %v3966_v35 = vpack.c.bf16 %v2817_v62, %v2815_v22  ;;  %v2941_v22 = vld [vmem:[#allocation7 + $0x200] sm:$0xff]  ;;  %v2942_v62 = vld [vmem:[#allocation7 + $0x208] sm:$0xff] }
 0x3d7   :  { %v3968_v36 = vpack.c.bf16 %v2822_v14, %v2820_v10  ;;  %v2943_v10 = vld [vmem:[#allocation7 + $0x210] sm:$0xff]  ;;  %v2944_v14 = vld [vmem:[#allocation7 + $0x218] sm:$0xff] }
 0x3d8   :  { %3260 = vmatmul.mubr.msk.f32.gmra.mrb[8].mxu0 %vm447_vm0, %v2605_v38  ;;  %v2826_v38 = vld [vmem:[#allocation5 + $0x11f8] sm:$0xff] }
 0x3d9   :  { %3931 = vmatpush1.bf16.msra.mxu0 %v3930_v25  ;;  %2727 = vmatprep.mubr.f32.mxu0 %v5063_v60  ;;  %v2824_v25 = vld [vmem:[#allocation5 + $0x11e8] sm:$0xff] }
 0x3da   :  { %3933 = vmatprep.subr.bf16.mxu0 %v3932_v44  ;;  %v3970_v44 = vpack.c.bf16 %v2821_v33, %v2819_v34  ;;  %v3972_v6 = vpack.c.bf16 %v2826_v38, %v2824_v25  ;;  %v2947_v34 = vld [vmem:[#allocation7 + $0x230] sm:$0xff]  ;;  %v2948_v33 = vld [vmem:[#allocation7 + $0x238] sm:$0xff] }
 0x3dc   :  { %3261 = vmatmul.mubr.msk.f32.gmra.mrb[10].mxu0 %vm447_vm0, %v2606_v11  ;;  %v5090_v11 = vld [vmem:[#allocation13_spill] sm:$0xff] }
 0x3dd   :  { %3935 = vmatpush1.bf16.msra.mxu0 %v3934_v41  ;;  %2733 = vmatprep.mubr.f32.mxu0 %v5063_v60  ;;  %v5089_v41 = vld [vmem:[#allocation12_spill] sm:$0xff] }
 0x3de   :  { %3937 = vmatprep.subr.bf16.mxu0 %v3936_v39  ;;  %v5091_v39 = vld [vmem:[#allocation14_spill] sm:$0xff] }
 0x3e0   :  { %3262 = vmatmul.mubr.msk.f32.gmra.mrb[12].mxu0 %vm447_vm0, %v2607_v17  ;;  %v4158_v17 = vld [vmem:[#allocation2 + $0x40] sm:$0xff] }
 0x3e1   :  { %3939 = vmatpush1.bf16.msra.mxu0 %v3938_v16  ;;  %2739 = vmatprep.mubr.f32.mxu0 %v5063_v60  ;;  %v5096_v16 = vld [vmem:[#allocation19_spill] sm:$0xff] }
 0x3e2   :  { %3941 = vmatprep.subr.bf16.mxu0 %v3940_v26  ;;  %v4159_v26 = vld [vmem:[#allocation2 + $0x58] sm:$0xff] }
 0x3e4   :  { %3263 = vmatmul.mubr.msk.f32.gmra.mrb[14].mxu0 %vm447_vm0, %v2608_v27  ;;  %v3102_v27 = vld [vmem:[%s5035_s3] sm:$0xff] }
 0x3e5   :  { %3943 = vmatpush1.bf16.msra.mxu0 %v3942_v30  ;;  %2891 = vmatprep.mubr.f32.mxu0 %v4157_v7  ;;  %v4164_v30 = vld [vmem:[#allocation2 + $0x70] sm:$0xff]  ;;  %v3109_v7 = vld [vmem:[%s5035_s3 + $0x38] sm:$0xff] }
 0x3e6   :  { %3945 = vmatprep.subr.bf16.mxu0 %v3944_v28  ;;  %v3104_v28 = vld [vmem:[%s5035_s3 + $0x10] sm:$0xff]  ;;  %3112 = vperm.xlu0 %4130, %v3102_v27  }
 0x3e7   :  { %3122 = vperm.xlu1 %4131, %v3104_v28  }
 0x3e9   :  { %3947 = vmatpush1.bf16.msra.mxu0 %v3946_v55  ;;  %v3107_v55 = vld [vmem:[%s5035_s3 + $0x28] sm:$0xff] }
 0x3ea   :  { %3949 = vmatprep.subr.bf16.mxu0 %v3948_v50  ;;  %3117 = vperm.xlu0 %4130, %v3103_v12   ;;  %v3108_v50 = vld [vmem:[%s5035_s3 + $0x30] sm:$0xff]  ;;  %s4268_s3 = smov [#allocation8]  }
 0x3eb   :  { %3127 = vperm.xlu1 %4131, %v3105_v47   ;;  %s3187_s17 = sshll.u32 %s4268_s3, 4  ;;  %s3188_s17 = int_to_ptr.vmem [resolvable:$true] %s3187_s17 }
 0x3ec   :  { %s4231_s19 = scalar_lea.vmem %s3188_s17, 2048  ;;  %p4236_p11 = scmp.lt.s32.totalorder %s3188_s17, %s3188_s17 }
 0x3ed   :  { %3951 = vmatpush1.bf16.msra.mxu0 %v3950_v29  ;;  %p4232_p10 = scmp.ne.s32.totalorder %s3188_s17, %s4231_s19  ;;  %p4237_p12 = scmp.lt.s32.totalorder %s4231_s19, %s4231_s19 }
 0x3ee   :  { %3953 = vmatprep.subr.bf16.mxu0 %v3952_v23  ;;  %3132 = vperm.xlu0 %4130, %v3106_v48  }
 0x3ef   :  { %3137 = vperm.xlu1 %4131, %v3107_v55   ;;  %p4238_p13 = por %p4237_p12, %p4236_p11 }
 0x3f1   :  { %3955 = vmatpush1.bf16.msra.mxu0 %v3954_v61  ;;  %p4239_p0 = pnand %p4238_p13, %p4232_p10 }
 0x3f2   :  { %3957 = vmatprep.subr.bf16.mxu0 %v3956_v57  ;;  %3142 = vperm.xlu0 %4130, %v3108_v50  }
 0x3f3   :  { %3147 = vperm.xlu1 %4131, %v3109_v7  }
 0x3f5   :  { %3959 = vmatpush1.bf16.msra.mxu0 %v3958_v32 }
 0x3f6   :  { %3961 = vmatprep.subr.bf16.mxu0 %v3960_v49 }
 0x3f9   :  { %3963 = vmatpush1.bf16.msra.mxu0 %v3962_v0 }
 0x3fa   :  { %3965 = vmatprep.subr.bf16.mxu0 %v3964_v43 }
 0x3fd   :  { %3967 = vmatpush1.bf16.msra.mxu0 %v3966_v35  ;;  %v2945_v35 = vld [vmem:[#allocation7 + $0x220] sm:$0xff] }
 0x3fe   :  { %3969 = vmatprep.subr.bf16.mxu0 %v3968_v36  ;;  %v2946_v36 = vld [vmem:[#allocation7 + $0x228] sm:$0xff] }
 0x401   :  { %3971 = vmatpush1.bf16.msra.mxu0 %v3970_v44 }
 0x402   :  { %3973 = vmatprep.subr.bf16.mxu0 %v3972_v6 }
 0x405   :  { %3975 = vmatpush1.bf16.msra.mxu0 %v3974_v8 }
 0x408   :  { %2892 = vmatmul.mubr.f32.vlgmr.msra.gmra.mrb[32].mxu0 %v5089_v41 }
 0x409   :  { %2897 = vmatprep.mubr.f32.mxu0 %v5090_v11 }
 0x40c   :  { %2898 = vmatmul.mubr.f32.gmra.mrb[34].mxu0 %v5091_v39 }
 0x40d   :  { %2903 = vmatprep.mubr.f32.mxu0 %v5092_v4 }
 0x410   :  { %2904 = vmatmul.mubr.f32.gmra.mrb[36].mxu0 %v5093_v42 }
 0x411   :  { %2909 = vmatprep.mubr.f32.mxu0 %v5094_v2 }
 0x414   :  { %2910 = vmatmul.mubr.f32.gmra.mrb[38].mxu0 %v5095_v15 }
 0x415   :  { %2915 = vmatprep.mubr.f32.mxu0 %v5096_v16 }
 0x418   :  { %2916 = vmatmul.mubr.f32.gmra.mrb[40].mxu0 %v4158_v17 }
 0x419   :  { %2921 = vmatprep.mubr.f32.mxu0 %v4159_v26 }
 0x41c   :  { %2922 = vmatmul.mubr.f32.gmra.mrb[42].mxu0 %v4160_v20 }
 0x41d   :  { %2927 = vmatprep.mubr.f32.mxu0 %v4161_v21 }
 0x420   :  { %2928 = vmatmul.mubr.f32.gmra.mrb[44].mxu0 %v4162_v19 }
 0x421   :  { %2933 = vmatprep.mubr.f32.mxu0 %v4163_v24 }
 0x424   :  { %2934 = vmatmul.mubr.f32.gmra.mrb[46].mxu0 %v4164_v30 }
 0x425   :  { %3037 = vmatprep.mubr.f32.mxu0 %v5063_v60 }
 0x465   :  { %v3113_v25 = vpop.permute.xlu0 %3112 }
 0x466   :  { %v3123_v4 = vpop.permute.xlu1 %3122 }
 0x469   :  { %v3118_v45 = vpop.permute.xlu0 %3117 }
 0x46a   :  { %v3128_v16 = vpop.permute.xlu1 %3127 }
 0x46d   :  { %v3133_v19 = vpop.permute.xlu0 %3132 }
 0x46e   :  { %v3138_v9 = vpop.permute.xlu1 %3137 }
 0x471   :  { %v3143_v7 = vpop.permute.xlu0 %3142 }
 0x4db   :  { %v2893_v51 = vpop.f32.mrb[32].mxu0 }
 0x4dc   :  { %v2895_v52 = vpop.f32.mrb[33].mxu0 }
 0x4df   :  { %v2899_v53 = vpop.f32.mrb[34].mxu0 }
 0x4e0   :  { %v3978_v56 = vpack.c.bf16 %v2899_v53, %v2893_v51  ;;  %v2901_v29 = vpop.f32.mrb[35].mxu0 }
 0x4e1   :  { %v3976_v23 = vpack.c.bf16 %v2901_v29, %v2895_v52 }
 0x4e3   :  { %v2905_v5 = vpop.f32.mrb[36].mxu0  ;;  %3977 = vmatprep.subr.bf16.mxu0 %v3976_v23 }
 0x4e4   :  { %v2907_v31 = vpop.f32.mrb[37].mxu0  ;;  %3979 = vmatpush1.bf16.msra.mxu0 %v3978_v56  ;;  %v3148_v56 = vpop.permute.xlu1 %3147 }
 0x4e7   :  { %v2911_v37 = vpop.f32.mrb[38].mxu0 }
 0x4e8   :  { %v3982_v58 = vpack.c.bf16 %v2911_v37, %v2905_v5  ;;  %v2913_v61 = vpop.f32.mrb[39].mxu0 }
 0x4e9   :  { %v3980_v57 = vpack.c.bf16 %v2913_v61, %v2907_v31 }
 0x4eb   :  { %v2917_v63 = vpop.f32.mrb[40].mxu0  ;;  %3981 = vmatprep.subr.bf16.mxu0 %v3980_v57 }
 0x4ec   :  { %v2919_v54 = vpop.f32.mrb[41].mxu0  ;;  %3983 = vmatpush1.bf16.msra.mxu0 %v3982_v58 }
 0x4ef   :  { %v2923_v1 = vpop.f32.mrb[42].mxu0 }
 0x4f0   :  { %v3986_v3 = vpack.c.bf16 %v2923_v1, %v2917_v63  ;;  %v2925_v32 = vpop.f32.mrb[43].mxu0 }
 0x4f1   :  { %v3984_v49 = vpack.c.bf16 %v2925_v32, %v2919_v54 }
 0x4f3   :  { %v2929_v18 = vpop.f32.mrb[44].mxu0  ;;  %3985 = vmatprep.subr.bf16.mxu0 %v3984_v49 }
 0x4f4   :  { %v2931_v13 = vpop.f32.mrb[45].mxu0  ;;  %3987 = vmatpush1.bf16.msra.mxu0 %v3986_v3 }
 0x4f7   :  { %v2935_v46 = vpop.f32.mrb[46].mxu0 }
 0x4f8   :  { %v3990_v59 = vpack.c.bf16 %v2935_v46, %v2929_v18  ;;  %v2937_v0 = vpop.f32.mrb[47].mxu0 }
 0x4f9   :  { %v3988_v43 = vpack.c.bf16 %v2937_v0, %v2931_v13 }
 0x4fb   :  { %3989 = vmatprep.subr.bf16.mxu0 %v3988_v43 }
 0x4fc   :  { %3991 = vmatpush1.bf16.msra.mxu0 %v3990_v59 }
 0x4ff   :  { %3264 = vmatmul.mubr.msk.f32.vlgmr.msra.gmra.mrb[0].mxu0 %vm447_vm0, %v2941_v22 }
 0x500   :  { %3043 = vmatprep.mubr.f32.mxu0 %v5063_v60 }
 0x503   :  { %3265 = vmatmul.mubr.msk.f32.gmra.mrb[2].mxu0 %vm447_vm0, %v2942_v62 }
 0x504   :  { %3049 = vmatprep.mubr.f32.mxu0 %v5063_v60 }
 0x507   :  { %3266 = vmatmul.mubr.msk.f32.gmra.mrb[4].mxu0 %vm447_vm0, %v2943_v10 }
 0x508   :  { %3055 = vmatprep.mubr.f32.mxu0 %v5063_v60 }
 0x50b   :  { %3267 = vmatmul.mubr.msk.f32.gmra.mrb[6].mxu0 %vm447_vm0, %v2944_v14 }
 0x50c   :  { %3061 = vmatprep.mubr.f32.mxu0 %v5063_v60 }
 0x50f   :  { %3268 = vmatmul.mubr.msk.f32.gmra.mrb[8].mxu0 %vm447_vm0, %v2945_v35 }
 0x510   :  { %3067 = vmatprep.mubr.f32.mxu0 %v5063_v60 }
 0x513   :  { %3269 = vmatmul.mubr.msk.f32.gmra.mrb[10].mxu0 %vm447_vm0, %v2946_v36 }
 0x514   :  { %3073 = vmatprep.mubr.f32.mxu0 %v5063_v60 }
 0x517   :  { %3270 = vmatmul.mubr.msk.f32.gmra.mrb[12].mxu0 %vm447_vm0, %v2947_v34 }
 0x518   :  { %3079 = vmatprep.mubr.f32.mxu0 %v5063_v60 }
 0x51b   :  { %3271 = vmatmul.mubr.msk.f32.gmra.mrb[14].mxu0 %vm447_vm0, %v2948_v33 }
 0x5d2   :  { %v3039_v38 = vpop.f32.mrb[0].mxu0 }
 0x5d3   :  { %v3150_v44 = vadd.f32 %v3113_v25, %v3039_v38  ;;  %v3041_v6 = vpop.f32.mrb[1].mxu0 }
 0x5d4   :  { %v3151_v40 = vadd.f32 %v3113_v25, %v3041_v6 }
 0x5d5   :  { %3166 = vst [vmem:[#allocation8] sm:$0xff] %v3150_v44 }
 0x5d6   :  { %3167 = vst [vmem:[#allocation8 + $0x8] sm:$0xff] %v3151_v40  ;;  %v3045_v8 = vpop.f32.mrb[2].mxu0 }
 0x5d7   :  { %v3152_v41 = vadd.f32 %v3118_v45, %v3045_v8  ;;  %v3047_v11 = vpop.f32.mrb[3].mxu0 }
 0x5d8   :  { %v3153_v39 = vadd.f32 %v3118_v45, %v3047_v11 }
 0x5d9   :  { %3168 = vst [vmem:[#allocation8 + $0x10] sm:$0xff] %v3152_v41 }
 0x5da   :  { %3169 = vst [vmem:[#allocation8 + $0x18] sm:$0xff] %v3153_v39  ;;  %v3051_v42 = vpop.f32.mrb[4].mxu0 }
 0x5db   :  { %v3154_v60 = vadd.f32 %v3123_v4, %v3051_v42  ;;  %v3053_v2 = vpop.f32.mrb[5].mxu0 }
 0x5dc   :  { %v3155_v15 = vadd.f32 %v3123_v4, %v3053_v2 }
 0x5dd   :  { %3170 = vst [vmem:[#allocation8 + $0x20] sm:$0xff] %v3154_v60 }
 0x5de   :  { %3171 = vst [vmem:[#allocation8 + $0x28] sm:$0xff] %v3155_v15  ;;  %v3057_v17 = vpop.f32.mrb[6].mxu0 }
 0x5df   :  { %v3156_v26 = vadd.f32 %v3128_v16, %v3057_v17  ;;  %v3059_v20 = vpop.f32.mrb[7].mxu0 }
 0x5e0   :  { %v3157_v21 = vadd.f32 %v3128_v16, %v3059_v20 }
 0x5e1   :  { %3172 = vst [vmem:[#allocation8 + $0x30] sm:$0xff] %v3156_v26 }
 0x5e2   :  { %3173 = vst [vmem:[#allocation8 + $0x38] sm:$0xff] %v3157_v21  ;;  %v3063_v24 = vpop.f32.mrb[8].mxu0 }
 0x5e3   :  { %v3158_v30 = vadd.f32 %v3133_v19, %v3063_v24  ;;  %v3065_v27 = vpop.f32.mrb[9].mxu0 }
 0x5e4   :  { %v3159_v28 = vadd.f32 %v3133_v19, %v3065_v27 }
 0x5e5   :  { %3174 = vst [vmem:[#allocation8 + $0x40] sm:$0xff] %v3158_v30 }
 0x5e6   :  { %3175 = vst [vmem:[#allocation8 + $0x48] sm:$0xff] %v3159_v28  ;;  %v3069_v12 = vpop.f32.mrb[10].mxu0 }
 0x5e7   :  { %v3160_v47 = vadd.f32 %v3138_v9, %v3069_v12  ;;  %v3071_v48 = vpop.f32.mrb[11].mxu0 }
 0x5e8   :  { %v3161_v55 = vadd.f32 %v3138_v9, %v3071_v48 }
 0x5e9   :  { %3176 = vst [vmem:[#allocation8 + $0x50] sm:$0xff] %v3160_v47 }
 0x5ea   :  { %3177 = vst [vmem:[#allocation8 + $0x58] sm:$0xff] %v3161_v55  ;;  %v3075_v50 = vpop.f32.mrb[12].mxu0 }
 0x5eb   :  { %v3162_v51 = vadd.f32 %v3143_v7, %v3075_v50  ;;  %v3077_v52 = vpop.f32.mrb[13].mxu0 }
 0x5ec   :  { %v3163_v53 = vadd.f32 %v3143_v7, %v3077_v52 }
 0x5ed   :  { %3178 = vst [vmem:[#allocation8 + $0x60] sm:$0xff] %v3162_v51 }
 0x5ee   :  { %3179 = vst [vmem:[#allocation8 + $0x68] sm:$0xff] %v3163_v53  ;;  %v3081_v29 = vpop.f32.mrb[14].mxu0 }
 0x5ef   :  { %v3164_v23 = vadd.f32 %v3148_v56, %v3081_v29  ;;  %v3083_v5 = vpop.f32.mrb[15].mxu0 }
 0x5f0   :  { %v3165_v31 = vadd.f32 %v3148_v56, %v3083_v5 }
 0x5f1   :  { %3180 = vst [vmem:[#allocation8 + $0x70] sm:$0xff] %v3164_v23 }
 0x5f2   :  { %3181 = vst [vmem:[#allocation8 + $0x78] sm:$0xff] %v3165_v31 }
 0x5f3   :  { %4242 = shalt.err (!%p4239_p0)
}
 0x5f4   :  { %s4243_s22 = scalar_lea.hbm %s5036_s4, 2048 }
 0x5f5   :  { %p4244_p1 = scmp.ne.s32.totalorder %s5036_s4, %s4243_s22  ;;  %p4247_p2 = scmp.lt.u32.totalorder %s4243_s22, %s5036_s4 }
 0x5f7   :  { %p4249_p3 = pnand %p4247_p2, %p4244_p1 }
 0x5f9   :  { %4252 = shalt.err (!%p4249_p3)
}
 0x5fa   :  { %3193 = dma.vmem_to_hbm [thread:$0]  %s3188_s17, 2048, %s5036_s4, [#allocation4], %s4261_s27, %s4261_s27, %s4262_s28  }
 0x5fb   :  { %4257 = dma.done.wait [#allocation4], 2048  }
 0x5fc   :  { %4258 = vsyncadd [#allocation4], 4294965248 }
 0x5fd   :  { %3197 = vsyncpa [#allocation3], 1 }
 0x5fe   :  { %3198 = vsyncpa [#allocation6], 1 }
 0x5ff   :  { %3199 = vsyncpa [#allocation4], 1 }

</bundles_post_ra>
